<compile_context>
chip_gen: v5e
topology: v5e:2x2
jax: 0.10.0
libtpu: 0.0.40
codegen_flags: <defaults>
</compile_context>

<pallas_src>
import math

import jax
import jax.numpy as jnp
from jax.experimental import pallas as pl
from jax.experimental.pallas import tpu as pltpu


# ----------------------------- small helpers -------------------------------------------------

_SQRT_2_OVER_PI = math.sqrt(2.0 / math.pi)


def _gelu(x):
    # TODO(synk): torch.nn.functional.gelu default is the exact erf form; the tanh
    # approximation is used here because tanh lowers to the EUP on all TPU generations.
    return 0.5 * x * (1.0 + jnp.tanh(_SQRT_2_OVER_PI * (x + 0.044715 * x * x * x)))


def _block_diag_fold(blocks, head_scale=None):
    """[E, H, D, D] per-head relation mats -> [E, H*D, H*D] block-diagonal matrices.

    Optionally scales head h of edge type e by head_scale[e, h] (folds p_rel/sqrt(D) into
    a_rel so no per-head scalar multiply is needed in-kernel).  Host-side, setup-time only.
    """
    e, h, d, _ = blocks.shape
    out = jnp.zeros((e, h * d, h * d), jnp.float32)
    for i in range(h):
        blk = blocks[:, i]
        if head_scale is not None:
            blk = blk * head_scale[:, i][:, None, None]
        out = out.at[:, i * d:(i + 1) * d, i * d:(i + 1) * d].set(blk)
    return out


# ----------------------------- the single fused forward kernel -------------------------------

def _build_forward_kernel(node_order, node_slices, edge_types, heads, head_dim,
                          num_layers, out_rows):
    n_types = len(node_order)
    n_edges = len(edge_types)
    hidden = heads * head_dim
    edge_list = [(src, dst) for (src, _, dst) in edge_types]
    # group edge-type indices by destination type -> short accumulator live ranges
    dst_edges = {nt: [(e, src) for e, (src, dst) in enumerate(edge_list) if dst == nt]
                 for nt in node_order}

    def kernel(*refs):
        idx = 0
        x_refs = refs[idx:idx + n_types]; idx += n_types
        we_refs = refs[idx:idx + n_types]; idx += n_types
        be_refs = refs[idx:idx + n_types]; idx += n_types
        (wk_ref, wq_ref, wv_ref, bk_ref, bq_ref, bv_ref,
         wa_ref, ba_ref, arel_ref, mrel_ref) = refs[idx:idx + 10]; idx += 10
        bias_refs = refs[idx:idx + n_edges]; idx += n_edges
        wo_ref, bo_ref, skip_ref = refs[idx:idx + 3]; idx += 3
        o_ref = refs[idx]; idx += 1
        xs_ref = refs[idx]                       # VMEM scratch [N_total, hidden], f32

        # ---- encode: per-type Linear + relu; direct sublane-aligned sub-stores ----
        for t, nt in enumerate(node_order):
            lo, hi = node_slices[nt]
            y = jnp.dot(x_refs[t][...], we_refs[t][...],
                        preferred_element_type=jnp.float32) + be_refs[t][...]
            xs_ref[lo:hi, :] = jnp.maximum(y, 0.0)

        # ---- HGTConv layers (unrolled); activations stay resident in VMEM scratch ----
        for l in range(num_layers):
            x_old, k_t, q_t, v_t = {}, {}, {}, {}
            for t, nt in enumerate(node_order):
                lo, hi = node_slices[nt]
                xv = xs_ref[lo:hi, :]
                x_old[nt] = xv
                k_t[nt] = jnp.dot(xv, wk_ref[l, t],
                                  preferred_element_type=jnp.float32) + bk_ref[l, t]
                q_t[nt] = jnp.dot(xv, wq_ref[l, t],
                                  preferred_element_type=jnp.float32) + bq_ref[l, t]
                v_t[nt] = jnp.dot(xv, wv_ref[l, t],
                                  preferred_element_type=jnp.float32) + bv_ref[l, t]

            for t, nt in enumerate(node_order):
                lo, hi = node_slices[nt]
                n_dst = hi - lo
                msg = jnp.zeros((n_dst, hidden), jnp.float32)

                # per-edge-type attention + aggregation (group='sum' over edge types)
                for e, src in dst_edges[nt]:
                    # block-diagonal per-head relation transforms; p_rel/sqrt(D) pre-folded
                    kt = jnp.dot(k_t[src], arel_ref[l, e],
                                 preferred_element_type=jnp.float32)      # [Ns, HD]
                    vt = jnp.dot(v_t[src], mrel_ref[l, e],
                                 preferred_element_type=jnp.float32)      # [Ns, HD]
                    kt_T = kt.T                          # single XLU transpose per edge type
                    bias = bias_refs[e][...]             # [Nd, Ns], 0 for edge / -1e30 else
                    q_dst = q_t[nt]
                    head_out = []
                    for h in range(heads):               # H is small; unrolled
                        sl = slice(h * head_dim, (h + 1) * head_dim)
                        s = jnp.dot(q_dst[:, sl], kt_T[sl, :],
                                    preferred_element_type=jnp.float32) + bias
                        smax = jnp.max(s, axis=-1, keepdims=True)
                        p = jnp.exp(s - smax)            # masked entries underflow to 0
                        denom = jnp.sum(p, axis=-1, keepdims=True)
                        gate = (smax > -1e20).astype(jnp.float32)  # zero isolated dst rows
                        alpha = p * (gate / denom)       # exact division (denom >= 1)
                        head_out.append(jnp.dot(alpha, vt[:, sl],
                                                preferred_element_type=jnp.float32))
                    msg = msg + jnp.concatenate(head_out, axis=-1)

                # a_lin(gelu(msg)) + gated skip; direct sub-store (no node-axis concat)
                out_t = jnp.dot(_gelu(msg), wa_ref[l, t],
                                preferred_element_type=jnp.float32) + ba_ref[l, t]
                a = skip_ref[l, t]                       # scalar from SMEM (sigmoid(skip))
                xs_ref[lo:hi, :] = a * out_t + (1.0 - a) * x_old[nt]

        # ---- decode head on 'NLRoot' rows only ----
        lo, hi = out_rows
        y = jnp.dot(xs_ref[lo:hi, :], wo_ref[...],
                    preferred_element_type=jnp.float32) + bo_ref[...]
        o_ref[...] = y.astype(o_ref.dtype)

    return kernel


def hgt_forward(prep, x_dict, node_order, node_slices, edge_types, heads,
                num_layers, out_ch):
    """Single pallas_call for the whole forward pass."""
    hidden = prep['w_k'].shape[-1]
    head_dim = hidden // heads
    n_total = max(hi for _, hi in node_slices.values())
    out_rows = node_slices['NLRoot']

    xs = [x_dict[nt] for nt in node_order]
    dense_inputs = (xs + prep['w_enc'] + prep['b_enc']
                    + [prep['w_k'], prep['w_q'], prep['w_v'],
                       prep['b_k'], prep['b_q'], prep['b_v'],
                       prep['w_a'], prep['b_a'],
                       prep['a_rel_bd'], prep['m_rel_bd']]
                    + prep['edge_biases']
                    + [prep['w_out'], prep['b_out']])
    inputs = dense_inputs + [prep['skip_alpha']]

    in_specs = ([pl.BlockSpec(memory_space=pltpu.MemorySpace.VMEM)] * len(dense_inputs)
                + [pl.BlockSpec(memory_space=pltpu.MemorySpace.SMEM)])   # skip_alpha scalars

    kernel = _build_forward_kernel(node_order, node_slices, edge_types, heads,
                                   head_dim, num_layers, out_rows)
    return pl.pallas_call(
        kernel,
        out_shape=jax.ShapeDtypeStruct((out_rows[1] - out_rows[0], out_ch), jnp.float32),
        in_specs=in_specs,
        out_specs=pl.BlockSpec(memory_space=pltpu.MemorySpace.VMEM),
        scratch_shapes=[pltpu.VMEM((n_total, hidden), jnp.float32)],   # resident activations
    )(*inputs)


# ----------------------------- parameter init & one-time prepare -----------------------------

def init_hgt_params(key, node_order, edge_types, in_dims, hidden, out_ch, heads, layers):
    d = hidden // heads
    n_types, n_edges = len(node_order), len(edge_types)
    keys = iter(jax.random.split(key, 1024))

    def lin(fin, fout):
        w = jax.random.normal(next(keys), (fin, fout), jnp.float32) / math.sqrt(fin)
        b = jax.random.normal(next(keys), (1, fout), jnp.float32) * 0.02
        return {'w': w, 'b': b}

    def typed_lin(fin, fout):
        w = jax.random.normal(next(keys), (n_types, fin, fout), jnp.float32) / math.sqrt(fin)
        b = jax.random.normal(next(keys), (n_types, 1, fout), jnp.float32) * 0.02
        return w, b

    params = {
        'hidden': hidden,
        'lin_dict': {nt: lin(in_dims[nt], hidden) for nt in node_order},
        'convs': [],
        'lin': lin(hidden, out_ch),
    }
    for _ in range(layers):
        w_k, b_k = typed_lin(hidden, hidden)
        w_q, b_q = typed_lin(hidden, hidden)
        w_v, b_v = typed_lin(hidden, hidden)
        w_a, b_a = typed_lin(hidden, hidden)
        layer = {
            'w_k': w_k, 'b_k': b_k, 'w_q': w_q, 'b_q': b_q, 'w_v': w_v, 'b_v': b_v,
            'w_a': w_a, 'b_a': b_a,
            'skip': jnp.ones((n_types,), jnp.float32),          # PyG default init
            'a_rel': jax.random.normal(next(keys), (n_edges, heads, d, d),
                                       jnp.float32) / math.sqrt(d),
            'm_rel': jax.random.normal(next(keys), (n_edges, heads, d, d),
                                       jnp.float32) / math.sqrt(d),
            'p_rel': jnp.ones((n_edges, heads), jnp.float32),   # PyG p_rel init = ones
        }
        params['convs'].append(layer)
    return params


def prepare_model(params, masks, node_order, edge_types, heads):
    """One-time host-side folds (NOT on the per-forward path)."""
    hidden = params['hidden']
    d = hidden // heads
    convs = params['convs']
    stack = lambda k: jnp.stack([lp[k] for lp in convs], axis=0)

    prep = {
        'w_enc': [params['lin_dict'][nt]['w'] for nt in node_order],
        'b_enc': [params['lin_dict'][nt]['b'] for nt in node_order],
        'w_k': stack('w_k'), 'w_q': stack('w_q'), 'w_v': stack('w_v'),
        'b_k': stack('b_k'), 'b_q': stack('b_q'), 'b_v': stack('b_v'),
        'w_a': stack('w_a'), 'b_a': stack('b_a'),
        # [L, E, H*D, H*D]; p_rel/sqrt(D) folded into a_rel
        'a_rel_bd': jnp.stack([_block_diag_fold(lp['a_rel'], lp['p_rel'] / math.sqrt(d))
                               for lp in convs], axis=0),
        'm_rel_bd': jnp.stack([_block_diag_fold(lp['m_rel']) for lp in convs], axis=0),
        'skip_alpha': jax.nn.sigmoid(stack('skip')),            # [L, T] SMEM scalars
        # additive attention masks (0 / -1e30), built once, reused by every layer
        # TODO(synk): sparse COO edge_index is represented as a dense per-edge-type
        # adjacency mask (equivalent masked-softmax semantics; no scatter kernel needed).
        'edge_biases': [jnp.where(masks[et] > 0.5, 0.0, -1e30).astype(jnp.float32)
                        for et in edge_types],
        'w_out': params['lin']['w'], 'b_out': params['lin']['b'],
    }
    return jax.block_until_ready(prep)


# ----------------------------- main ------------------------------------------------------------

if __name__ == "__main__":
    hidden_channels, out_channels, num_heads, num_layers = 32, 4, 2, 2
    node_types = ['NLRoot', 'Code']
    edge_types = [('Code', 'to', 'NLRoot'),
                  ('NLRoot', 'rev_to', 'Code'),
                  ('Code', 'next', 'Code')]
    num_nodes = {'NLRoot': 8, 'Code': 16}       # multiples of 8 -> sublane-aligned sub-stores
    in_dims = {'NLRoot': 12, 'Code': 20}

    # static node-table layout: NLRoot rows [0,8), Code rows [8,24)
    node_slices = {}
    off = 0
    for nt in node_types:
        node_slices[nt] = (off, off + num_nodes[nt])
        off += num_nodes[nt]

    key = jax.random.PRNGKey(0)
    k_feat, k_edge, k_par = jax.random.split(key, 3)

    x_dict = {nt: jax.random.normal(kk, (num_nodes[nt], in_dims[nt]), jnp.float32)
              for nt, kk in zip(node_types, jax.random.split(k_feat, len(node_types)))}

    masks = {}
    for et, kk in zip(edge_types, jax.random.split(k_edge, len(edge_types))):
        src, _, dst = et
        masks[et] = jax.random.bernoulli(
            kk, 0.4, (num_nodes[dst], num_nodes[src])).astype(jnp.float32)

    params = init_hgt_params(k_par, node_types, edge_types, in_dims,
                             hidden_channels, out_channels, num_heads, num_layers)
    prep = prepare_model(params, masks, node_types, edge_types, num_heads)

    out = hgt_forward(prep, x_dict, node_types, node_slices, edge_types,
                      num_heads, num_layers, out_channels)
    out = jax.block_until_ready(out)
    assert out.shape == (num_nodes['NLRoot'], out_channels)
    assert bool(jnp.all(jnp.isfinite(out)))
    print("KERNEL_OK")
</pallas_src>

<mosaic_0001>
module attributes {stable_mosaic.version = 11 : i64} {
  func.func @kernel(%arg0: memref<8x12xf32, #tpu.memory_space<vmem>>, %arg1: memref<16x20xf32, #tpu.memory_space<vmem>>, %arg2: memref<12x32xf32, #tpu.memory_space<vmem>>, %arg3: memref<20x32xf32, #tpu.memory_space<vmem>>, %arg4: memref<1x32xf32, #tpu.memory_space<vmem>>, %arg5: memref<1x32xf32, #tpu.memory_space<vmem>>, %arg6: memref<2x2x32x32xf32, #tpu.memory_space<vmem>>, %arg7: memref<2x2x32x32xf32, #tpu.memory_space<vmem>>, %arg8: memref<2x2x32x32xf32, #tpu.memory_space<vmem>>, %arg9: memref<2x2x1x32xf32, #tpu.memory_space<vmem>>, %arg10: memref<2x2x1x32xf32, #tpu.memory_space<vmem>>, %arg11: memref<2x2x1x32xf32, #tpu.memory_space<vmem>>, %arg12: memref<2x2x32x32xf32, #tpu.memory_space<vmem>>, %arg13: memref<2x2x1x32xf32, #tpu.memory_space<vmem>>, %arg14: memref<2x3x32x32xf32, #tpu.memory_space<vmem>>, %arg15: memref<2x3x32x32xf32, #tpu.memory_space<vmem>>, %arg16: memref<8x16xf32, #tpu.memory_space<vmem>>, %arg17: memref<16x8xf32, #tpu.memory_space<vmem>>, %arg18: memref<16x16xf32, #tpu.memory_space<vmem>>, %arg19: memref<32x4xf32, #tpu.memory_space<vmem>>, %arg20: memref<1x4xf32, #tpu.memory_space<vmem>>, %arg21: memref<2x2xf32, #tpu.memory_space<smem>>, %arg22: memref<8x4xf32, #tpu.memory_space<vmem>>, %arg23: memref<24x32xf32, #tpu.memory_space<vmem>>) attributes {dimension_semantics = [], scalar_prefetch = 0 : i64, scratch_operands = 1 : i64, tpu.core_type = #tpu.core_type<tc>} {
    %c0 = arith.constant 0 : index
    %c0_0 = arith.constant 0 : index
    %0 = vector.load %arg0[%c0, %c0_0] : memref<8x12xf32, #tpu.memory_space<vmem>>, vector<8x12xf32>
    %c0_1 = arith.constant 0 : index
    %c0_2 = arith.constant 0 : index
    %1 = vector.load %arg2[%c0_1, %c0_2] : memref<12x32xf32, #tpu.memory_space<vmem>>, vector<12x32xf32>
    %cst = arith.constant dense<0.000000e+00> : vector<8x32xf32>
    %2 = tpu.matmul %0, %1, %cst {dimension_numbers = #tpu.dot_dimension_numbers<[1], [0], [0], [1], [0, 0, 1, 1], [], []>} : vector<8x12xf32>, vector<12x32xf32>, vector<8x32xf32> -> vector<8x32xf32>
    %c0_3 = arith.constant 0 : index
    %c0_4 = arith.constant 0 : index
    %3 = vector.load %arg4[%c0_3, %c0_4] : memref<1x32xf32, #tpu.memory_space<vmem>>, vector<1x32xf32>
    %4 = vector.broadcast %3 : vector<1x32xf32> to vector<8x32xf32>
    %5 = arith.addf %2, %4 : vector<8x32xf32>
    %cst_5 = arith.constant 0.000000e+00 : f32
    %6 = vector.broadcast %cst_5 : f32 to vector<8x32xf32>
    %7 = arith.maximumf %5, %6 : vector<8x32xf32>
    %c0_6 = arith.constant 0 : index
    %c0_7 = arith.constant 0 : index
    %8 = vector.load %arg23[%c0_6, %c0_7] : memref<24x32xf32, #tpu.memory_space<vmem>>, vector<8x32xf32>
    tpu.vector_store %arg23[%c0_6, %c0_7], %7 {strides = array<i32>} : memref<24x32xf32, #tpu.memory_space<vmem>>, vector<8x32xf32>,
    %c0_8 = arith.constant 0 : index
    %c0_9 = arith.constant 0 : index
    %9 = vector.load %arg1[%c0_8, %c0_9] : memref<16x20xf32, #tpu.memory_space<vmem>>, vector<16x20xf32>
    %c0_10 = arith.constant 0 : index
    %c0_11 = arith.constant 0 : index
    %10 = vector.load %arg3[%c0_10, %c0_11] : memref<20x32xf32, #tpu.memory_space<vmem>>, vector<20x32xf32>
    %cst_12 = arith.constant dense<0.000000e+00> : vector<16x32xf32>
    %11 = tpu.matmul %9, %10, %cst_12 {dimension_numbers = #tpu.dot_dimension_numbers<[1], [0], [0], [1], [0, 0, 1, 1], [], []>} : vector<16x20xf32>, vector<20x32xf32>, vector<16x32xf32> -> vector<16x32xf32>
    %c0_13 = arith.constant 0 : index
    %c0_14 = arith.constant 0 : index
    %12 = vector.load %arg5[%c0_13, %c0_14] : memref<1x32xf32, #tpu.memory_space<vmem>>, vector<1x32xf32>
    %13 = vector.broadcast %12 : vector<1x32xf32> to vector<16x32xf32>
    %14 = arith.addf %11, %13 : vector<16x32xf32>
    %cst_15 = arith.constant 0.000000e+00 : f32
    %15 = vector.broadcast %cst_15 : f32 to vector<16x32xf32>
    %16 = arith.maximumf %14, %15 : vector<16x32xf32>
    %c8 = arith.constant 8 : index
    %c0_16 = arith.constant 0 : index
    %17 = vector.load %arg23[%c8, %c0_16] : memref<24x32xf32, #tpu.memory_space<vmem>>, vector<16x32xf32>
    tpu.vector_store %arg23[%c8, %c0_16], %16 {strides = array<i32>} : memref<24x32xf32, #tpu.memory_space<vmem>>, vector<16x32xf32>,
    %c0_17 = arith.constant 0 : index
    %c0_18 = arith.constant 0 : index
    %18 = vector.load %arg23[%c0_17, %c0_18] : memref<24x32xf32, #tpu.memory_space<vmem>>, vector<8x32xf32>
    %c0_19 = arith.constant 0 : index
    %c0_20 = arith.constant 0 : index
    %c0_21 = arith.constant 0 : index
    %c0_22 = arith.constant 0 : index
    %19 = vector.load %arg6[%c0_19, %c0_20, %c0_21, %c0_22] : memref<2x2x32x32xf32, #tpu.memory_space<vmem>>, vector<1x1x32x32xf32>
    %20 = vector.shape_cast %19 : vector<1x1x32x32xf32> to vector<32x32xf32>
    %cst_23 = arith.constant dense<0.000000e+00> : vector<8x32xf32>
    %21 = tpu.matmul %18, %20, %cst_23 {dimension_numbers = #tpu.dot_dimension_numbers<[1], [0], [0], [1], [0, 0, 1, 1], [], []>} : vector<8x32xf32>, vector<32x32xf32>, vector<8x32xf32> -> vector<8x32xf32>
    %c0_24 = arith.constant 0 : index
    %c0_25 = arith.constant 0 : index
    %c0_26 = arith.constant 0 : index
    %c0_27 = arith.constant 0 : index
    %22 = vector.load %arg9[%c0_24, %c0_25, %c0_26, %c0_27] : memref<2x2x1x32xf32, #tpu.memory_space<vmem>>, vector<1x1x1x32xf32>
    %23 = vector.shape_cast %22 : vector<1x1x1x32xf32> to vector<1x32xf32>
    %24 = vector.broadcast %23 : vector<1x32xf32> to vector<8x32xf32>
    %25 = arith.addf %21, %24 : vector<8x32xf32>
    %c0_28 = arith.constant 0 : index
    %c0_29 = arith.constant 0 : index
    %c0_30 = arith.constant 0 : index
    %c0_31 = arith.constant 0 : index
    %26 = vector.load %arg7[%c0_28, %c0_29, %c0_30, %c0_31] : memref<2x2x32x32xf32, #tpu.memory_space<vmem>>, vector<1x1x32x32xf32>
    %27 = vector.shape_cast %26 : vector<1x1x32x32xf32> to vector<32x32xf32>
    %cst_32 = arith.constant dense<0.000000e+00> : vector<8x32xf32>
    %28 = tpu.matmul %18, %27, %cst_32 {dimension_numbers = #tpu.dot_dimension_numbers<[1], [0], [0], [1], [0, 0, 1, 1], [], []>} : vector<8x32xf32>, vector<32x32xf32>, vector<8x32xf32> -> vector<8x32xf32>
    %c0_33 = arith.constant 0 : index
    %c0_34 = arith.constant 0 : index
    %c0_35 = arith.constant 0 : index
    %c0_36 = arith.constant 0 : index
    %29 = vector.load %arg10[%c0_33, %c0_34, %c0_35, %c0_36] : memref<2x2x1x32xf32, #tpu.memory_space<vmem>>, vector<1x1x1x32xf32>
    %30 = vector.shape_cast %29 : vector<1x1x1x32xf32> to vector<1x32xf32>
    %31 = vector.broadcast %30 : vector<1x32xf32> to vector<8x32xf32>
    %32 = arith.addf %28, %31 : vector<8x32xf32>
    %c0_37 = arith.constant 0 : index
    %c0_38 = arith.constant 0 : index
    %c0_39 = arith.constant 0 : index
    %c0_40 = arith.constant 0 : index
    %33 = vector.load %arg8[%c0_37, %c0_38, %c0_39, %c0_40] : memref<2x2x32x32xf32, #tpu.memory_space<vmem>>, vector<1x1x32x32xf32>
    %34 = vector.shape_cast %33 : vector<1x1x32x32xf32> to vector<32x32xf32>
    %cst_41 = arith.constant dense<0.000000e+00> : vector<8x32xf32>
    %35 = tpu.matmul %18, %34, %cst_41 {dimension_numbers = #tpu.dot_dimension_numbers<[1], [0], [0], [1], [0, 0, 1, 1], [], []>} : vector<8x32xf32>, vector<32x32xf32>, vector<8x32xf32> -> vector<8x32xf32>
    %c0_42 = arith.constant 0 : index
    %c0_43 = arith.constant 0 : index
    %c0_44 = arith.constant 0 : index
    %c0_45 = arith.constant 0 : index
    %36 = vector.load %arg11[%c0_42, %c0_43, %c0_44, %c0_45] : memref<2x2x1x32xf32, #tpu.memory_space<vmem>>, vector<1x1x1x32xf32>
    %37 = vector.shape_cast %36 : vector<1x1x1x32xf32> to vector<1x32xf32>
    %38 = vector.broadcast %37 : vector<1x32xf32> to vector<8x32xf32>
    %39 = arith.addf %35, %38 : vector<8x32xf32>
    %c8_46 = arith.constant 8 : index
    %c0_47 = arith.constant 0 : index
    %40 = vector.load %arg23[%c8_46, %c0_47] : memref<24x32xf32, #tpu.memory_space<vmem>>, vector<16x32xf32>
    %c0_48 = arith.constant 0 : index
    %c1 = arith.constant 1 : index
    %c0_49 = arith.constant 0 : index
    %c0_50 = arith.constant 0 : index
    %41 = vector.load %arg6[%c0_48, %c1, %c0_49, %c0_50] : memref<2x2x32x32xf32, #tpu.memory_space<vmem>>, vector<1x1x32x32xf32>
    %42 = vector.shape_cast %41 : vector<1x1x32x32xf32> to vector<32x32xf32>
    %cst_51 = arith.constant dense<0.000000e+00> : vector<16x32xf32>
    %43 = tpu.matmul %40, %42, %cst_51 {dimension_numbers = #tpu.dot_dimension_numbers<[1], [0], [0], [1], [0, 0, 1, 1], [], []>} : vector<16x32xf32>, vector<32x32xf32>, vector<16x32xf32> -> vector<16x32xf32>
    %c0_52 = arith.constant 0 : index
    %c1_53 = arith.constant 1 : index
    %c0_54 = arith.constant 0 : index
    %c0_55 = arith.constant 0 : index
    %44 = vector.load %arg9[%c0_52, %c1_53, %c0_54, %c0_55] : memref<2x2x1x32xf32, #tpu.memory_space<vmem>>, vector<1x1x1x32xf32>
    %45 = vector.shape_cast %44 : vector<1x1x1x32xf32> to vector<1x32xf32>
    %46 = vector.broadcast %45 : vector<1x32xf32> to vector<16x32xf32>
    %47 = arith.addf %43, %46 : vector<16x32xf32>
    %c0_56 = arith.constant 0 : index
    %c1_57 = arith.constant 1 : index
    %c0_58 = arith.constant 0 : index
    %c0_59 = arith.constant 0 : index
    %48 = vector.load %arg7[%c0_56, %c1_57, %c0_58, %c0_59] : memref<2x2x32x32xf32, #tpu.memory_space<vmem>>, vector<1x1x32x32xf32>
    %49 = vector.shape_cast %48 : vector<1x1x32x32xf32> to vector<32x32xf32>
    %cst_60 = arith.constant dense<0.000000e+00> : vector<16x32xf32>
    %50 = tpu.matmul %40, %49, %cst_60 {dimension_numbers = #tpu.dot_dimension_numbers<[1], [0], [0], [1], [0, 0, 1, 1], [], []>} : vector<16x32xf32>, vector<32x32xf32>, vector<16x32xf32> -> vector<16x32xf32>
    %c0_61 = arith.constant 0 : index
    %c1_62 = arith.constant 1 : index
    %c0_63 = arith.constant 0 : index
    %c0_64 = arith.constant 0 : index
    %51 = vector.load %arg10[%c0_61, %c1_62, %c0_63, %c0_64] : memref<2x2x1x32xf32, #tpu.memory_space<vmem>>, vector<1x1x1x32xf32>
    %52 = vector.shape_cast %51 : vector<1x1x1x32xf32> to vector<1x32xf32>
    %53 = vector.broadcast %52 : vector<1x32xf32> to vector<16x32xf32>
    %54 = arith.addf %50, %53 : vector<16x32xf32>
    %c0_65 = arith.constant 0 : index
    %c1_66 = arith.constant 1 : index
    %c0_67 = arith.constant 0 : index
    %c0_68 = arith.constant 0 : index
    %55 = vector.load %arg8[%c0_65, %c1_66, %c0_67, %c0_68] : memref<2x2x32x32xf32, #tpu.memory_space<vmem>>, vector<1x1x32x32xf32>
    %56 = vector.shape_cast %55 : vector<1x1x32x32xf32> to vector<32x32xf32>
    %cst_69 = arith.constant dense<0.000000e+00> : vector<16x32xf32>
    %57 = tpu.matmul %40, %56, %cst_69 {dimension_numbers = #tpu.dot_dimension_numbers<[1], [0], [0], [1], [0, 0, 1, 1], [], []>} : vector<16x32xf32>, vector<32x32xf32>, vector<16x32xf32> -> vector<16x32xf32>
    %c0_70 = arith.constant 0 : index
    %c1_71 = arith.constant 1 : index
    %c0_72 = arith.constant 0 : index
    %c0_73 = arith.constant 0 : index
    %58 = vector.load %arg11[%c0_70, %c1_71, %c0_72, %c0_73] : memref<2x2x1x32xf32, #tpu.memory_space<vmem>>, vector<1x1x1x32xf32>
    %59 = vector.shape_cast %58 : vector<1x1x1x32xf32> to vector<1x32xf32>
    %60 = vector.broadcast %59 : vector<1x32xf32> to vector<16x32xf32>
    %61 = arith.addf %57, %60 : vector<16x32xf32>
    %cst_74 = arith.constant 0.000000e+00 : f32
    %62 = vector.broadcast %cst_74 : f32 to vector<8x32xf32>
    %c0_75 = arith.constant 0 : index
    %c0_76 = arith.constant 0 : index
    %c0_77 = arith.constant 0 : index
    %c0_78 = arith.constant 0 : index
    %63 = vector.load %arg14[%c0_75, %c0_76, %c0_77, %c0_78] : memref<2x3x32x32xf32, #tpu.memory_space<vmem>>, vector<1x1x32x32xf32>
    %64 = vector.shape_cast %63 : vector<1x1x32x32xf32> to vector<32x32xf32>
    %cst_79 = arith.constant dense<0.000000e+00> : vector<16x32xf32>
    %65 = tpu.matmul %47, %64, %cst_79 {dimension_numbers = #tpu.dot_dimension_numbers<[1], [0], [0], [1], [0, 0, 1, 1], [], []>} : vector<16x32xf32>, vector<32x32xf32>, vector<16x32xf32> -> vector<16x32xf32>
    %c0_80 = arith.constant 0 : index
    %c0_81 = arith.constant 0 : index
    %c0_82 = arith.constant 0 : index
    %c0_83 = arith.constant 0 : index
    %66 = vector.load %arg15[%c0_80, %c0_81, %c0_82, %c0_83] : memref<2x3x32x32xf32, #tpu.memory_space<vmem>>, vector<1x1x32x32xf32>
    %67 = vector.shape_cast %66 : vector<1x1x32x32xf32> to vector<32x32xf32>
    %cst_84 = arith.constant dense<0.000000e+00> : vector<16x32xf32>
    %68 = tpu.matmul %61, %67, %cst_84 {dimension_numbers = #tpu.dot_dimension_numbers<[1], [0], [0], [1], [0, 0, 1, 1], [], []>} : vector<16x32xf32>, vector<32x32xf32>, vector<16x32xf32> -> vector<16x32xf32>
    %69 = tpu.transpose %65, [1, 0] : vector<16x32xf32> -> vector<32x16xf32>
    %c0_85 = arith.constant 0 : index
    %c0_86 = arith.constant 0 : index
    %70 = vector.load %arg16[%c0_85, %c0_86] : memref<8x16xf32, #tpu.memory_space<vmem>>, vector<8x16xf32>
    %71 = vector.extract_strided_slice %32 {offsets = [0, 0], sizes = [8, 16], strides = [1, 1]} : vector<8x32xf32> to vector<8x16xf32>
    %72 = vector.extract_strided_slice %69 {offsets = [0, 0], sizes = [16, 16], strides = [1, 1]} : vector<32x16xf32> to vector<16x16xf32>
    %cst_87 = arith.constant dense<0.000000e+00> : vector<8x16xf32>
    %73 = tpu.matmul %71, %72, %cst_87 {dimension_numbers = #tpu.dot_dimension_numbers<[1], [0], [0], [1], [0, 0, 1, 1], [], []>} : vector<8x16xf32>, vector<16x16xf32>, vector<8x16xf32> -> vector<8x16xf32>
    %74 = arith.addf %73, %70 : vector<8x16xf32>
    %cst_88 = arith.constant dense<0xFF800000> : vector<8xf32>
    %75 = vector.multi_reduction <maximumf>, %74, %cst_88 [1] : vector<8x16xf32> to vector<8xf32>
    %76 = vector.shape_cast %75 : vector<8xf32> to vector<8x1xf32>
    %77 = vector.broadcast %76 : vector<8x1xf32> to vector<8x16xf32>
    %78 = arith.subf %74, %77 : vector<8x16xf32>
    %79 = math.exp %78 : vector<8x16xf32>
    %cst_89 = arith.constant dense<0.000000e+00> : vector<8xf32>
    %80 = vector.multi_reduction <add>, %79, %cst_89 [1] : vector<8x16xf32> to vector<8xf32>
    %81 = vector.shape_cast %80 : vector<8xf32> to vector<8x1xf32>
    %cst_90 = arith.constant -1.000000e+20 : f32
    %82 = vector.broadcast %cst_90 : f32 to vector<8x1xf32>
    %83 = arith.cmpf ogt, %76, %82 : vector<8x1xf32>
    %84 = arith.extui %83 : vector<8x1xi1> to vector<8x1xi32>
    %85 = arith.sitofp %84 : vector<8x1xi32> to vector<8x1xf32>
    %86 = arith.divf %85, %81 : vector<8x1xf32>
    %87 = vector.broadcast %86 : vector<8x1xf32> to vector<8x16xf32>
    %88 = arith.mulf %79, %87 : vector<8x16xf32>
    %89 = vector.extract_strided_slice %68 {offsets = [0, 0], sizes = [16, 16], strides = [1, 1]} : vector<16x32xf32> to vector<16x16xf32>
    %cst_91 = arith.constant dense<0.000000e+00> : vector<8x16xf32>
    %90 = tpu.matmul %88, %89, %cst_91 {dimension_numbers = #tpu.dot_dimension_numbers<[1], [0], [0], [1], [0, 0, 1, 1], [], []>} : vector<8x16xf32>, vector<16x16xf32>, vector<8x16xf32> -> vector<8x16xf32>
    %91 = vector.extract_strided_slice %32 {offsets = [0, 16], sizes = [8, 16], strides = [1, 1]} : vector<8x32xf32> to vector<8x16xf32>
    %92 = vector.extract_strided_slice %69 {offsets = [16, 0], sizes = [16, 16], strides = [1, 1]} : vector<32x16xf32> to vector<16x16xf32>
    %cst_92 = arith.constant dense<0.000000e+00> : vector<8x16xf32>
    %93 = tpu.matmul %91, %92, %cst_92 {dimension_numbers = #tpu.dot_dimension_numbers<[1], [0], [0], [1], [0, 0, 1, 1], [], []>} : vector<8x16xf32>, vector<16x16xf32>, vector<8x16xf32> -> vector<8x16xf32>
    %94 = arith.addf %93, %70 : vector<8x16xf32>
    %cst_93 = arith.constant dense<0xFF800000> : vector<8xf32>
    %95 = vector.multi_reduction <maximumf>, %94, %cst_93 [1] : vector<8x16xf32> to vector<8xf32>
    %96 = vector.shape_cast %95 : vector<8xf32> to vector<8x1xf32>
    %97 = vector.broadcast %96 : vector<8x1xf32> to vector<8x16xf32>
    %98 = arith.subf %94, %97 : vector<8x16xf32>
    %99 = math.exp %98 : vector<8x16xf32>
    %cst_94 = arith.constant dense<0.000000e+00> : vector<8xf32>
    %100 = vector.multi_reduction <add>, %99, %cst_94 [1] : vector<8x16xf32> to vector<8xf32>
    %101 = vector.shape_cast %100 : vector<8xf32> to vector<8x1xf32>
    %cst_95 = arith.constant -1.000000e+20 : f32
    %102 = vector.broadcast %cst_95 : f32 to vector<8x1xf32>
    %103 = arith.cmpf ogt, %96, %102 : vector<8x1xf32>
    %104 = arith.extui %103 : vector<8x1xi1> to vector<8x1xi32>
    %105 = arith.sitofp %104 : vector<8x1xi32> to vector<8x1xf32>
    %106 = arith.divf %105, %101 : vector<8x1xf32>
    %107 = vector.broadcast %106 : vector<8x1xf32> to vector<8x16xf32>
    %108 = arith.mulf %99, %107 : vector<8x16xf32>
    %109 = vector.extract_strided_slice %68 {offsets = [0, 16], sizes = [16, 16], strides = [1, 1]} : vector<16x32xf32> to vector<16x16xf32>
    %cst_96 = arith.constant dense<0.000000e+00> : vector<8x16xf32>
    %110 = tpu.matmul %108, %109, %cst_96 {dimension_numbers = #tpu.dot_dimension_numbers<[1], [0], [0], [1], [0, 0, 1, 1], [], []>} : vector<8x16xf32>, vector<16x16xf32>, vector<8x16xf32> -> vector<8x16xf32>
    %111 = tpu.concatenate %90, %110 in 1 : vector<8x16xf32>, vector<8x16xf32> -> vector<8x32xf32>
    %112 = arith.addf %62, %111 : vector<8x32xf32>
    %cst_97 = arith.constant 5.000000e-01 : f32
    %113 = vector.broadcast %cst_97 : f32 to vector<8x32xf32>
    %114 = arith.mulf %113, %112 : vector<8x32xf32>
    %cst_98 = arith.constant 4.471500e-02 : f32
    %115 = vector.broadcast %cst_98 : f32 to vector<8x32xf32>
    %116 = arith.mulf %115, %112 : vector<8x32xf32>
    %117 = arith.mulf %116, %112 : vector<8x32xf32>
    %118 = arith.mulf %117, %112 : vector<8x32xf32>
    %119 = arith.addf %112, %118 : vector<8x32xf32>
    %cst_99 = arith.constant 0.797884583 : f32
    %120 = vector.broadcast %cst_99 : f32 to vector<8x32xf32>
    %121 = arith.mulf %120, %119 : vector<8x32xf32>
    %122 = math.tanh %121 : vector<8x32xf32>
    %cst_100 = arith.constant 1.000000e+00 : f32
    %123 = vector.broadcast %cst_100 : f32 to vector<8x32xf32>
    %124 = arith.addf %123, %122 : vector<8x32xf32>
    %125 = arith.mulf %114, %124 : vector<8x32xf32>
    %c0_101 = arith.constant 0 : index
    %c0_102 = arith.constant 0 : index
    %c0_103 = arith.constant 0 : index
    %c0_104 = arith.constant 0 : index
    %126 = vector.load %arg12[%c0_101, %c0_102, %c0_103, %c0_104] : memref<2x2x32x32xf32, #tpu.memory_space<vmem>>, vector<1x1x32x32xf32>
    %127 = vector.shape_cast %126 : vector<1x1x32x32xf32> to vector<32x32xf32>
    %cst_105 = arith.constant dense<0.000000e+00> : vector<8x32xf32>
    %128 = tpu.matmul %125, %127, %cst_105 {dimension_numbers = #tpu.dot_dimension_numbers<[1], [0], [0], [1], [0, 0, 1, 1], [], []>} : vector<8x32xf32>, vector<32x32xf32>, vector<8x32xf32> -> vector<8x32xf32>
    %c0_106 = arith.constant 0 : index
    %c0_107 = arith.constant 0 : index
    %c0_108 = arith.constant 0 : index
    %c0_109 = arith.constant 0 : index
    %129 = vector.load %arg13[%c0_106, %c0_107, %c0_108, %c0_109] : memref<2x2x1x32xf32, #tpu.memory_space<vmem>>, vector<1x1x1x32xf32>
    %130 = vector.shape_cast %129 : vector<1x1x1x32xf32> to vector<1x32xf32>
    %131 = vector.broadcast %130 : vector<1x32xf32> to vector<8x32xf32>
    %132 = arith.addf %128, %131 : vector<8x32xf32>
    %c0_110 = arith.constant 0 : index
    %c0_111 = arith.constant 0 : index
    %133 = memref.load %arg21[%c0_110, %c0_111] : memref<2x2xf32, #tpu.memory_space<smem>>
    %134 = vector.broadcast %133 : f32 to vector<8x32xf32>
    %135 = arith.mulf %134, %132 : vector<8x32xf32>
    %cst_112 = arith.constant 1.000000e+00 : f32
    %136 = arith.subf %cst_112, %133 : f32
    %137 = vector.broadcast %136 : f32 to vector<8x32xf32>
    %138 = arith.mulf %137, %18 : vector<8x32xf32>
    %139 = arith.addf %135, %138 : vector<8x32xf32>
    %c0_113 = arith.constant 0 : index
    %c0_114 = arith.constant 0 : index
    %140 = vector.load %arg23[%c0_113, %c0_114] : memref<24x32xf32, #tpu.memory_space<vmem>>, vector<8x32xf32>
    tpu.vector_store %arg23[%c0_113, %c0_114], %139 {strides = array<i32>} : memref<24x32xf32, #tpu.memory_space<vmem>>, vector<8x32xf32>,
    %cst_115 = arith.constant 0.000000e+00 : f32
    %141 = vector.broadcast %cst_115 : f32 to vector<16x32xf32>
    %c0_116 = arith.constant 0 : index
    %c1_117 = arith.constant 1 : index
    %c0_118 = arith.constant 0 : index
    %c0_119 = arith.constant 0 : index
    %142 = vector.load %arg14[%c0_116, %c1_117, %c0_118, %c0_119] : memref<2x3x32x32xf32, #tpu.memory_space<vmem>>, vector<1x1x32x32xf32>
    %143 = vector.shape_cast %142 : vector<1x1x32x32xf32> to vector<32x32xf32>
    %cst_120 = arith.constant dense<0.000000e+00> : vector<8x32xf32>
    %144 = tpu.matmul %25, %143, %cst_120 {dimension_numbers = #tpu.dot_dimension_numbers<[1], [0], [0], [1], [0, 0, 1, 1], [], []>} : vector<8x32xf32>, vector<32x32xf32>, vector<8x32xf32> -> vector<8x32xf32>
    %c0_121 = arith.constant 0 : index
    %c1_122 = arith.constant 1 : index
    %c0_123 = arith.constant 0 : index
    %c0_124 = arith.constant 0 : index
    %145 = vector.load %arg15[%c0_121, %c1_122, %c0_123, %c0_124] : memref<2x3x32x32xf32, #tpu.memory_space<vmem>>, vector<1x1x32x32xf32>
    %146 = vector.shape_cast %145 : vector<1x1x32x32xf32> to vector<32x32xf32>
    %cst_125 = arith.constant dense<0.000000e+00> : vector<8x32xf32>
    %147 = tpu.matmul %39, %146, %cst_125 {dimension_numbers = #tpu.dot_dimension_numbers<[1], [0], [0], [1], [0, 0, 1, 1], [], []>} : vector<8x32xf32>, vector<32x32xf32>, vector<8x32xf32> -> vector<8x32xf32>
    %148 = tpu.transpose %144, [1, 0] : vector<8x32xf32> -> vector<32x8xf32>
    %c0_126 = arith.constant 0 : index
    %c0_127 = arith.constant 0 : index
    %149 = vector.load %arg17[%c0_126, %c0_127] : memref<16x8xf32, #tpu.memory_space<vmem>>, vector<16x8xf32>
    %150 = vector.extract_strided_slice %54 {offsets = [0, 0], sizes = [16, 16], strides = [1, 1]} : vector<16x32xf32> to vector<16x16xf32>
    %151 = vector.extract_strided_slice %148 {offsets = [0, 0], sizes = [16, 8], strides = [1, 1]} : vector<32x8xf32> to vector<16x8xf32>
    %cst_128 = arith.constant dense<0.000000e+00> : vector<16x8xf32>
    %152 = tpu.matmul %150, %151, %cst_128 {dimension_numbers = #tpu.dot_dimension_numbers<[1], [0], [0], [1], [0, 0, 1, 1], [], []>} : vector<16x16xf32>, vector<16x8xf32>, vector<16x8xf32> -> vector<16x8xf32>
    %153 = arith.addf %152, %149 : vector<16x8xf32>
    %cst_129 = arith.constant dense<0xFF800000> : vector<16xf32>
    %154 = vector.multi_reduction <maximumf>, %153, %cst_129 [1] : vector<16x8xf32> to vector<16xf32>
    %155 = vector.shape_cast %154 : vector<16xf32> to vector<16x1xf32>
    %156 = vector.broadcast %155 : vector<16x1xf32> to vector<16x8xf32>
    %157 = arith.subf %153, %156 : vector<16x8xf32>
    %158 = math.exp %157 : vector<16x8xf32>
    %cst_130 = arith.constant dense<0.000000e+00> : vector<16xf32>
    %159 = vector.multi_reduction <add>, %158, %cst_130 [1] : vector<16x8xf32> to vector<16xf32>
    %160 = vector.shape_cast %159 : vector<16xf32> to vector<16x1xf32>
    %cst_131 = arith.constant -1.000000e+20 : f32
    %161 = vector.broadcast %cst_131 : f32 to vector<16x1xf32>
    %162 = arith.cmpf ogt, %155, %161 : vector<16x1xf32>
    %163 = arith.extui %162 : vector<16x1xi1> to vector<16x1xi32>
    %164 = arith.sitofp %163 : vector<16x1xi32> to vector<16x1xf32>
    %165 = arith.divf %164, %160 : vector<16x1xf32>
    %166 = vector.broadcast %165 : vector<16x1xf32> to vector<16x8xf32>
    %167 = arith.mulf %158, %166 : vector<16x8xf32>
    %168 = vector.extract_strided_slice %147 {offsets = [0, 0], sizes = [8, 16], strides = [1, 1]} : vector<8x32xf32> to vector<8x16xf32>
    %cst_132 = arith.constant dense<0.000000e+00> : vector<16x16xf32>
    %169 = tpu.matmul %167, %168, %cst_132 {dimension_numbers = #tpu.dot_dimension_numbers<[1], [0], [0], [1], [0, 0, 1, 1], [], []>} : vector<16x8xf32>, vector<8x16xf32>, vector<16x16xf32> -> vector<16x16xf32>
    %170 = vector.extract_strided_slice %54 {offsets = [0, 16], sizes = [16, 16], strides = [1, 1]} : vector<16x32xf32> to vector<16x16xf32>
    %171 = vector.extract_strided_slice %148 {offsets = [16, 0], sizes = [16, 8], strides = [1, 1]} : vector<32x8xf32> to vector<16x8xf32>
    %cst_133 = arith.constant dense<0.000000e+00> : vector<16x8xf32>
    %172 = tpu.matmul %170, %171, %cst_133 {dimension_numbers = #tpu.dot_dimension_numbers<[1], [0], [0], [1], [0, 0, 1, 1], [], []>} : vector<16x16xf32>, vector<16x8xf32>, vector<16x8xf32> -> vector<16x8xf32>
    %173 = arith.addf %172, %149 : vector<16x8xf32>
    %cst_134 = arith.constant dense<0xFF800000> : vector<16xf32>
    %174 = vector.multi_reduction <maximumf>, %173, %cst_134 [1] : vector<16x8xf32> to vector<16xf32>
    %175 = vector.shape_cast %174 : vector<16xf32> to vector<16x1xf32>
    %176 = vector.broadcast %175 : vector<16x1xf32> to vector<16x8xf32>
    %177 = arith.subf %173, %176 : vector<16x8xf32>
    %178 = math.exp %177 : vector<16x8xf32>
    %cst_135 = arith.constant dense<0.000000e+00> : vector<16xf32>
    %179 = vector.multi_reduction <add>, %178, %cst_135 [1] : vector<16x8xf32> to vector<16xf32>
    %180 = vector.shape_cast %179 : vector<16xf32> to vector<16x1xf32>
    %cst_136 = arith.constant -1.000000e+20 : f32
    %181 = vector.broadcast %cst_136 : f32 to vector<16x1xf32>
    %182 = arith.cmpf ogt, %175, %181 : vector<16x1xf32>
    %183 = arith.extui %182 : vector<16x1xi1> to vector<16x1xi32>
    %184 = arith.sitofp %183 : vector<16x1xi32> to vector<16x1xf32>
    %185 = arith.divf %184, %180 : vector<16x1xf32>
    %186 = vector.broadcast %185 : vector<16x1xf32> to vector<16x8xf32>
    %187 = arith.mulf %178, %186 : vector<16x8xf32>
    %188 = vector.extract_strided_slice %147 {offsets = [0, 16], sizes = [8, 16], strides = [1, 1]} : vector<8x32xf32> to vector<8x16xf32>
    %cst_137 = arith.constant dense<0.000000e+00> : vector<16x16xf32>
    %189 = tpu.matmul %187, %188, %cst_137 {dimension_numbers = #tpu.dot_dimension_numbers<[1], [0], [0], [1], [0, 0, 1, 1], [], []>} : vector<16x8xf32>, vector<8x16xf32>, vector<16x16xf32> -> vector<16x16xf32>
    %190 = tpu.concatenate %169, %189 in 1 : vector<16x16xf32>, vector<16x16xf32> -> vector<16x32xf32>
    %191 = arith.addf %141, %190 : vector<16x32xf32>
    %c0_138 = arith.constant 0 : index
    %c2 = arith.constant 2 : index
    %c0_139 = arith.constant 0 : index
    %c0_140 = arith.constant 0 : index
    %192 = vector.load %arg14[%c0_138, %c2, %c0_139, %c0_140] : memref<2x3x32x32xf32, #tpu.memory_space<vmem>>, vector<1x1x32x32xf32>
    %193 = vector.shape_cast %192 : vector<1x1x32x32xf32> to vector<32x32xf32>
    %cst_141 = arith.constant dense<0.000000e+00> : vector<16x32xf32>
    %194 = tpu.matmul %47, %193, %cst_141 {dimension_numbers = #tpu.dot_dimension_numbers<[1], [0], [0], [1], [0, 0, 1, 1], [], []>} : vector<16x32xf32>, vector<32x32xf32>, vector<16x32xf32> -> vector<16x32xf32>
    %c0_142 = arith.constant 0 : index
    %c2_143 = arith.constant 2 : index
    %c0_144 = arith.constant 0 : index
    %c0_145 = arith.constant 0 : index
    %195 = vector.load %arg15[%c0_142, %c2_143, %c0_144, %c0_145] : memref<2x3x32x32xf32, #tpu.memory_space<vmem>>, vector<1x1x32x32xf32>
    %196 = vector.shape_cast %195 : vector<1x1x32x32xf32> to vector<32x32xf32>
    %cst_146 = arith.constant dense<0.000000e+00> : vector<16x32xf32>
    %197 = tpu.matmul %61, %196, %cst_146 {dimension_numbers = #tpu.dot_dimension_numbers<[1], [0], [0], [1], [0, 0, 1, 1], [], []>} : vector<16x32xf32>, vector<32x32xf32>, vector<16x32xf32> -> vector<16x32xf32>
    %198 = tpu.transpose %194, [1, 0] : vector<16x32xf32> -> vector<32x16xf32>
    %c0_147 = arith.constant 0 : index
    %c0_148 = arith.constant 0 : index
    %199 = vector.load %arg18[%c0_147, %c0_148] : memref<16x16xf32, #tpu.memory_space<vmem>>, vector<16x16xf32>
    %200 = vector.extract_strided_slice %54 {offsets = [0, 0], sizes = [16, 16], strides = [1, 1]} : vector<16x32xf32> to vector<16x16xf32>
    %201 = vector.extract_strided_slice %198 {offsets = [0, 0], sizes = [16, 16], strides = [1, 1]} : vector<32x16xf32> to vector<16x16xf32>
    %cst_149 = arith.constant dense<0.000000e+00> : vector<16x16xf32>
    %202 = tpu.matmul %200, %201, %cst_149 {dimension_numbers = #tpu.dot_dimension_numbers<[1], [0], [0], [1], [0, 0, 1, 1], [], []>} : vector<16x16xf32>, vector<16x16xf32>, vector<16x16xf32> -> vector<16x16xf32>
    %203 = arith.addf %202, %199 : vector<16x16xf32>
    %cst_150 = arith.constant dense<0xFF800000> : vector<16xf32>
    %204 = vector.multi_reduction <maximumf>, %203, %cst_150 [1] : vector<16x16xf32> to vector<16xf32>
    %205 = vector.shape_cast %204 : vector<16xf32> to vector<16x1xf32>
    %206 = vector.broadcast %205 : vector<16x1xf32> to vector<16x16xf32>
    %207 = arith.subf %203, %206 : vector<16x16xf32>
    %208 = math.exp %207 : vector<16x16xf32>
    %cst_151 = arith.constant dense<0.000000e+00> : vector<16xf32>
    %209 = vector.multi_reduction <add>, %208, %cst_151 [1] : vector<16x16xf32> to vector<16xf32>
    %210 = vector.shape_cast %209 : vector<16xf32> to vector<16x1xf32>
    %cst_152 = arith.constant -1.000000e+20 : f32
    %211 = vector.broadcast %cst_152 : f32 to vector<16x1xf32>
    %212 = arith.cmpf ogt, %205, %211 : vector<16x1xf32>
    %213 = arith.extui %212 : vector<16x1xi1> to vector<16x1xi32>
    %214 = arith.sitofp %213 : vector<16x1xi32> to vector<16x1xf32>
    %215 = arith.divf %214, %210 : vector<16x1xf32>
    %216 = vector.broadcast %215 : vector<16x1xf32> to vector<16x16xf32>
    %217 = arith.mulf %208, %216 : vector<16x16xf32>
    %218 = vector.extract_strided_slice %197 {offsets = [0, 0], sizes = [16, 16], strides = [1, 1]} : vector<16x32xf32> to vector<16x16xf32>
    %cst_153 = arith.constant dense<0.000000e+00> : vector<16x16xf32>
    %219 = tpu.matmul %217, %218, %cst_153 {dimension_numbers = #tpu.dot_dimension_numbers<[1], [0], [0], [1], [0, 0, 1, 1], [], []>} : vector<16x16xf32>, vector<16x16xf32>, vector<16x16xf32> -> vector<16x16xf32>
    %220 = vector.extract_strided_slice %54 {offsets = [0, 16], sizes = [16, 16], strides = [1, 1]} : vector<16x32xf32> to vector<16x16xf32>
    %221 = vector.extract_strided_slice %198 {offsets = [16, 0], sizes = [16, 16], strides = [1, 1]} : vector<32x16xf32> to vector<16x16xf32>
    %cst_154 = arith.constant dense<0.000000e+00> : vector<16x16xf32>
    %222 = tpu.matmul %220, %221, %cst_154 {dimension_numbers = #tpu.dot_dimension_numbers<[1], [0], [0], [1], [0, 0, 1, 1], [], []>} : vector<16x16xf32>, vector<16x16xf32>, vector<16x16xf32> -> vector<16x16xf32>
    %223 = arith.addf %222, %199 : vector<16x16xf32>
    %cst_155 = arith.constant dense<0xFF800000> : vector<16xf32>
    %224 = vector.multi_reduction <maximumf>, %223, %cst_155 [1] : vector<16x16xf32> to vector<16xf32>
    %225 = vector.shape_cast %224 : vector<16xf32> to vector<16x1xf32>
    %226 = vector.broadcast %225 : vector<16x1xf32> to vector<16x16xf32>
    %227 = arith.subf %223, %226 : vector<16x16xf32>
    %228 = math.exp %227 : vector<16x16xf32>
    %cst_156 = arith.constant dense<0.000000e+00> : vector<16xf32>
    %229 = vector.multi_reduction <add>, %228, %cst_156 [1] : vector<16x16xf32> to vector<16xf32>
    %230 = vector.shape_cast %229 : vector<16xf32> to vector<16x1xf32>
    %cst_157 = arith.constant -1.000000e+20 : f32
    %231 = vector.broadcast %cst_157 : f32 to vector<16x1xf32>
    %232 = arith.cmpf ogt, %225, %231 : vector<16x1xf32>
    %233 = arith.extui %232 : vector<16x1xi1> to vector<16x1xi32>
    %234 = arith.sitofp %233 : vector<16x1xi32> to vector<16x1xf32>
    %235 = arith.divf %234, %230 : vector<16x1xf32>
    %236 = vector.broadcast %235 : vector<16x1xf32> to vector<16x16xf32>
    %237 = arith.mulf %228, %236 : vector<16x16xf32>
    %238 = vector.extract_strided_slice %197 {offsets = [0, 16], sizes = [16, 16], strides = [1, 1]} : vector<16x32xf32> to vector<16x16xf32>
    %cst_158 = arith.constant dense<0.000000e+00> : vector<16x16xf32>
    %239 = tpu.matmul %237, %238, %cst_158 {dimension_numbers = #tpu.dot_dimension_numbers<[1], [0], [0], [1], [0, 0, 1, 1], [], []>} : vector<16x16xf32>, vector<16x16xf32>, vector<16x16xf32> -> vector<16x16xf32>
    %240 = tpu.concatenate %219, %239 in 1 : vector<16x16xf32>, vector<16x16xf32> -> vector<16x32xf32>
    %241 = arith.addf %191, %240 : vector<16x32xf32>
    %cst_159 = arith.constant 5.000000e-01 : f32
    %242 = vector.broadcast %cst_159 : f32 to vector<16x32xf32>
    %243 = arith.mulf %242, %241 : vector<16x32xf32>
    %cst_160 = arith.constant 4.471500e-02 : f32
    %244 = vector.broadcast %cst_160 : f32 to vector<16x32xf32>
    %245 = arith.mulf %244, %241 : vector<16x32xf32>
    %246 = arith.mulf %245, %241 : vector<16x32xf32>
    %247 = arith.mulf %246, %241 : vector<16x32xf32>
    %248 = arith.addf %241, %247 : vector<16x32xf32>
    %cst_161 = arith.constant 0.797884583 : f32
    %249 = vector.broadcast %cst_161 : f32 to vector<16x32xf32>
    %250 = arith.mulf %249, %248 : vector<16x32xf32>
    %251 = math.tanh %250 : vector<16x32xf32>
    %cst_162 = arith.constant 1.000000e+00 : f32
    %252 = vector.broadcast %cst_162 : f32 to vector<16x32xf32>
    %253 = arith.addf %252, %251 : vector<16x32xf32>
    %254 = arith.mulf %243, %253 : vector<16x32xf32>
    %c0_163 = arith.constant 0 : index
    %c1_164 = arith.constant 1 : index
    %c0_165 = arith.constant 0 : index
    %c0_166 = arith.constant 0 : index
    %255 = vector.load %arg12[%c0_163, %c1_164, %c0_165, %c0_166] : memref<2x2x32x32xf32, #tpu.memory_space<vmem>>, vector<1x1x32x32xf32>
    %256 = vector.shape_cast %255 : vector<1x1x32x32xf32> to vector<32x32xf32>
    %cst_167 = arith.constant dense<0.000000e+00> : vector<16x32xf32>
    %257 = tpu.matmul %254, %256, %cst_167 {dimension_numbers = #tpu.dot_dimension_numbers<[1], [0], [0], [1], [0, 0, 1, 1], [], []>} : vector<16x32xf32>, vector<32x32xf32>, vector<16x32xf32> -> vector<16x32xf32>
    %c0_168 = arith.constant 0 : index
    %c1_169 = arith.constant 1 : index
    %c0_170 = arith.constant 0 : index
    %c0_171 = arith.constant 0 : index
    %258 = vector.load %arg13[%c0_168, %c1_169, %c0_170, %c0_171] : memref<2x2x1x32xf32, #tpu.memory_space<vmem>>, vector<1x1x1x32xf32>
    %259 = vector.shape_cast %258 : vector<1x1x1x32xf32> to vector<1x32xf32>
    %260 = vector.broadcast %259 : vector<1x32xf32> to vector<16x32xf32>
    %261 = arith.addf %257, %260 : vector<16x32xf32>
    %c0_172 = arith.constant 0 : index
    %c1_173 = arith.constant 1 : index
    %262 = memref.load %arg21[%c0_172, %c1_173] : memref<2x2xf32, #tpu.memory_space<smem>>
    %263 = vector.broadcast %262 : f32 to vector<16x32xf32>
    %264 = arith.mulf %263, %261 : vector<16x32xf32>
    %cst_174 = arith.constant 1.000000e+00 : f32
    %265 = arith.subf %cst_174, %262 : f32
    %266 = vector.broadcast %265 : f32 to vector<16x32xf32>
    %267 = arith.mulf %266, %40 : vector<16x32xf32>
    %268 = arith.addf %264, %267 : vector<16x32xf32>
    %c8_175 = arith.constant 8 : index
    %c0_176 = arith.constant 0 : index
    %269 = vector.load %arg23[%c8_175, %c0_176] : memref<24x32xf32, #tpu.memory_space<vmem>>, vector<16x32xf32>
    tpu.vector_store %arg23[%c8_175, %c0_176], %268 {strides = array<i32>} : memref<24x32xf32, #tpu.memory_space<vmem>>, vector<16x32xf32>,
    %c0_177 = arith.constant 0 : index
    %c0_178 = arith.constant 0 : index
    %270 = vector.load %arg23[%c0_177, %c0_178] : memref<24x32xf32, #tpu.memory_space<vmem>>, vector<8x32xf32>
    %c1_179 = arith.constant 1 : index
    %c0_180 = arith.constant 0 : index
    %c0_181 = arith.constant 0 : index
    %c0_182 = arith.constant 0 : index
    %271 = vector.load %arg6[%c1_179, %c0_180, %c0_181, %c0_182] : memref<2x2x32x32xf32, #tpu.memory_space<vmem>>, vector<1x1x32x32xf32>
    %272 = vector.shape_cast %271 : vector<1x1x32x32xf32> to vector<32x32xf32>
    %cst_183 = arith.constant dense<0.000000e+00> : vector<8x32xf32>
    %273 = tpu.matmul %270, %272, %cst_183 {dimension_numbers = #tpu.dot_dimension_numbers<[1], [0], [0], [1], [0, 0, 1, 1], [], []>} : vector<8x32xf32>, vector<32x32xf32>, vector<8x32xf32> -> vector<8x32xf32>
    %c1_184 = arith.constant 1 : index
    %c0_185 = arith.constant 0 : index
    %c0_186 = arith.constant 0 : index
    %c0_187 = arith.constant 0 : index
    %274 = vector.load %arg9[%c1_184, %c0_185, %c0_186, %c0_187] : memref<2x2x1x32xf32, #tpu.memory_space<vmem>>, vector<1x1x1x32xf32>
    %275 = vector.shape_cast %274 : vector<1x1x1x32xf32> to vector<1x32xf32>
    %276 = vector.broadcast %275 : vector<1x32xf32> to vector<8x32xf32>
    %277 = arith.addf %273, %276 : vector<8x32xf32>
    %c1_188 = arith.constant 1 : index
    %c0_189 = arith.constant 0 : index
    %c0_190 = arith.constant 0 : index
    %c0_191 = arith.constant 0 : index
    %278 = vector.load %arg7[%c1_188, %c0_189, %c0_190, %c0_191] : memref<2x2x32x32xf32, #tpu.memory_space<vmem>>, vector<1x1x32x32xf32>
    %279 = vector.shape_cast %278 : vector<1x1x32x32xf32> to vector<32x32xf32>
    %cst_192 = arith.constant dense<0.000000e+00> : vector<8x32xf32>
    %280 = tpu.matmul %270, %279, %cst_192 {dimension_numbers = #tpu.dot_dimension_numbers<[1], [0], [0], [1], [0, 0, 1, 1], [], []>} : vector<8x32xf32>, vector<32x32xf32>, vector<8x32xf32> -> vector<8x32xf32>
    %c1_193 = arith.constant 1 : index
    %c0_194 = arith.constant 0 : index
    %c0_195 = arith.constant 0 : index
    %c0_196 = arith.constant 0 : index
    %281 = vector.load %arg10[%c1_193, %c0_194, %c0_195, %c0_196] : memref<2x2x1x32xf32, #tpu.memory_space<vmem>>, vector<1x1x1x32xf32>
    %282 = vector.shape_cast %281 : vector<1x1x1x32xf32> to vector<1x32xf32>
    %283 = vector.broadcast %282 : vector<1x32xf32> to vector<8x32xf32>
    %284 = arith.addf %280, %283 : vector<8x32xf32>
    %c1_197 = arith.constant 1 : index
    %c0_198 = arith.constant 0 : index
    %c0_199 = arith.constant 0 : index
    %c0_200 = arith.constant 0 : index
    %285 = vector.load %arg8[%c1_197, %c0_198, %c0_199, %c0_200] : memref<2x2x32x32xf32, #tpu.memory_space<vmem>>, vector<1x1x32x32xf32>
    %286 = vector.shape_cast %285 : vector<1x1x32x32xf32> to vector<32x32xf32>
    %cst_201 = arith.constant dense<0.000000e+00> : vector<8x32xf32>
    %287 = tpu.matmul %270, %286, %cst_201 {dimension_numbers = #tpu.dot_dimension_numbers<[1], [0], [0], [1], [0, 0, 1, 1], [], []>} : vector<8x32xf32>, vector<32x32xf32>, vector<8x32xf32> -> vector<8x32xf32>
    %c1_202 = arith.constant 1 : index
    %c0_203 = arith.constant 0 : index
    %c0_204 = arith.constant 0 : index
    %c0_205 = arith.constant 0 : index
    %288 = vector.load %arg11[%c1_202, %c0_203, %c0_204, %c0_205] : memref<2x2x1x32xf32, #tpu.memory_space<vmem>>, vector<1x1x1x32xf32>
    %289 = vector.shape_cast %288 : vector<1x1x1x32xf32> to vector<1x32xf32>
    %290 = vector.broadcast %289 : vector<1x32xf32> to vector<8x32xf32>
    %291 = arith.addf %287, %290 : vector<8x32xf32>
    %c8_206 = arith.constant 8 : index
    %c0_207 = arith.constant 0 : index
    %292 = vector.load %arg23[%c8_206, %c0_207] : memref<24x32xf32, #tpu.memory_space<vmem>>, vector<16x32xf32>
    %c1_208 = arith.constant 1 : index
    %c1_209 = arith.constant 1 : index
    %c0_210 = arith.constant 0 : index
    %c0_211 = arith.constant 0 : index
    %293 = vector.load %arg6[%c1_208, %c1_209, %c0_210, %c0_211] : memref<2x2x32x32xf32, #tpu.memory_space<vmem>>, vector<1x1x32x32xf32>
    %294 = vector.shape_cast %293 : vector<1x1x32x32xf32> to vector<32x32xf32>
    %cst_212 = arith.constant dense<0.000000e+00> : vector<16x32xf32>
    %295 = tpu.matmul %292, %294, %cst_212 {dimension_numbers = #tpu.dot_dimension_numbers<[1], [0], [0], [1], [0, 0, 1, 1], [], []>} : vector<16x32xf32>, vector<32x32xf32>, vector<16x32xf32> -> vector<16x32xf32>
    %c1_213 = arith.constant 1 : index
    %c1_214 = arith.constant 1 : index
    %c0_215 = arith.constant 0 : index
    %c0_216 = arith.constant 0 : index
    %296 = vector.load %arg9[%c1_213, %c1_214, %c0_215, %c0_216] : memref<2x2x1x32xf32, #tpu.memory_space<vmem>>, vector<1x1x1x32xf32>
    %297 = vector.shape_cast %296 : vector<1x1x1x32xf32> to vector<1x32xf32>
    %298 = vector.broadcast %297 : vector<1x32xf32> to vector<16x32xf32>
    %299 = arith.addf %295, %298 : vector<16x32xf32>
    %c1_217 = arith.constant 1 : index
    %c1_218 = arith.constant 1 : index
    %c0_219 = arith.constant 0 : index
    %c0_220 = arith.constant 0 : index
    %300 = vector.load %arg7[%c1_217, %c1_218, %c0_219, %c0_220] : memref<2x2x32x32xf32, #tpu.memory_space<vmem>>, vector<1x1x32x32xf32>
    %301 = vector.shape_cast %300 : vector<1x1x32x32xf32> to vector<32x32xf32>
    %cst_221 = arith.constant dense<0.000000e+00> : vector<16x32xf32>
    %302 = tpu.matmul %292, %301, %cst_221 {dimension_numbers = #tpu.dot_dimension_numbers<[1], [0], [0], [1], [0, 0, 1, 1], [], []>} : vector<16x32xf32>, vector<32x32xf32>, vector<16x32xf32> -> vector<16x32xf32>
    %c1_222 = arith.constant 1 : index
    %c1_223 = arith.constant 1 : index
    %c0_224 = arith.constant 0 : index
    %c0_225 = arith.constant 0 : index
    %303 = vector.load %arg10[%c1_222, %c1_223, %c0_224, %c0_225] : memref<2x2x1x32xf32, #tpu.memory_space<vmem>>, vector<1x1x1x32xf32>
    %304 = vector.shape_cast %303 : vector<1x1x1x32xf32> to vector<1x32xf32>
    %305 = vector.broadcast %304 : vector<1x32xf32> to vector<16x32xf32>
    %306 = arith.addf %302, %305 : vector<16x32xf32>
    %c1_226 = arith.constant 1 : index
    %c1_227 = arith.constant 1 : index
    %c0_228 = arith.constant 0 : index
    %c0_229 = arith.constant 0 : index
    %307 = vector.load %arg8[%c1_226, %c1_227, %c0_228, %c0_229] : memref<2x2x32x32xf32, #tpu.memory_space<vmem>>, vector<1x1x32x32xf32>
    %308 = vector.shape_cast %307 : vector<1x1x32x32xf32> to vector<32x32xf32>
    %cst_230 = arith.constant dense<0.000000e+00> : vector<16x32xf32>
    %309 = tpu.matmul %292, %308, %cst_230 {dimension_numbers = #tpu.dot_dimension_numbers<[1], [0], [0], [1], [0, 0, 1, 1], [], []>} : vector<16x32xf32>, vector<32x32xf32>, vector<16x32xf32> -> vector<16x32xf32>
    %c1_231 = arith.constant 1 : index
    %c1_232 = arith.constant 1 : index
    %c0_233 = arith.constant 0 : index
    %c0_234 = arith.constant 0 : index
    %310 = vector.load %arg11[%c1_231, %c1_232, %c0_233, %c0_234] : memref<2x2x1x32xf32, #tpu.memory_space<vmem>>, vector<1x1x1x32xf32>
    %311 = vector.shape_cast %310 : vector<1x1x1x32xf32> to vector<1x32xf32>
    %312 = vector.broadcast %311 : vector<1x32xf32> to vector<16x32xf32>
    %313 = arith.addf %309, %312 : vector<16x32xf32>
    %cst_235 = arith.constant 0.000000e+00 : f32
    %314 = vector.broadcast %cst_235 : f32 to vector<8x32xf32>
    %c1_236 = arith.constant 1 : index
    %c0_237 = arith.constant 0 : index
    %c0_238 = arith.constant 0 : index
    %c0_239 = arith.constant 0 : index
    %315 = vector.load %arg14[%c1_236, %c0_237, %c0_238, %c0_239] : memref<2x3x32x32xf32, #tpu.memory_space<vmem>>, vector<1x1x32x32xf32>
    %316 = vector.shape_cast %315 : vector<1x1x32x32xf32> to vector<32x32xf32>
    %cst_240 = arith.constant dense<0.000000e+00> : vector<16x32xf32>
    %317 = tpu.matmul %299, %316, %cst_240 {dimension_numbers = #tpu.dot_dimension_numbers<[1], [0], [0], [1], [0, 0, 1, 1], [], []>} : vector<16x32xf32>, vector<32x32xf32>, vector<16x32xf32> -> vector<16x32xf32>
    %c1_241 = arith.constant 1 : index
    %c0_242 = arith.constant 0 : index
    %c0_243 = arith.constant 0 : index
    %c0_244 = arith.constant 0 : index
    %318 = vector.load %arg15[%c1_241, %c0_242, %c0_243, %c0_244] : memref<2x3x32x32xf32, #tpu.memory_space<vmem>>, vector<1x1x32x32xf32>
    %319 = vector.shape_cast %318 : vector<1x1x32x32xf32> to vector<32x32xf32>
    %cst_245 = arith.constant dense<0.000000e+00> : vector<16x32xf32>
    %320 = tpu.matmul %313, %319, %cst_245 {dimension_numbers = #tpu.dot_dimension_numbers<[1], [0], [0], [1], [0, 0, 1, 1], [], []>} : vector<16x32xf32>, vector<32x32xf32>, vector<16x32xf32> -> vector<16x32xf32>
    %321 = tpu.transpose %317, [1, 0] : vector<16x32xf32> -> vector<32x16xf32>
    %c0_246 = arith.constant 0 : index
    %c0_247 = arith.constant 0 : index
    %322 = vector.load %arg16[%c0_246, %c0_247] : memref<8x16xf32, #tpu.memory_space<vmem>>, vector<8x16xf32>
    %323 = vector.extract_strided_slice %284 {offsets = [0, 0], sizes = [8, 16], strides = [1, 1]} : vector<8x32xf32> to vector<8x16xf32>
    %324 = vector.extract_strided_slice %321 {offsets = [0, 0], sizes = [16, 16], strides = [1, 1]} : vector<32x16xf32> to vector<16x16xf32>
    %cst_248 = arith.constant dense<0.000000e+00> : vector<8x16xf32>
    %325 = tpu.matmul %323, %324, %cst_248 {dimension_numbers = #tpu.dot_dimension_numbers<[1], [0], [0], [1], [0, 0, 1, 1], [], []>} : vector<8x16xf32>, vector<16x16xf32>, vector<8x16xf32> -> vector<8x16xf32>
    %326 = arith.addf %325, %322 : vector<8x16xf32>
    %cst_249 = arith.constant dense<0xFF800000> : vector<8xf32>
    %327 = vector.multi_reduction <maximumf>, %326, %cst_249 [1] : vector<8x16xf32> to vector<8xf32>
    %328 = vector.shape_cast %327 : vector<8xf32> to vector<8x1xf32>
    %329 = vector.broadcast %328 : vector<8x1xf32> to vector<8x16xf32>
    %330 = arith.subf %326, %329 : vector<8x16xf32>
    %331 = math.exp %330 : vector<8x16xf32>
    %cst_250 = arith.constant dense<0.000000e+00> : vector<8xf32>
    %332 = vector.multi_reduction <add>, %331, %cst_250 [1] : vector<8x16xf32> to vector<8xf32>
    %333 = vector.shape_cast %332 : vector<8xf32> to vector<8x1xf32>
    %cst_251 = arith.constant -1.000000e+20 : f32
    %334 = vector.broadcast %cst_251 : f32 to vector<8x1xf32>
    %335 = arith.cmpf ogt, %328, %334 : vector<8x1xf32>
    %336 = arith.extui %335 : vector<8x1xi1> to vector<8x1xi32>
    %337 = arith.sitofp %336 : vector<8x1xi32> to vector<8x1xf32>
    %338 = arith.divf %337, %333 : vector<8x1xf32>
    %339 = vector.broadcast %338 : vector<8x1xf32> to vector<8x16xf32>
    %340 = arith.mulf %331, %339 : vector<8x16xf32>
    %341 = vector.extract_strided_slice %320 {offsets = [0, 0], sizes = [16, 16], strides = [1, 1]} : vector<16x32xf32> to vector<16x16xf32>
    %cst_252 = arith.constant dense<0.000000e+00> : vector<8x16xf32>
    %342 = tpu.matmul %340, %341, %cst_252 {dimension_numbers = #tpu.dot_dimension_numbers<[1], [0], [0], [1], [0, 0, 1, 1], [], []>} : vector<8x16xf32>, vector<16x16xf32>, vector<8x16xf32> -> vector<8x16xf32>
    %343 = vector.extract_strided_slice %284 {offsets = [0, 16], sizes = [8, 16], strides = [1, 1]} : vector<8x32xf32> to vector<8x16xf32>
    %344 = vector.extract_strided_slice %321 {offsets = [16, 0], sizes = [16, 16], strides = [1, 1]} : vector<32x16xf32> to vector<16x16xf32>
    %cst_253 = arith.constant dense<0.000000e+00> : vector<8x16xf32>
    %345 = tpu.matmul %343, %344, %cst_253 {dimension_numbers = #tpu.dot_dimension_numbers<[1], [0], [0], [1], [0, 0, 1, 1], [], []>} : vector<8x16xf32>, vector<16x16xf32>, vector<8x16xf32> -> vector<8x16xf32>
    %346 = arith.addf %345, %322 : vector<8x16xf32>
    %cst_254 = arith.constant dense<0xFF800000> : vector<8xf32>
    %347 = vector.multi_reduction <maximumf>, %346, %cst_254 [1] : vector<8x16xf32> to vector<8xf32>
    %348 = vector.shape_cast %347 : vector<8xf32> to vector<8x1xf32>
    %349 = vector.broadcast %348 : vector<8x1xf32> to vector<8x16xf32>
    %350 = arith.subf %346, %349 : vector<8x16xf32>
    %351 = math.exp %350 : vector<8x16xf32>
    %cst_255 = arith.constant dense<0.000000e+00> : vector<8xf32>
    %352 = vector.multi_reduction <add>, %351, %cst_255 [1] : vector<8x16xf32> to vector<8xf32>
    %353 = vector.shape_cast %352 : vector<8xf32> to vector<8x1xf32>
    %cst_256 = arith.constant -1.000000e+20 : f32
    %354 = vector.broadcast %cst_256 : f32 to vector<8x1xf32>
    %355 = arith.cmpf ogt, %348, %354 : vector<8x1xf32>
    %356 = arith.extui %355 : vector<8x1xi1> to vector<8x1xi32>
    %357 = arith.sitofp %356 : vector<8x1xi32> to vector<8x1xf32>
    %358 = arith.divf %357, %353 : vector<8x1xf32>
    %359 = vector.broadcast %358 : vector<8x1xf32> to vector<8x16xf32>
    %360 = arith.mulf %351, %359 : vector<8x16xf32>
    %361 = vector.extract_strided_slice %320 {offsets = [0, 16], sizes = [16, 16], strides = [1, 1]} : vector<16x32xf32> to vector<16x16xf32>
    %cst_257 = arith.constant dense<0.000000e+00> : vector<8x16xf32>
    %362 = tpu.matmul %360, %361, %cst_257 {dimension_numbers = #tpu.dot_dimension_numbers<[1], [0], [0], [1], [0, 0, 1, 1], [], []>} : vector<8x16xf32>, vector<16x16xf32>, vector<8x16xf32> -> vector<8x16xf32>
    %363 = tpu.concatenate %342, %362 in 1 : vector<8x16xf32>, vector<8x16xf32> -> vector<8x32xf32>
    %364 = arith.addf %314, %363 : vector<8x32xf32>
    %cst_258 = arith.constant 5.000000e-01 : f32
    %365 = vector.broadcast %cst_258 : f32 to vector<8x32xf32>
    %366 = arith.mulf %365, %364 : vector<8x32xf32>
    %cst_259 = arith.constant 4.471500e-02 : f32
    %367 = vector.broadcast %cst_259 : f32 to vector<8x32xf32>
    %368 = arith.mulf %367, %364 : vector<8x32xf32>
    %369 = arith.mulf %368, %364 : vector<8x32xf32>
    %370 = arith.mulf %369, %364 : vector<8x32xf32>
    %371 = arith.addf %364, %370 : vector<8x32xf32>
    %cst_260 = arith.constant 0.797884583 : f32
    %372 = vector.broadcast %cst_260 : f32 to vector<8x32xf32>
    %373 = arith.mulf %372, %371 : vector<8x32xf32>
    %374 = math.tanh %373 : vector<8x32xf32>
    %cst_261 = arith.constant 1.000000e+00 : f32
    %375 = vector.broadcast %cst_261 : f32 to vector<8x32xf32>
    %376 = arith.addf %375, %374 : vector<8x32xf32>
    %377 = arith.mulf %366, %376 : vector<8x32xf32>
    %c1_262 = arith.constant 1 : index
    %c0_263 = arith.constant 0 : index
    %c0_264 = arith.constant 0 : index
    %c0_265 = arith.constant 0 : index
    %378 = vector.load %arg12[%c1_262, %c0_263, %c0_264, %c0_265] : memref<2x2x32x32xf32, #tpu.memory_space<vmem>>, vector<1x1x32x32xf32>
    %379 = vector.shape_cast %378 : vector<1x1x32x32xf32> to vector<32x32xf32>
    %cst_266 = arith.constant dense<0.000000e+00> : vector<8x32xf32>
    %380 = tpu.matmul %377, %379, %cst_266 {dimension_numbers = #tpu.dot_dimension_numbers<[1], [0], [0], [1], [0, 0, 1, 1], [], []>} : vector<8x32xf32>, vector<32x32xf32>, vector<8x32xf32> -> vector<8x32xf32>
    %c1_267 = arith.constant 1 : index
    %c0_268 = arith.constant 0 : index
    %c0_269 = arith.constant 0 : index
    %c0_270 = arith.constant 0 : index
    %381 = vector.load %arg13[%c1_267, %c0_268, %c0_269, %c0_270] : memref<2x2x1x32xf32, #tpu.memory_space<vmem>>, vector<1x1x1x32xf32>
    %382 = vector.shape_cast %381 : vector<1x1x1x32xf32> to vector<1x32xf32>
    %383 = vector.broadcast %382 : vector<1x32xf32> to vector<8x32xf32>
    %384 = arith.addf %380, %383 : vector<8x32xf32>
    %c1_271 = arith.constant 1 : index
    %c0_272 = arith.constant 0 : index
    %385 = memref.load %arg21[%c1_271, %c0_272] : memref<2x2xf32, #tpu.memory_space<smem>>
    %386 = vector.broadcast %385 : f32 to vector<8x32xf32>
    %387 = arith.mulf %386, %384 : vector<8x32xf32>
    %cst_273 = arith.constant 1.000000e+00 : f32
    %388 = arith.subf %cst_273, %385 : f32
    %389 = vector.broadcast %388 : f32 to vector<8x32xf32>
    %390 = arith.mulf %389, %270 : vector<8x32xf32>
    %391 = arith.addf %387, %390 : vector<8x32xf32>
    %c0_274 = arith.constant 0 : index
    %c0_275 = arith.constant 0 : index
    %392 = vector.load %arg23[%c0_274, %c0_275] : memref<24x32xf32, #tpu.memory_space<vmem>>, vector<8x32xf32>
    tpu.vector_store %arg23[%c0_274, %c0_275], %391 {strides = array<i32>} : memref<24x32xf32, #tpu.memory_space<vmem>>, vector<8x32xf32>,
    %cst_276 = arith.constant 0.000000e+00 : f32
    %393 = vector.broadcast %cst_276 : f32 to vector<16x32xf32>
    %c1_277 = arith.constant 1 : index
    %c1_278 = arith.constant 1 : index
    %c0_279 = arith.constant 0 : index
    %c0_280 = arith.constant 0 : index
    %394 = vector.load %arg14[%c1_277, %c1_278, %c0_279, %c0_280] : memref<2x3x32x32xf32, #tpu.memory_space<vmem>>, vector<1x1x32x32xf32>
    %395 = vector.shape_cast %394 : vector<1x1x32x32xf32> to vector<32x32xf32>
    %cst_281 = arith.constant dense<0.000000e+00> : vector<8x32xf32>
    %396 = tpu.matmul %277, %395, %cst_281 {dimension_numbers = #tpu.dot_dimension_numbers<[1], [0], [0], [1], [0, 0, 1, 1], [], []>} : vector<8x32xf32>, vector<32x32xf32>, vector<8x32xf32> -> vector<8x32xf32>
    %c1_282 = arith.constant 1 : index
    %c1_283 = arith.constant 1 : index
    %c0_284 = arith.constant 0 : index
    %c0_285 = arith.constant 0 : index
    %397 = vector.load %arg15[%c1_282, %c1_283, %c0_284, %c0_285] : memref<2x3x32x32xf32, #tpu.memory_space<vmem>>, vector<1x1x32x32xf32>
    %398 = vector.shape_cast %397 : vector<1x1x32x32xf32> to vector<32x32xf32>
    %cst_286 = arith.constant dense<0.000000e+00> : vector<8x32xf32>
    %399 = tpu.matmul %291, %398, %cst_286 {dimension_numbers = #tpu.dot_dimension_numbers<[1], [0], [0], [1], [0, 0, 1, 1], [], []>} : vector<8x32xf32>, vector<32x32xf32>, vector<8x32xf32> -> vector<8x32xf32>
    %400 = tpu.transpose %396, [1, 0] : vector<8x32xf32> -> vector<32x8xf32>
    %c0_287 = arith.constant 0 : index
    %c0_288 = arith.constant 0 : index
    %401 = vector.load %arg17[%c0_287, %c0_288] : memref<16x8xf32, #tpu.memory_space<vmem>>, vector<16x8xf32>
    %402 = vector.extract_strided_slice %306 {offsets = [0, 0], sizes = [16, 16], strides = [1, 1]} : vector<16x32xf32> to vector<16x16xf32>
    %403 = vector.extract_strided_slice %400 {offsets = [0, 0], sizes = [16, 8], strides = [1, 1]} : vector<32x8xf32> to vector<16x8xf32>
    %cst_289 = arith.constant dense<0.000000e+00> : vector<16x8xf32>
    %404 = tpu.matmul %402, %403, %cst_289 {dimension_numbers = #tpu.dot_dimension_numbers<[1], [0], [0], [1], [0, 0, 1, 1], [], []>} : vector<16x16xf32>, vector<16x8xf32>, vector<16x8xf32> -> vector<16x8xf32>
    %405 = arith.addf %404, %401 : vector<16x8xf32>
    %cst_290 = arith.constant dense<0xFF800000> : vector<16xf32>
    %406 = vector.multi_reduction <maximumf>, %405, %cst_290 [1] : vector<16x8xf32> to vector<16xf32>
    %407 = vector.shape_cast %406 : vector<16xf32> to vector<16x1xf32>
    %408 = vector.broadcast %407 : vector<16x1xf32> to vector<16x8xf32>
    %409 = arith.subf %405, %408 : vector<16x8xf32>
    %410 = math.exp %409 : vector<16x8xf32>
    %cst_291 = arith.constant dense<0.000000e+00> : vector<16xf32>
    %411 = vector.multi_reduction <add>, %410, %cst_291 [1] : vector<16x8xf32> to vector<16xf32>
    %412 = vector.shape_cast %411 : vector<16xf32> to vector<16x1xf32>
    %cst_292 = arith.constant -1.000000e+20 : f32
    %413 = vector.broadcast %cst_292 : f32 to vector<16x1xf32>
    %414 = arith.cmpf ogt, %407, %413 : vector<16x1xf32>
    %415 = arith.extui %414 : vector<16x1xi1> to vector<16x1xi32>
    %416 = arith.sitofp %415 : vector<16x1xi32> to vector<16x1xf32>
    %417 = arith.divf %416, %412 : vector<16x1xf32>
    %418 = vector.broadcast %417 : vector<16x1xf32> to vector<16x8xf32>
    %419 = arith.mulf %410, %418 : vector<16x8xf32>
    %420 = vector.extract_strided_slice %399 {offsets = [0, 0], sizes = [8, 16], strides = [1, 1]} : vector<8x32xf32> to vector<8x16xf32>
    %cst_293 = arith.constant dense<0.000000e+00> : vector<16x16xf32>
    %421 = tpu.matmul %419, %420, %cst_293 {dimension_numbers = #tpu.dot_dimension_numbers<[1], [0], [0], [1], [0, 0, 1, 1], [], []>} : vector<16x8xf32>, vector<8x16xf32>, vector<16x16xf32> -> vector<16x16xf32>
    %422 = vector.extract_strided_slice %306 {offsets = [0, 16], sizes = [16, 16], strides = [1, 1]} : vector<16x32xf32> to vector<16x16xf32>
    %423 = vector.extract_strided_slice %400 {offsets = [16, 0], sizes = [16, 8], strides = [1, 1]} : vector<32x8xf32> to vector<16x8xf32>
    %cst_294 = arith.constant dense<0.000000e+00> : vector<16x8xf32>
    %424 = tpu.matmul %422, %423, %cst_294 {dimension_numbers = #tpu.dot_dimension_numbers<[1], [0], [0], [1], [0, 0, 1, 1], [], []>} : vector<16x16xf32>, vector<16x8xf32>, vector<16x8xf32> -> vector<16x8xf32>
    %425 = arith.addf %424, %401 : vector<16x8xf32>
    %cst_295 = arith.constant dense<0xFF800000> : vector<16xf32>
    %426 = vector.multi_reduction <maximumf>, %425, %cst_295 [1] : vector<16x8xf32> to vector<16xf32>
    %427 = vector.shape_cast %426 : vector<16xf32> to vector<16x1xf32>
    %428 = vector.broadcast %427 : vector<16x1xf32> to vector<16x8xf32>
    %429 = arith.subf %425, %428 : vector<16x8xf32>
    %430 = math.exp %429 : vector<16x8xf32>
    %cst_296 = arith.constant dense<0.000000e+00> : vector<16xf32>
    %431 = vector.multi_reduction <add>, %430, %cst_296 [1] : vector<16x8xf32> to vector<16xf32>
    %432 = vector.shape_cast %431 : vector<16xf32> to vector<16x1xf32>
    %cst_297 = arith.constant -1.000000e+20 : f32
    %433 = vector.broadcast %cst_297 : f32 to vector<16x1xf32>
    %434 = arith.cmpf ogt, %427, %433 : vector<16x1xf32>
    %435 = arith.extui %434 : vector<16x1xi1> to vector<16x1xi32>
    %436 = arith.sitofp %435 : vector<16x1xi32> to vector<16x1xf32>
    %437 = arith.divf %436, %432 : vector<16x1xf32>
    %438 = vector.broadcast %437 : vector<16x1xf32> to vector<16x8xf32>
    %439 = arith.mulf %430, %438 : vector<16x8xf32>
    %440 = vector.extract_strided_slice %399 {offsets = [0, 16], sizes = [8, 16], strides = [1, 1]} : vector<8x32xf32> to vector<8x16xf32>
    %cst_298 = arith.constant dense<0.000000e+00> : vector<16x16xf32>
    %441 = tpu.matmul %439, %440, %cst_298 {dimension_numbers = #tpu.dot_dimension_numbers<[1], [0], [0], [1], [0, 0, 1, 1], [], []>} : vector<16x8xf32>, vector<8x16xf32>, vector<16x16xf32> -> vector<16x16xf32>
    %442 = tpu.concatenate %421, %441 in 1 : vector<16x16xf32>, vector<16x16xf32> -> vector<16x32xf32>
    %443 = arith.addf %393, %442 : vector<16x32xf32>
    %c1_299 = arith.constant 1 : index
    %c2_300 = arith.constant 2 : index
    %c0_301 = arith.constant 0 : index
    %c0_302 = arith.constant 0 : index
    %444 = vector.load %arg14[%c1_299, %c2_300, %c0_301, %c0_302] : memref<2x3x32x32xf32, #tpu.memory_space<vmem>>, vector<1x1x32x32xf32>
    %445 = vector.shape_cast %444 : vector<1x1x32x32xf32> to vector<32x32xf32>
    %cst_303 = arith.constant dense<0.000000e+00> : vector<16x32xf32>
    %446 = tpu.matmul %299, %445, %cst_303 {dimension_numbers = #tpu.dot_dimension_numbers<[1], [0], [0], [1], [0, 0, 1, 1], [], []>} : vector<16x32xf32>, vector<32x32xf32>, vector<16x32xf32> -> vector<16x32xf32>
    %c1_304 = arith.constant 1 : index
    %c2_305 = arith.constant 2 : index
    %c0_306 = arith.constant 0 : index
    %c0_307 = arith.constant 0 : index
    %447 = vector.load %arg15[%c1_304, %c2_305, %c0_306, %c0_307] : memref<2x3x32x32xf32, #tpu.memory_space<vmem>>, vector<1x1x32x32xf32>
    %448 = vector.shape_cast %447 : vector<1x1x32x32xf32> to vector<32x32xf32>
    %cst_308 = arith.constant dense<0.000000e+00> : vector<16x32xf32>
    %449 = tpu.matmul %313, %448, %cst_308 {dimension_numbers = #tpu.dot_dimension_numbers<[1], [0], [0], [1], [0, 0, 1, 1], [], []>} : vector<16x32xf32>, vector<32x32xf32>, vector<16x32xf32> -> vector<16x32xf32>
    %450 = tpu.transpose %446, [1, 0] : vector<16x32xf32> -> vector<32x16xf32>
    %c0_309 = arith.constant 0 : index
    %c0_310 = arith.constant 0 : index
    %451 = vector.load %arg18[%c0_309, %c0_310] : memref<16x16xf32, #tpu.memory_space<vmem>>, vector<16x16xf32>
    %452 = vector.extract_strided_slice %306 {offsets = [0, 0], sizes = [16, 16], strides = [1, 1]} : vector<16x32xf32> to vector<16x16xf32>
    %453 = vector.extract_strided_slice %450 {offsets = [0, 0], sizes = [16, 16], strides = [1, 1]} : vector<32x16xf32> to vector<16x16xf32>
    %cst_311 = arith.constant dense<0.000000e+00> : vector<16x16xf32>
    %454 = tpu.matmul %452, %453, %cst_311 {dimension_numbers = #tpu.dot_dimension_numbers<[1], [0], [0], [1], [0, 0, 1, 1], [], []>} : vector<16x16xf32>, vector<16x16xf32>, vector<16x16xf32> -> vector<16x16xf32>
    %455 = arith.addf %454, %451 : vector<16x16xf32>
    %cst_312 = arith.constant dense<0xFF800000> : vector<16xf32>
    %456 = vector.multi_reduction <maximumf>, %455, %cst_312 [1] : vector<16x16xf32> to vector<16xf32>
    %457 = vector.shape_cast %456 : vector<16xf32> to vector<16x1xf32>
    %458 = vector.broadcast %457 : vector<16x1xf32> to vector<16x16xf32>
    %459 = arith.subf %455, %458 : vector<16x16xf32>
    %460 = math.exp %459 : vector<16x16xf32>
    %cst_313 = arith.constant dense<0.000000e+00> : vector<16xf32>
    %461 = vector.multi_reduction <add>, %460, %cst_313 [1] : vector<16x16xf32> to vector<16xf32>
    %462 = vector.shape_cast %461 : vector<16xf32> to vector<16x1xf32>
    %cst_314 = arith.constant -1.000000e+20 : f32
    %463 = vector.broadcast %cst_314 : f32 to vector<16x1xf32>
    %464 = arith.cmpf ogt, %457, %463 : vector<16x1xf32>
    %465 = arith.extui %464 : vector<16x1xi1> to vector<16x1xi32>
    %466 = arith.sitofp %465 : vector<16x1xi32> to vector<16x1xf32>
    %467 = arith.divf %466, %462 : vector<16x1xf32>
    %468 = vector.broadcast %467 : vector<16x1xf32> to vector<16x16xf32>
    %469 = arith.mulf %460, %468 : vector<16x16xf32>
    %470 = vector.extract_strided_slice %449 {offsets = [0, 0], sizes = [16, 16], strides = [1, 1]} : vector<16x32xf32> to vector<16x16xf32>
    %cst_315 = arith.constant dense<0.000000e+00> : vector<16x16xf32>
    %471 = tpu.matmul %469, %470, %cst_315 {dimension_numbers = #tpu.dot_dimension_numbers<[1], [0], [0], [1], [0, 0, 1, 1], [], []>} : vector<16x16xf32>, vector<16x16xf32>, vector<16x16xf32> -> vector<16x16xf32>
    %472 = vector.extract_strided_slice %306 {offsets = [0, 16], sizes = [16, 16], strides = [1, 1]} : vector<16x32xf32> to vector<16x16xf32>
    %473 = vector.extract_strided_slice %450 {offsets = [16, 0], sizes = [16, 16], strides = [1, 1]} : vector<32x16xf32> to vector<16x16xf32>
    %cst_316 = arith.constant dense<0.000000e+00> : vector<16x16xf32>
    %474 = tpu.matmul %472, %473, %cst_316 {dimension_numbers = #tpu.dot_dimension_numbers<[1], [0], [0], [1], [0, 0, 1, 1], [], []>} : vector<16x16xf32>, vector<16x16xf32>, vector<16x16xf32> -> vector<16x16xf32>
    %475 = arith.addf %474, %451 : vector<16x16xf32>
    %cst_317 = arith.constant dense<0xFF800000> : vector<16xf32>
    %476 = vector.multi_reduction <maximumf>, %475, %cst_317 [1] : vector<16x16xf32> to vector<16xf32>
    %477 = vector.shape_cast %476 : vector<16xf32> to vector<16x1xf32>
    %478 = vector.broadcast %477 : vector<16x1xf32> to vector<16x16xf32>
    %479 = arith.subf %475, %478 : vector<16x16xf32>
    %480 = math.exp %479 : vector<16x16xf32>
    %cst_318 = arith.constant dense<0.000000e+00> : vector<16xf32>
    %481 = vector.multi_reduction <add>, %480, %cst_318 [1] : vector<16x16xf32> to vector<16xf32>
    %482 = vector.shape_cast %481 : vector<16xf32> to vector<16x1xf32>
    %cst_319 = arith.constant -1.000000e+20 : f32
    %483 = vector.broadcast %cst_319 : f32 to vector<16x1xf32>
    %484 = arith.cmpf ogt, %477, %483 : vector<16x1xf32>
    %485 = arith.extui %484 : vector<16x1xi1> to vector<16x1xi32>
    %486 = arith.sitofp %485 : vector<16x1xi32> to vector<16x1xf32>
    %487 = arith.divf %486, %482 : vector<16x1xf32>
    %488 = vector.broadcast %487 : vector<16x1xf32> to vector<16x16xf32>
    %489 = arith.mulf %480, %488 : vector<16x16xf32>
    %490 = vector.extract_strided_slice %449 {offsets = [0, 16], sizes = [16, 16], strides = [1, 1]} : vector<16x32xf32> to vector<16x16xf32>
    %cst_320 = arith.constant dense<0.000000e+00> : vector<16x16xf32>
    %491 = tpu.matmul %489, %490, %cst_320 {dimension_numbers = #tpu.dot_dimension_numbers<[1], [0], [0], [1], [0, 0, 1, 1], [], []>} : vector<16x16xf32>, vector<16x16xf32>, vector<16x16xf32> -> vector<16x16xf32>
    %492 = tpu.concatenate %471, %491 in 1 : vector<16x16xf32>, vector<16x16xf32> -> vector<16x32xf32>
    %493 = arith.addf %443, %492 : vector<16x32xf32>
    %cst_321 = arith.constant 5.000000e-01 : f32
    %494 = vector.broadcast %cst_321 : f32 to vector<16x32xf32>
    %495 = arith.mulf %494, %493 : vector<16x32xf32>
    %cst_322 = arith.constant 4.471500e-02 : f32
    %496 = vector.broadcast %cst_322 : f32 to vector<16x32xf32>
    %497 = arith.mulf %496, %493 : vector<16x32xf32>
    %498 = arith.mulf %497, %493 : vector<16x32xf32>
    %499 = arith.mulf %498, %493 : vector<16x32xf32>
    %500 = arith.addf %493, %499 : vector<16x32xf32>
    %cst_323 = arith.constant 0.797884583 : f32
    %501 = vector.broadcast %cst_323 : f32 to vector<16x32xf32>
    %502 = arith.mulf %501, %500 : vector<16x32xf32>
    %503 = math.tanh %502 : vector<16x32xf32>
    %cst_324 = arith.constant 1.000000e+00 : f32
    %504 = vector.broadcast %cst_324 : f32 to vector<16x32xf32>
    %505 = arith.addf %504, %503 : vector<16x32xf32>
    %506 = arith.mulf %495, %505 : vector<16x32xf32>
    %c1_325 = arith.constant 1 : index
    %c1_326 = arith.constant 1 : index
    %c0_327 = arith.constant 0 : index
    %c0_328 = arith.constant 0 : index
    %507 = vector.load %arg12[%c1_325, %c1_326, %c0_327, %c0_328] : memref<2x2x32x32xf32, #tpu.memory_space<vmem>>, vector<1x1x32x32xf32>
    %508 = vector.shape_cast %507 : vector<1x1x32x32xf32> to vector<32x32xf32>
    %cst_329 = arith.constant dense<0.000000e+00> : vector<16x32xf32>
    %509 = tpu.matmul %506, %508, %cst_329 {dimension_numbers = #tpu.dot_dimension_numbers<[1], [0], [0], [1], [0, 0, 1, 1], [], []>} : vector<16x32xf32>, vector<32x32xf32>, vector<16x32xf32> -> vector<16x32xf32>
    %c1_330 = arith.constant 1 : index
    %c1_331 = arith.constant 1 : index
    %c0_332 = arith.constant 0 : index
    %c0_333 = arith.constant 0 : index
    %510 = vector.load %arg13[%c1_330, %c1_331, %c0_332, %c0_333] : memref<2x2x1x32xf32, #tpu.memory_space<vmem>>, vector<1x1x1x32xf32>
    %511 = vector.shape_cast %510 : vector<1x1x1x32xf32> to vector<1x32xf32>
    %512 = vector.broadcast %511 : vector<1x32xf32> to vector<16x32xf32>
    %513 = arith.addf %509, %512 : vector<16x32xf32>
    %c1_334 = arith.constant 1 : index
    %c1_335 = arith.constant 1 : index
    %514 = memref.load %arg21[%c1_334, %c1_335] : memref<2x2xf32, #tpu.memory_space<smem>>
    %515 = vector.broadcast %514 : f32 to vector<16x32xf32>
    %516 = arith.mulf %515, %513 : vector<16x32xf32>
    %cst_336 = arith.constant 1.000000e+00 : f32
    %517 = arith.subf %cst_336, %514 : f32
    %518 = vector.broadcast %517 : f32 to vector<16x32xf32>
    %519 = arith.mulf %518, %292 : vector<16x32xf32>
    %520 = arith.addf %516, %519 : vector<16x32xf32>
    %c8_337 = arith.constant 8 : index
    %c0_338 = arith.constant 0 : index
    %521 = vector.load %arg23[%c8_337, %c0_338] : memref<24x32xf32, #tpu.memory_space<vmem>>, vector<16x32xf32>
    tpu.vector_store %arg23[%c8_337, %c0_338], %520 {strides = array<i32>} : memref<24x32xf32, #tpu.memory_space<vmem>>, vector<16x32xf32>,
    %c0_339 = arith.constant 0 : index
    %c0_340 = arith.constant 0 : index
    %522 = vector.load %arg23[%c0_339, %c0_340] : memref<24x32xf32, #tpu.memory_space<vmem>>, vector<8x32xf32>
    %c0_341 = arith.constant 0 : index
    %c0_342 = arith.constant 0 : index
    %523 = vector.load %arg19[%c0_341, %c0_342] : memref<32x4xf32, #tpu.memory_space<vmem>>, vector<32x4xf32>
    %cst_343 = arith.constant dense<0.000000e+00> : vector<8x4xf32>
    %524 = tpu.matmul %522, %523, %cst_343 {dimension_numbers = #tpu.dot_dimension_numbers<[1], [0], [0], [1], [0, 0, 1, 1], [], []>} : vector<8x32xf32>, vector<32x4xf32>, vector<8x4xf32> -> vector<8x4xf32>
    %c0_344 = arith.constant 0 : index
    %c0_345 = arith.constant 0 : index
    %525 = vector.load %arg20[%c0_344, %c0_345] : memref<1x4xf32, #tpu.memory_space<vmem>>, vector<1x4xf32>
    %526 = vector.broadcast %525 : vector<1x4xf32> to vector<8x4xf32>
    %527 = arith.addf %524, %526 : vector<8x4xf32>
    %c0_346 = arith.constant 0 : index
    %c0_347 = arith.constant 0 : index
    %528 = vector.load %arg22[%c0_346, %c0_347] : memref<8x4xf32, #tpu.memory_space<vmem>>, vector<8x4xf32>
    tpu.vector_store %arg22[%c0_346, %c0_347], %527 {strides = array<i32>} : memref<8x4xf32, #tpu.memory_space<vmem>>, vector<8x4xf32>,
    return
  }
}

</mosaic_0001>

<bundles_post_ra>
// kernel: tpu_custom_call.1
= control target key start
LH: loop header
LB: loop body
LE: loop exit
PB: predicated region body
PF: predicated region fallthrough
CT: control target
= control target key end

     0   :  { %s4280_s0 = inlined_call_operand.hbm [shape: f32[8,12], index: 0, kind: input, shape index: {}]   ;;  %s4281_s1 = inlined_call_operand.vmem [shape: f32[16,20], index: 1, kind: input, shape index: {}]   ;;  %s4282_s2 = inlined_call_operand.vmem [shape: f32[12,32], index: 2, kind: input, shape index: {}]   ;;  %s4283_s3 = inlined_call_operand.vmem [shape: f32[20,32], index: 3, kind: input, shape index: {}]   ;;  %s4284_s4 = inlined_call_operand.hbm [shape: f32[1,32], index: 4, kind: input, shape index: {}]   ;;  %s4285_s5 = inlined_call_operand.hbm [shape: f32[1,32], index: 5, kind: input, shape index: {}]   ;;  %s4286_s6 = inlined_call_operand.hbm [shape: f32[2,2,32,32], index: 6, kind: input, shape index: {}]   ;;  %s4287_s7 = inlined_call_operand.hbm [shape: f32[2,2,32,32], index: 7, kind: input, shape index: {}]   ;;  %s4288_s8 = inlined_call_operand.hbm [shape: f32[2,2,32,32], index: 8, kind: input, shape index: {}]   ;;  %s4289_s9 = inlined_call_operand.hbm [shape: f32[2,2,1,32], index: 9, kind: input, shape index: {}]   ;;  %s4290_s10 = inlined_call_operand.hbm [shape: f32[2,2,1,32], index: 10, kind: input, shape index: {}]   ;;  %s4291_s11 = inlined_call_operand.hbm [shape: f32[2,2,1,32], index: 11, kind: input, shape index: {}]   ;;  %s4292_s12 = inlined_call_operand.hbm [shape: f32[2,2,32,32], index: 12, kind: input, shape index: {}]   ;;  %s4293_s13 = inlined_call_operand.hbm [shape: f32[2,2,1,32], index: 13, kind: input, shape index: {}]   ;;  %s4294_s14 = inlined_call_operand.hbm [shape: f32[2,3,32,32], index: 14, kind: input, shape index: {}]   ;;  %s4295_s15 = inlined_call_operand.hbm [shape: f32[2,3,32,32], index: 15, kind: input, shape index: {}]   ;;  %s4296_s16 = inlined_call_operand.vmem [shape: f32[8,16], index: 16, kind: input, shape index: {}]   ;;  %s4297_s17 = inlined_call_operand.vmem [shape: f32[16,8], index: 17, kind: input, shape index: {}]   ;;  %s4298_s18 = inlined_call_operand.hbm [shape: f32[16,16], index: 18, kind: input, shape index: {}]   ;;  %s4299_s19 = inlined_call_operand.vmem [shape: f32[32,4], index: 19, kind: input, shape index: {}]   ;;  %s4300_s20 = inlined_call_operand.vmem [shape: f32[1,4], index: 20, kind: input, shape index: {}]   ;;  %s4301_s21 = inlined_call_operand.vmem [shape: f32[2,2], index: 21, kind: input, shape index: {}]   ;;  %s4302_s22 = inlined_call_operand.vmem [shape: f32[8,4], index: 22, kind: output, shape index: {}]  }
   0x1   :  { %4306 = sst [smem:[#allocation36_spill]] %s4280_s0 }
   0x2   :  { %4307 = sst [smem:[#allocation37_spill]] %s4281_s1 }
   0x3   :  { %4308 = sst [smem:[#allocation38_spill]] %s4282_s2 }
   0x4   :  { %4309 = sst [smem:[#allocation39_spill]] %s4283_s3 }
   0x5   :  { %4310 = sst [smem:[#allocation40_spill]] %s4284_s4 }
   0x6   :  { %4311 = sst [smem:[#allocation41_spill]] %s4285_s5 }
   0x7   :  { %4312 = sst [smem:[#allocation42_spill]] %s4286_s6 }
   0x8   :  { %27 = vsyncpa [#allocation4], 0 }
   0x9   :  { %28 = vsyncpa [#allocation7], 0 }
   0xa   :  { %29 = vsyncpa [#allocation10], 0 }
   0xb   :  { %30 = vsyncpa [#allocation13], 0 }
   0xc   :  { %31 = vsyncpa [#allocation16], 0 }
   0xd   :  { %32 = vsyncpa [#allocation19], 0 }
   0xe   :  { %33 = vsyncpa [#allocation22], 0 }
   0xf   :  { %34 = vsyncpa [#allocation25], 0  ;;  %s4313_s29 = sld [smem:[#allocation40_spill]] }
  0x15   :  { %s58_s30 = sshll.u32 %s4313_s29, 4  ;;  %s59_s30 = int_to_ptr.hbm [resolvable:$true] %s58_s30 }
  0x16   :  { %35 = vsyncpa [#allocation5], 0  ;;  %s3445_s4 = smov [#allocation6]   ;;  %s4314_s5 = sld [smem:[#allocation42_spill]] }
  0x17   :  { %s60_s0 = sshll.u32 %s3445_s4, 4  ;;  %s3446_s6 = smov [#allocation9]   ;;  %s61_s0 = int_to_ptr.vmem [resolvable:$true] %s60_s0 }
  0x18   :  { %63 = dma.hbm_to_vmem [thread:$0]  %s59_s30, 16, %s61_s0, [#allocation7]  }
  0x19   :  { %s81_s25 = sshll.u32 %s3446_s6, 4  ;;  %s3447_s26 = smov 128   ;;  %s82_s25 = int_to_ptr.vmem [resolvable:$true] %s81_s25 }
  0x1a   :  { %s3448_s2 = smov 8   ;;  %s105_s28 = sshll.u32 %s4288_s8, 4  ;;  %s106_s28 = int_to_ptr.hbm [resolvable:$true] %s105_s28 }
  0x1b   :  { %s3449_s29 = smov [#allocation12]   ;;  %s131_s23 = sshll.u32 %s4290_s10, 4  ;;  %s132_s23 = int_to_ptr.hbm [resolvable:$true] %s131_s23 }
  0x1c   :  { %s79_s24 = sshll.u32 %s4314_s5, 4  ;;  %s107_s4 = sshll.u32 %s3449_s29, 4  ;;  %s80_s24 = int_to_ptr.hbm [resolvable:$true] %s79_s24  ;;  %s108_s4 = int_to_ptr.vmem [resolvable:$true] %s107_s4 }
  0x1d   :  { %87 = dma.hbm_to_vmem [thread:$0]  %s80_s24, 2048, %s82_s25, [#allocation10], %s3447_s26, %s3447_s26, %s3448_s2  }
  0x1e   :  { %113 = dma.hbm_to_vmem [thread:$0]  %s106_s28, 2048, %s108_s4, [#allocation13], %s3447_s26, %s3447_s26, %s3448_s2  }
  0x1f   :  { %s3450_s1 = smov [#allocation15]   ;;  %s157_s25 = sshll.u32 %s4292_s12, 4  ;;  %s158_s25 = int_to_ptr.hbm [resolvable:$true] %s157_s25 }
  0x20   :  { %s133_s5 = sshll.u32 %s3450_s1, 4  ;;  %s3451_s8 = smov 16   ;;  %s134_s5 = int_to_ptr.vmem [resolvable:$true] %s133_s5 }
  0x21   :  { %s3452_s27 = smov 1   ;;  %s183_s29 = sshll.u32 %s4294_s14, 4  ;;  %s184_s29 = int_to_ptr.hbm [resolvable:$true] %s183_s29 }
  0x22   :  { %139 = dma.hbm_to_vmem [thread:$0]  %s132_s23, 64, %s134_s5, [#allocation16], %s3451_s8, %s3451_s8, %s3452_s27  }
  0x23   :  { %s3453_s10 = smov [#allocation18]   ;;  %s3454_s12 = smov [#allocation21]  }
  0x24   :  { %s159_s4 = sshll.u32 %s3453_s10, 4  ;;  %s185_s30 = sshll.u32 %s3454_s12, 4  ;;  %s160_s4 = int_to_ptr.vmem [resolvable:$true] %s159_s4  ;;  %s186_s30 = int_to_ptr.vmem [resolvable:$true] %s185_s30 }
  0x25   :  { %165 = dma.hbm_to_vmem [thread:$0]  %s158_s25, 2048, %s160_s4, [#allocation19], %s3447_s26, %s3447_s26, %s3448_s2  }
  0x26   :  { %s4315_s24 = sld [smem:[#allocation36_spill]]  ;;  %s3455_s28 = smov [#allocation3]  }
  0x27   :  { %191 = dma.hbm_to_vmem [thread:$0]  %s184_s29, 3072, %s186_s30, [#allocation22], %s3447_s26, %s3447_s26, %s3448_s2  }
  0x28   :  { %s4316_s5 = sld [smem:[#allocation41_spill]]  ;;  %s43_s10 = sshll.u32 %s3455_s28, 4  ;;  %s44_s10 = int_to_ptr.vmem [resolvable:$true] %s43_s10 }
  0x29   :  { %s3456_s25 = smov [#allocation8]   ;;  %s92_s1 = sshll.u32 %s4287_s7, 4  ;;  %s93_s1 = int_to_ptr.hbm [resolvable:$true] %s92_s1 }
  0x2a   :  { %s71_s4 = sshll.u32 %s3456_s25, 4  ;;  %s118_s30 = sshll.u32 %s4289_s9, 4  ;;  %s72_s4 = int_to_ptr.vmem [resolvable:$true] %s71_s4  ;;  %s119_s30 = int_to_ptr.hbm [resolvable:$true] %s118_s30 }
  0x2b   :  { %s3457_s14 = smov [#allocation11]   ;;  %s144_s7 = sshll.u32 %s4291_s11, 4  ;;  %s145_s7 = int_to_ptr.hbm [resolvable:$true] %s144_s7 }
  0x2c   :  { %s41_s6 = sshll.u32 %s4315_s24, 4  ;;  %s94_s23 = sshll.u32 %s3457_s14, 4  ;;  %s42_s6 = int_to_ptr.hbm [resolvable:$true] %s41_s6  ;;  %s95_s23 = int_to_ptr.vmem [resolvable:$true] %s94_s23 }
  0x2d   :  { %46 = dma.hbm_to_vmem [thread:$0]  %s42_s6, 128, %s44_s10, [#allocation4]  }
  0x2e   :  { %s69_s3 = sshll.u32 %s4316_s5, 4  ;;  %s3458_s6 = smov [#allocation14]   ;;  %s70_s3 = int_to_ptr.hbm [resolvable:$true] %s69_s3 }
  0x2f   :  { %74 = dma.hbm_to_vmem [thread:$0]  %s70_s3, 16, %s72_s4, [#allocation7]  }
  0x30   :  { %100 = dma.hbm_to_vmem [thread:$0]  %s93_s1, 2048, %s95_s23, [#allocation10], %s3447_s26, %s3447_s26, %s3448_s2  }
  0x31   :  { %s120_s5 = sshll.u32 %s3458_s6, 4  ;;  %s170_s25 = sshll.u32 %s4293_s13, 4  ;;  %s121_s5 = int_to_ptr.vmem [resolvable:$true] %s120_s5  ;;  %s171_s25 = int_to_ptr.hbm [resolvable:$true] %s170_s25 }
  0x32   :  { %126 = dma.hbm_to_vmem [thread:$0]  %s119_s30, 64, %s121_s5, [#allocation13], %s3451_s8, %s3451_s8, %s3452_s27  }
  0x33   :  { %s3459_s4 = smov [#allocation17]   ;;  %s3460_s0 = smov [#allocation20]  }
  0x34   :  { %s146_s12 = sshll.u32 %s3459_s4, 4  ;;  %s172_s11 = sshll.u32 %s3460_s0, 4  ;;  %s147_s12 = int_to_ptr.vmem [resolvable:$true] %s146_s12  ;;  %s173_s11 = int_to_ptr.vmem [resolvable:$true] %s172_s11 }
  0x35   :  { %152 = dma.hbm_to_vmem [thread:$0]  %s145_s7, 64, %s147_s12, [#allocation16], %s3451_s8, %s3451_s8, %s3452_s27  }
  0x36   :  { %s196_s29 = sshll.u32 %s4295_s15, 4  ;;  %s213_s14 = sshll.u32 %s4298_s18, 4  ;;  %s197_s29 = int_to_ptr.hbm [resolvable:$true] %s196_s29  ;;  %s214_s14 = int_to_ptr.hbm [resolvable:$true] %s213_s14 }
  0x37   :  { %178 = dma.hbm_to_vmem [thread:$0]  %s171_s25, 64, %s173_s11, [#allocation19], %s3451_s8, %s3451_s8, %s3452_s27  }
  0x38   :  { %s3461_s23 = smov [#allocation23]   ;;  %s3462_s5 = smov [#allocation24]  }
  0x39   :  { %s198_s6 = sshll.u32 %s3461_s23, 4  ;;  %s215_s15 = sshll.u32 %s3462_s5, 4  ;;  %s199_s6 = int_to_ptr.vmem [resolvable:$true] %s198_s6  ;;  %s216_s15 = int_to_ptr.vmem [resolvable:$true] %s215_s15 }
  0x3a   :  { %204 = dma.hbm_to_vmem [thread:$0]  %s197_s29, 3072, %s199_s6, [#allocation22], %s3447_s26, %s3447_s26, %s3448_s2  }
  0x3b   :  { %s231_s7 = sshll.u32 %s4301_s21, 4  ;;  %s3463_s18 = smov [#allocation26]   ;;  %s232_s7 = int_to_ptr.vmem [resolvable:$true] %s231_s7 }
  0x3c   :  { %221 = dma.hbm_to_vmem [thread:$0]  %s214_s14, 256, %s216_s15, [#allocation25], %s3447_s26, %s3447_s26, %s3448_s2  }
  0x3d   :  { %234 = dma.vmem_to_smem %s232_s7, 32, %s3463_s18, [#allocation5]  }
  0x3e   :  { %3427 = dma.done.wait [#allocation4], 128  }
  0x3f   :  { %3428 = vsyncadd [#allocation4], 4294967168 }
  0x40   :  { %3429 = dma.done.wait [#allocation7], 32  }
  0x41   :  { %3430 = vsyncadd [#allocation7], 4294967264 }
  0x42   :  { %3431 = dma.done.wait [#allocation10], 4096  }
  0x43   :  { %3432 = vsyncadd [#allocation10], 4294963200 }
  0x44   :  { %3433 = dma.done.wait [#allocation13], 2112  }
  0x45   :  { %3434 = vsyncadd [#allocation13], 4294965184 }
  0x46   :  { %3435 = dma.done.wait [#allocation16], 128  }
  0x47   :  { %3436 = vsyncadd [#allocation16], 4294967168 }
  0x48   :  { %3437 = dma.done.wait [#allocation19], 2112  }
  0x49   :  { %3438 = vsyncadd [#allocation19], 4294965184 }
  0x4a   :  { %3439 = dma.done.wait [#allocation22], 6144  }
  0x4b   :  { %3440 = vsyncadd [#allocation22], 4294961152 }
  0x4c   :  { %3441 = dma.done.wait [#allocation25], 256  }
  0x4d   :  { %3442 = vsyncadd [#allocation25], 4294967040 }
  0x4e   :  { %3443 = dma.done.wait [#allocation5], 32  }
  0x4f   :  { %3444 = vsyncadd [#allocation5], 4294967264 }
  0x50   :  { %295 = sfence }
  0x51   :  { %s4317_s2 = sld [smem:[#allocation38_spill]]  ;;  %vm307_vm0 = vcmask 1043456   ;;  %v296_v2 = vld [vmem:[#allocation3] sm:$0xff]  ;;  %vm303_vm1 = vcmask 97280   ;;  %vm343_vm2 = vcmask 162816   ;;  %v382_v14 = vld [vmem:[#allocation9 + $0x8] sm:$0xff] }
  0x52   :  { %s4318_s4 = sld [smem:[#allocation39_spill]]  ;;  %v384_v8 = vld [vmem:[#allocation9 + $0x18] sm:$0xff]  ;;  %v383_v11 = vld [vmem:[#allocation9 + $0x10] sm:$0xff]  ;;  %v413_v15 = vld [vmem:[#allocation11 + $0x8] sm:$0xff]  ;;  %vm332_vm3 = vcmask 261120   ;;  %s3464_s23 = smov 112  }
  0x53   :  { %s4319_s13 = sld [smem:[#allocation37_spill]]  ;;  %v415_v9 = vld [vmem:[#allocation11 + $0x18] sm:$0xff]  ;;  %404 = vmatpush.msra.mxu2 %v384_v8  ;;  %v414_v12 = vld [vmem:[#allocation11 + $0x10] sm:$0xff]  ;;  %v441_v16 = vld [vmem:[#allocation12 + $0x8] sm:$0xff]  ;;  %vm642_vm4 = vcmask 130048   ;;  %vm958_vm15 = vcmask 64512  }
  0x54   :  { %v443_v10 = vld [vmem:[#allocation12 + $0x18] sm:$0xff]  ;;  %432 = vmatpush.msra.mxu3 %v415_v9  ;;  %v442_v13 = vld [vmem:[#allocation12 + $0x10] sm:$0xff]  ;;  %v381_v17 = vld [vmem:[#allocation9] sm:$0xff]  ;;  %s860_s18 = sld [smem:[#allocation26]] }
  0x55   :  { %405 = vmatpush.msra.mxu2 %v383_v11  ;;  %v412_v18 = vld [vmem:[#allocation11] sm:$0xff]  ;;  %v474_v20 = vld [vmem:[#allocation9 + $0x38] sm:$0xff]  ;;  %v473_v23 = vld [vmem:[#allocation9 + $0x30] sm:$0xff]  ;;  %s2856_s26 = sld [smem:[#allocation26 + $0x1]] }
  0x56   :  { %433 = vmatpush.msra.mxu3 %v414_v12  ;;  %v440_v19 = vld [vmem:[#allocation12] sm:$0xff]  ;;  %v513_v21 = vld [vmem:[#allocation11 + $0x38] sm:$0xff]  ;;  %v512_v24 = vld [vmem:[#allocation11 + $0x30] sm:$0xff] }
  0x57   :  { %v298_v0 = vld [vmem:[%s4317_s2 + $0x8] sm:$0xf]  ;;  %v297_v1 = vld [vmem:[%s4317_s2] sm:$0xff]  ;;  %406 = vmatpush.msra.mxu2 %v382_v14  ;;  %v545_v25 = vld [vmem:[#allocation12 + $0x30] sm:$0xff] }
  0x58   :  { %2789 = vmatpush.msk.msra.mxu0 %vm307_vm0, %v298_v0  ;;  %v338_v3 = vld [vmem:[%s4318_s4 + $0x10] sm:$0xf]  ;;  %v337_v4 = vld [vmem:[%s4318_s4 + $0x8] sm:$0xff]  ;;  %v336_v5 = vld [vmem:[%s4318_s4] sm:$0xff]  ;;  %434 = vmatpush.msra.mxu3 %v413_v15 }
  0x59   :  { %2791 = vmatpush.msk.msra.mxu1 %vm307_vm0, %v338_v3  ;;  %v334_v6 = vld [vmem:[%s4319_s13] sm:$0xff]  ;;  %v335_v7 = vld [vmem:[%s4319_s13 + $0x8] sm:$0xff]  ;;  %407 = vmatpush.msra.mxu2 %v381_v17  ;;  %v608_v50 = vld [vmem:[#allocation23] sm:$0xff] }
  0x5a   :  { %326 = vmatpush.msra.mxu0 %v297_v1  ;;  %435 = vmatpush.msra.mxu3 %v412_v18  ;;  %v546_v22 = vld [vmem:[#allocation12 + $0x38] sm:$0xff]  ;;  %v472_v26 = vld [vmem:[#allocation9 + $0x28] sm:$0xff]  ;;  %v471_v29 = vld [vmem:[#allocation9 + $0x20] sm:$0xff]  ;;  %s863_s21 = ssub.f32 1.0, %s860_s18 }
  0x5b   :  { %2790 = vmatmul.msk.f32.vlgmr.msra.gmra.mxu0 %vm303_vm1, %v296_v2  ;;  %367 = vmatpush.msra.mxu1 %v337_v4  ;;  %v511_v27 = vld [vmem:[#allocation11 + $0x28] sm:$0xff]  ;;  %v510_v30 = vld [vmem:[#allocation11 + $0x20] sm:$0xff]  ;;  %v2963_v32 = vld [vmem:[#allocation6] ss:$0 sm:$0xff]  ;;  %s1549_s2 = ssub.f32 1.0, %s2856_s26 }
  0x5c   :  { %460 = vmatpush.msrb.mxu0 %v443_v10  ;;  %498 = vmatpush.msrb.mxu2 %v474_v20  ;;  %v544_v28 = vld [vmem:[#allocation12 + $0x28] sm:$0xff]  ;;  %v543_v31 = vld [vmem:[#allocation12 + $0x20] sm:$0xff]  ;;  %v2964_v34 = vld [vmem:[#allocation8] ss:$0 sm:$0xff] }
  0x5d   :  { %368 = vmatpush.msra.mxu1 %v336_v5  ;;  %531 = vmatpush.msrb.mxu3 %v513_v21  ;;  %v611_v46 = vld [vmem:[#allocation23 + $0x18] sm:$0xff]  ;;  %v610_v47 = vld [vmem:[#allocation23 + $0x10] sm:$0xff]  ;;  %v609_v48 = vld [vmem:[#allocation23 + $0x8] sm:$0xff] }
  0x5e   :  { %2792 = vmatmul.msk.f32.vlgmr.msra.gmra.mxu1 %vm343_vm2, %v334_v6  ;;  %461 = vmatpush.msrb.mxu0 %v442_v13  ;;  %v578_v49 = vld [vmem:[#allocation21 + $0x18] sm:$0xff]  ;;  %v577_v51 = vld [vmem:[#allocation21 + $0x10] sm:$0xff]  ;;  %v576_v52 = vld [vmem:[#allocation21 + $0x8] sm:$0xff] }
  0x5f   :  { %499 = vmatpush.msrb.mxu2 %v473_v23  ;;  %532 = vmatpush.msrb.mxu3 %v512_v24  ;;  %v575_v53 = vld [vmem:[#allocation21] sm:$0xff]  ;;  %v900_v54 = vld [vmem:[#allocation23 + $0x38] sm:$0xff]  ;;  %v899_v55 = vld [vmem:[#allocation23 + $0x30] sm:$0xff] }
  0x60   :  { %462 = vmatpush.msrb.mxu0 %v441_v16  ;;  %597 = vmatpush.msrb.mxu1 %v578_v49  ;;  %v898_v56 = vld [vmem:[#allocation23 + $0x28] sm:$0xff]  ;;  %v897_v57 = vld [vmem:[#allocation23 + $0x20] sm:$0xff]  ;;  %v2967_v59 = vld [vmem:[#allocation15] ss:$0 sm:$0xff] }
  0x61   :  { %500 = vmatpush.msrb.mxu2 %v472_v26  ;;  %533 = vmatpush.msrb.mxu3 %v511_v27  ;;  %v2968_v62 = vld [vmem:[#allocation17 + $0x1] ss:$0 sm:$0xff]  ;;  %v2969_v2 = vld [vmem:[#allocation14 + $0x1] ss:$0 sm:$0xff]  ;;  %v2966_v23 = vld [vmem:[#allocation14] ss:$0 sm:$0xff] }
  0x62   :  { %463 = vmatpush.msrb.mxu0 %v440_v19  ;;  %598 = vmatpush.msrb.mxu1 %v577_v51  ;;  %v872_v18 = vld [vmem:[#allocation21 + $0x38] sm:$0xff]  ;;  %v871_v20 = vld [vmem:[#allocation21 + $0x30] sm:$0xff]  ;;  %v869_v24 = vld [vmem:[#allocation21 + $0x20] sm:$0xff] }
  0x63   :  { %501 = vmatpush.msrb.mxu2 %v471_v29  ;;  %534 = vmatpush.msrb.mxu3 %v510_v30  ;;  %v641_v27 = vld [vmem:[%s4296_s16] sm:$0xff] }
  0x64   :  { %564 = vmatpush.msra.mxu0 %v546_v22  ;;  %599 = vmatpush.msrb.mxu1 %v576_v52  ;;  %v870_v22 = vld [vmem:[#allocation21 + $0x28] sm:$0xff] }
  0x66   :  { %2793 = vmatmul.msk.f32.gmra.mxu1 %vm343_vm2, %v335_v7  ;;  %565 = vmatpush.msra.mxu0 %v545_v25  ;;  %v2965_v7 = vld [vmem:[#allocation17] ss:$0 sm:$0xff] }
  0x67   :  { %600 = vmatpush.msrb.mxu1 %v575_v53 }
  0x68   :  { %566 = vmatpush.msra.mxu0 %v544_v28 }
  0x6a   :  { %567 = vmatpush.msra.mxu0 %v543_v31 }
  0xd8   :  { %v328_v33 = vpop.f32.mrf.mxu0 }
  0xd9   :  { %v329_v35 = vadd.f32 %v2963_v32, %v328_v33 }
  0xdb   :  { %v331_v36 = vmax.f32 %v329_v35, 0.0  ;;  %v370_v37 = vpop.f32.mrf.mxu1 }
  0xdc   :  { %v371_v38 = vadd.f32 %v2964_v34, %v370_v37 }
  0xdd   :  { %333 = vst.msk [vmem:[#allocation2] sm:$0xff] %vm332_vm3, %v331_v36 }
  0xde   :  { %v376_v39 = vmax.f32 %v371_v38, 0.0 }
  0xe0   :  { %378 = vst.msk [vmem:[#allocation2 + $0x8] sm:$0xff] %vm332_vm3, %v376_v39 }
  0xe3   :  { %v373_v40 = vpop.f32.mrf.mxu1 }
  0xe4   :  { %v3682_v41 = vld [vmem:[#allocation2] sm:$0xff]  ;;  %v374_v42 = vadd.f32 %v2964_v34, %v373_v40 }
  0xe5   :  { %2794 = vmatmul.msk.f32.vlgmr.msra.gmra.mxu2 %vm332_vm3, %v3682_v41  ;;  %2795 = vmatmul.msk.f32.vlgmr.msra.gmra.mxu3 %vm332_vm3, %v3682_v41 }
  0xe6   :  { %2796 = vmatmul.msk.f32.vlgmr.msrb.gmra.mxu0 %vm332_vm3, %v3682_v41  ;;  %v377_v43 = vmax.f32 %v374_v42, 0.0  ;;  %630 = vmatpush.msra.mxu2 %v611_v46 }
  0xe7   :  { %v468_v44 = vld [vmem:[#allocation2 + $0x8] sm:$0xff] }
  0xe8   :  { %379 = vst.msk [vmem:[#allocation2 + $0x10] sm:$0xff] %vm332_vm3, %v377_v43  ;;  %631 = vmatpush.msra.mxu2 %v610_v47 }
  0xea   :  { %632 = vmatpush.msra.mxu2 %v609_v48 }
  0xec   :  { %633 = vmatpush.msra.mxu2 %v608_v50 }
  0xed   :  { %2797 = vmatmul.msk.f32.vlgmr.msrb.gmra.mxu2 %vm332_vm3, %v468_v44  ;;  %2799 = vmatmul.msk.f32.vlgmr.msrb.gmra.mxu3 %vm332_vm3, %v468_v44 }
  0xee   :  { %2801 = vmatmul.msk.f32.vlgmr.msra.gmra.mxu0 %vm332_vm3, %v468_v44  ;;  %916 = vmatpush.msrb.mxu2 %v900_v54 }
  0xef   :  { %v469_v45 = vld [vmem:[#allocation2 + $0x10] sm:$0xff] }
  0xf0   :  { %917 = vmatpush.msrb.mxu2 %v899_v55 }
  0xf2   :  { %918 = vmatpush.msrb.mxu2 %v898_v56 }
  0xf4   :  { %919 = vmatpush.msrb.mxu2 %v897_v57 }
  0xf5   :  { %2798 = vmatmul.msk.f32.gmra.mxu2 %vm332_vm3, %v469_v45  ;;  %2800 = vmatmul.msk.f32.gmra.mxu3 %vm332_vm3, %v469_v45 }
  0xf6   :  { %2802 = vmatmul.msk.f32.gmra.mxu0 %vm332_vm3, %v469_v45 }
 0x163   :  { %v465_v58 = vpop.f32.mrf.mxu0 }
 0x164   :  { %v466_v10 = vadd.f32 %v2965_v7, %v465_v58  ;;  %v1182_v7 = vld [vmem:[#allocation21 + $0x48] sm:$0xff] }
 0x168   :  { %v409_v60 = vpop.f32.mrf.mxu2  ;;  %v437_v61 = vpop.f32.mrf.mxu3 }
 0x169   :  { %v438_v63 = vadd.f32 %v2967_v59, %v437_v61  ;;  %v410_v26 = vadd.f32 %v2966_v23, %v409_v60  ;;  %v3465_v60 = vmov 0.0  }
 0x16b   :  { %v569_v0 = vpop.f32.mrf.mxu0  ;;  %723 = vrot.lane.b32.xlu1 %v438_v63, %s3464_s23 }
 0x16c   :  { %v3698_v1 = vadd.f32 %v2968_v62, %v569_v0 }
 0x16e   :  { %2805 = vmatmul.msk.f32.vlgmr.msra.gmra.mxu2 %vm332_vm3, %v3698_v1 }
 0x170   :  { %v503_v3 = vpop.f32.mrf.mxu2  ;;  %v3721_v17 = vpop.f32.mrf.mxu3 }
 0x171   :  { %v3702_v4 = vadd.f32 %v2969_v2, %v503_v3  ;;  %v1183_v3 = vld [vmem:[#allocation21 + $0x50] sm:$0xff] }
 0x173   :  { %v572_v5 = vpop.f32.mrf.mxu0  ;;  %2803 = vmatmul.msk.f32.vlgmr.msrb.gmra.mxu1 %vm332_vm3, %v3702_v4 }
 0x174   :  { %v3706_v6 = vadd.f32 %v2968_v62, %v572_v5  ;;  %v2970_v5 = vld [vmem:[#allocation15 + $0x1] ss:$0 sm:$0xff] }
 0x176   :  { %2806 = vmatmul.msk.f32.gmra.mxu2 %vm332_vm3, %v3706_v6 }
 0x178   :  { %v506_v8 = vpop.f32.mrf.mxu2  ;;  %v3725_v25 = vpop.f32.mrf.mxu3 }
 0x179   :  { %v3710_v9 = vadd.f32 %v2969_v2, %v506_v8  ;;  %v1184_v2 = vld [vmem:[#allocation21 + $0x58] sm:$0xff]  ;;  %v1181_v8 = vld [vmem:[#allocation21 + $0x40] sm:$0xff] }
 0x17b   :  { %2804 = vmatmul.msk.f32.gmra.mxu1 %vm332_vm3, %v3710_v9 }
 0x17e   :  { %2819 = vmatmul.msk.f32.vlgmr.msrb.gmra.mxu2 %vm332_vm3, %v466_v10  ;;  %v3748_v10 = vadd.f32 %v2970_v5, %v3721_v17 }
 0x1dd   :  { %v724_v21 = vpop.permute.xlu1 %723 }
 0x1f0   :  { %v602_v11 = vpop.f32.mrf.mxu1 }
 0x1f1   :  { %v635_v12 = vpop.f32.mrf.mxu2 }
 0x1f8   :  { %v605_v13 = vpop.f32.mrf.mxu1 }
 0x1f9   :  { %v638_v14 = vpop.f32.mrf.mxu2  ;;  %727 = vrot.lane.b32.xlu0 %v605_v13, %s3464_s23  ;;  %2807 = vmatpush.xpose.msk.msra.mxu3 %vm642_vm4, %v605_v13  ;;  %v831_v13 = vld [vmem:[#allocation18 + $0x10] sm:$0xff] }
 0x1fa   :  { %v2943_v15 = vpack.i.bf16 %v635_v12, %v638_v14  ;;  %717 = vmatpush.msrb.mxu0 %v638_v14  ;;  %v830_v14 = vld [vmem:[#allocation18 + $0x8] sm:$0xff] }
 0x1fc   :  { %718 = vmatpush.msrb.mxu0 %v635_v12  ;;  %v832_v12 = vld [vmem:[#allocation18 + $0x18] sm:$0xff] }
 0x1fd   :  { %2808 = vmatpush.xpose.msk.msra.mxu3 %vm642_vm4, %v602_v11 }
 0x1fe   :  { %852 = vmatpush.msra.mxu0 %v832_v12 }
 0x200   :  { %2809 = vmatmul.msk.f32.vlgmr.msra.gmra.mxu3 %vm642_vm4, %v438_v63  ;;  %853 = vmatpush.msra.mxu0 %v831_v13  ;;  %v1210_v13 = vld [vmem:[#allocation23 + $0x48] sm:$0xff] }
 0x201   :  { %725 = vrot.lane.b32.xlu0 %v602_v11, %s3464_s23  ;;  %v3753_v11 = vadd.f32 %v2970_v5, %v3725_v25 }
 0x202   :  { %854 = vmatpush.msra.mxu0 %v830_v14 }
 0x26b   :  { %v728_v16 = vpop.permute.xlu0 %727 }
 0x26c   :  { %2812 = vmatpush.xpose.msk.msra.mxu1 %vm642_vm4, %v728_v16 }
 0x273   :  { %v726_v19 = vpop.permute.xlu0 %725 }
 0x274   :  { %2813 = vmatpush.xpose.msk.msra.mxu1 %vm642_vm4, %v726_v19 }
 0x277   :  { %2814 = vmatmul.msk.f32.vlgmr.msra.gmra.mxu1 %vm642_vm4, %v724_v21 }
 0x278   :  { %888 = vmatpush.msrb.mxu1 %v872_v18 }
 0x27a   :  { %889 = vmatpush.msrb.mxu1 %v871_v20 }
 0x27c   :  { %890 = vmatpush.msrb.mxu1 %v870_v22 }
 0x27e   :  { %891 = vmatpush.msrb.mxu1 %v869_v24 }
 0x27f   :  { %2818 = vmatmul.msk.f32.vlgmr.msrb.gmra.mxu1 %vm332_vm3, %v410_v26 }
 0x283   :  { %v669_v28 = vpop.f32.mrf.mxu3 }
 0x284   :  { %v670_v29 = vadd.f32 %v669_v28, %v641_v27  ;;  %v3764_v28 = vpop.f32.mrf.mxu2 }
 0x286   :  { %v672_v30 = vsel %vm642_vm4, %v670_v29, -inf }
 0x287   :  { %673 = vmax.xlane.f32.xlu0 %v672_v30  ;;  %v3771_v30 = vld [vmem:[%s4297_s17] sm:$0xff] }
 0x2f4   :  { %v752_v31 = vpop.f32.mrf.mxu1 }
 0x2f5   :  { %v753_v32 = vadd.f32 %v752_v31, %v641_v27 }
 0x2f7   :  { %v755_v33 = vsel %vm642_vm4, %v753_v32, -inf }
 0x2f8   :  { %756 = vmax.xlane.f32.xlu1 %v755_v33 }
 0x2fa   :  { %v3734_v35 = vpop.xlane.xlu0 %673 }
 0x2fb   :  { %v675_v43 = vsub.f32 %v670_v29, %v3734_v35  ;;  %vm681_vm11 = vcmp.gt.f32.partialorder %v3734_v35, -1e+20 }
 0x2fc   :  { %v893_v34 = vpop.f32.mrf.mxu1 }
 0x2fd   :  { %1048 = vrot.lane.b32.xlu0 %v893_v34, %s3464_s23  ;;  %v676_v44 = vmul.f32 1.442695, %v675_v43 }
 0x36b   :  { %v757_v36 = vpop.xlane.xlu1 %756 }
 0x36c   :  { %v758_v37 = vsub.f32 %v753_v32, %v757_v36  ;;  %vm764_vm6 = vcmp.gt.f32.partialorder %v757_v36, -1e+20 }
 0x36d   :  { %v2815_v61 = vsel %vm764_vm6, 1.0, %v3465_v60 }
 0x36e   :  { %v759_v38 = vmul.f32 1.442695, %v758_v37 }
 0x36f   :  { %v1049_v39 = vpop.permute.xlu0 %1048 }
 0x370   :  { %2982 = vpow2.f32 %v759_v38  ;;  %2827 = vmatpush.xpose.msk.msra.mxu1 %vm642_vm4, %v1049_v39 }
 0x371   :  { %2984 = vpow2.f32 %v676_v44 }
 0x376   :  { %v2983_v40 = vpop.eup %2982 }
 0x377   :  { %v761_v42 = vsel %vm642_vm4, %v2983_v40, 0.0  ;;  %v3740_v45 = vpop.eup %2984 }
 0x378   :  { %762 = vadd.xlane.f32.xlu2 %v761_v42  ;;  %v678_v46 = vsel %vm642_vm4, %v3740_v45, 0.0 }
 0x390   :  { %2944 = vrot.lane.b32.xlu2 %v2943_v15, %s3464_s23  ;;  %v829_v15 = vld [vmem:[#allocation18] sm:$0xff] }
 0x391   :  { %855 = vmatpush.msra.mxu0 %v829_v15 }
 0x3b9   :  { %679 = vadd.xlane.f32.xlu2 %v678_v46 }
 0x3eb   :  { %v763_v47 = vpop.xlane.xlu2 %762 }
 0x3ec   :  { %2986 = vrcp.f32 %v763_v47  ;;  %v778_v53 = vand.u32 2147483648, %v763_v47  ;;  %v776_v56 = vand.u32 2147483647, %v763_v47  ;;  %vm772_vm7 = vweird.f32 %v763_v47 }
 0x3ee   :  { %v779_v58 = vor.u32 1.1754944e-38, %v778_v53  ;;  %vm777_vm9 = vcmp.eq.f32.partialorder %v776_v56, 8.507059e+37 }
 0x3f2   :  { %v2987_v48 = vpop.eup %2986 }
 0x3f3   :  { %v768_v49 = vmul.f32 %v2987_v48, %v763_v47  ;;  %v2945_v50 = vpop.permute.xlu2 %2944  ;;  %vm773_vm5 = vweird.f32 %v2987_v48 }
 0x3f4   :  { %v2946_v51 = vunpack.i.l.bf16 %v2945_v50  ;;  %v2947_v54 = vunpack.i.h.bf16 %v2945_v50  ;;  %vm774_vm8 = vmor %vm772_vm7, %vm773_vm5 }
 0x3f5   :  { %v769_v52 = vsub.f32 1.0, %v768_v49 }
 0x3f6   :  { %808 = vmatpush.msrb.mxu3 %v2946_v51 }
 0x3f7   :  { %v770_v55 = vmul.f32 %v2987_v48, %v769_v52 }
 0x3f8   :  { %809 = vmatpush.msrb.mxu3 %v2947_v54 }
 0x3f9   :  { %v771_v57 = vadd.f32 %v2987_v48, %v770_v55 }
 0x3fa   :  { %2820 = vmatpush.xpose.msk.msra.mxu3 %vm642_vm4, %v893_v34  ;;  %v3778_v34 = vld [vmem:[%s4297_s17 + $0x8] sm:$0xff] }
 0x3fb   :  { %v775_v59 = vsel %vm774_vm8, %v2987_v48, %v771_v57 }
 0x3fc   :  { %v780_v62 = vsel %vm777_vm9, %v779_v58, %v775_v59 }
 0x3fd   :  { %v781_v63 = vmul.f32 %v2815_v61, %v780_v62 }
 0x3ff   :  { %v782_v0 = vmul.f32 %v2983_v40, %v781_v63 }
 0x401   :  { %2816 = vmatmul.msk.f32.vlgmr.msrb.gmra.mxu3 %vm642_vm4, %v782_v0 }
 0x402   :  { %1197 = vmatpush.msrb.mxu3 %v1184_v2 }
 0x404   :  { %1198 = vmatpush.msrb.mxu3 %v1183_v3 }
 0x406   :  { %1199 = vmatpush.msrb.mxu3 %v1182_v7  ;;  %v1212_v7 = vld [vmem:[#allocation23 + $0x58] sm:$0xff] }
 0x408   :  { %1200 = vmatpush.msrb.mxu3 %v1181_v8  ;;  %v1211_v8 = vld [vmem:[#allocation23 + $0x50] sm:$0xff] }
 0x409   :  { %2821 = vmatmul.msk.f32.vlgmr.msra.gmra.mxu3 %vm642_vm4, %v3748_v10 }
 0x411   :  { %2822 = vmatmul.msk.f32.gmra.mxu3 %vm642_vm4, %v3753_v11 }
 0x419   :  { %2834 = vmatmul.msk.f32.vlgmr.msrb.gmra.mxu3 %vm332_vm3, %v3702_v4 }
 0x421   :  { %2835 = vmatmul.msk.f32.gmra.mxu3 %vm332_vm3, %v3710_v9  ;;  %v2810_v9 = vsel %vm681_vm11, 1.0, %v3465_v60 }
 0x42c   :  { %v680_v16 = vpop.xlane.xlu2 %679 }
 0x42d   :  { %2988 = vrcp.f32 %v680_v16  ;;  %v695_v20 = vand.u32 2147483648, %v680_v16  ;;  %v693_v4 = vand.u32 2147483647, %v680_v16  ;;  %vm689_vm12 = vweird.f32 %v680_v16 }
 0x42f   :  { %v696_v23 = vor.u32 1.1754944e-38, %v695_v20  ;;  %vm694_vm14 = vcmp.eq.f32.partialorder %v693_v4, 8.507059e+37 }
 0x433   :  { %v2989_v17 = vpop.eup %2988 }
 0x434   :  { %v685_v18 = vmul.f32 %v2989_v17, %v680_v16  ;;  %vm690_vm10 = vweird.f32 %v2989_v17 }
 0x435   :  { %vm691_vm13 = vmor %vm689_vm12, %vm690_vm10 }
 0x436   :  { %v686_v19 = vsub.f32 1.0, %v685_v18 }
 0x438   :  { %v687_v21 = vmul.f32 %v2989_v17, %v686_v19 }
 0x43a   :  { %v688_v22 = vadd.f32 %v2989_v17, %v687_v21 }
 0x43c   :  { %v692_v24 = vsel %vm691_vm13, %v2989_v17, %v688_v22 }
 0x43d   :  { %v697_v25 = vsel %vm694_vm14, %v696_v23, %v692_v24 }
 0x43e   :  { %v698_v26 = vmul.f32 %v2810_v9, %v697_v25 }
 0x440   :  { %v699_v27 = vmul.f32 %v3740_v45, %v698_v26 }
 0x442   :  { %2811 = vmatmul.msk.f32.vlgmr.msrb.gmra.mxu0 %vm642_vm4, %v699_v27 }
 0x443   :  { %1036 = vmatpush.msrb.mxu0 %v3764_v28 }
 0x484   :  { %v811_v29 = vpop.f32.mrf.mxu3 }
 0x48c   :  { %v952_v31 = vpop.f32.mrf.mxu3 }
 0x48d   :  { %v953_v32 = vadd.f32 %v952_v31, %v3771_v30 }
 0x48f   :  { %v959_v33 = vsel %vm958_vm15, %v953_v32, -inf }
 0x490   :  { %960 = vmax.xlane.f32.xlu1 %v959_v33 }
 0x494   :  { %v955_v35 = vpop.f32.mrf.mxu3 }
 0x495   :  { %v956_v36 = vadd.f32 %v955_v35, %v3778_v34 }
 0x497   :  { %v962_v37 = vsel %vm958_vm15, %v956_v36, -inf }
 0x498   :  { %963 = vmax.xlane.f32.xlu0 %v962_v37 }
 0x49c   :  { %v1202_v38 = vpop.f32.mrf.mxu3 }
 0x49d   :  { %1352 = vrot.lane.b32.xlu2 %v1202_v38, %s3464_s23 }
 0x4a4   :  { %v1205_v39 = vpop.f32.mrf.mxu3 }
 0x4a5   :  { %2838 = vmatpush.xpose.msk.msrb.mxu1 %vm642_vm4, %v1205_v39 }
 0x4a9   :  { %2839 = vmatpush.xpose.msk.msrb.mxu1 %vm642_vm4, %v1202_v38  ;;  %1354 = vrot.lane.b32.xlu1 %v1205_v39, %s3464_s23 }
 0x4ac   :  { %1046 = vrot.lane.b32.xlu0 %v3753_v11, %s3464_s23 }
 0x4b1   :  { %1044 = vrot.lane.b32.xlu1 %v3748_v10, %s3464_s23 }
 0x4b9   :  { %815 = vrot.lane.b32.xlu1 %v811_v29, %s3451_s8 }
 0x4bf   :  { %v720_v54 = vpop.f32.mrf.mxu0 }
 0x4f7   :  { %v1353_v52 = vpop.permute.xlu2 %1352 }
 0x503   :  { %v3791_v40 = vpop.xlane.xlu1 %960 }
 0x504   :  { %v965_v42 = vsub.f32 %v953_v32, %v3791_v40  ;;  %vm977_vm1 = vcmp.gt.f32.partialorder %v3791_v40, -1e+20 }
 0x505   :  { %v2823_v24 = vsel %vm977_vm1, 1.0, %v3465_v60 }
 0x506   :  { %v967_v43 = vmul.f32 1.442695, %v965_v42 }
 0x508   :  { %2990 = vpow2.f32 %v967_v43 }
 0x50b   :  { %v3794_v44 = vpop.xlane.xlu0 %963 }
 0x50c   :  { %v966_v45 = vsub.f32 %v956_v36, %v3794_v44  ;;  %vm978_vm8 = vcmp.gt.f32.partialorder %v3794_v44, -1e+20 }
 0x50d   :  { %v2824_v37 = vsel %vm978_vm8, 1.0, %v3465_v60 }
 0x50e   :  { %v3797_v46 = vpop.eup %2990  ;;  %v969_v47 = vmul.f32 1.442695, %v966_v45  ;;  %v1236_v45 = vld [vmem:[#allocation24] sm:$0xff] }
 0x50f   :  { %v971_v48 = vsel %vm958_vm15, %v3797_v46, 0.0 }
 0x510   :  { %2992 = vpow2.f32 %v969_v47  ;;  %972 = vadd.xlane.f32.xlu0 %v971_v48  ;;  %v1624_v47 = vld [vmem:[#allocation12 + $0x50] sm:$0xff] }
 0x516   :  { %v3801_v49 = vpop.eup %2992 }
 0x517   :  { %v974_v50 = vsel %vm958_vm15, %v3801_v49, 0.0 }
 0x518   :  { %975 = vadd.xlane.f32.xlu2 %v974_v50 }
 0x51b   :  { %v1355_v51 = vpop.permute.xlu1 %1354 }
 0x51c   :  { %2846 = vmatpush.xpose.msk.msra.mxu3 %vm642_vm4, %v1355_v51  ;;  %v1623_v51 = vld [vmem:[#allocation12 + $0x48] sm:$0xff] }
 0x51e   :  { %v1047_v55 = vpop.permute.xlu0 %1046 }
 0x520   :  { %2847 = vmatpush.xpose.msk.msra.mxu3 %vm642_vm4, %v1353_v52 }
 0x523   :  { %v1045_v53 = vpop.permute.xlu1 %1044 }
 0x524   :  { %2828 = vmatmul.msk.f32.vlgmr.msra.gmra.mxu1 %vm642_vm4, %v1045_v53  ;;  %2848 = vmatmul.msk.f32.vlgmr.msra.gmra.mxu3 %vm642_vm4, %v1045_v53 }
 0x52b   :  { %v816_v56 = vpop.permute.xlu1 %815 }
 0x52c   :  { %v818_v57 = vsel %vm642_vm4, %v720_v54, %v816_v56  ;;  %2829 = vmatmul.msk.f32.gmra.mxu1 %vm642_vm4, %v1047_v55  ;;  %2849 = vmatmul.msk.f32.gmra.mxu3 %vm642_vm4, %v1047_v55  ;;  %v1237_v55 = vld [vmem:[#allocation24 + $0x8] sm:$0xff] }
 0x52d   :  { %v821_v58 = vmul.f32 0.044715, %v818_v57  ;;  %v820_v2 = vmul.f32 0.5, %v818_v57 }
 0x52f   :  { %v822_v59 = vmul.f32 %v821_v58, %v818_v57 }
 0x531   :  { %v823_v61 = vmul.f32 %v822_v59, %v818_v57 }
 0x533   :  { %v824_v62 = vadd.f32 %v823_v61, %v818_v57 }
 0x534   :  { %2840 = vmatmul.msk.f32.vlgmr.msrb.gmra.mxu1 %vm642_vm4, %v3748_v10  ;;  %v1209_v10 = vld [vmem:[#allocation23 + $0x40] sm:$0xff] }
 0x535   :  { %v825_v63 = vmul.f32 0.7978846, %v824_v62 }
 0x537   :  { %2994 = vtanh.f32 %v825_v63 }
 0x53c   :  { %2841 = vmatmul.msk.f32.gmra.mxu1 %vm642_vm4, %v3753_v11 }
 0x53d   :  { %v2995_v0 = vpop.eup %2994 }
 0x53e   :  { %v827_v3 = vadd.f32 1.0, %v2995_v0  ;;  %v2971_v0 = vld [vmem:[#allocation20] ss:$0 sm:$0xff] }
 0x540   :  { %v828_v5 = vmul.f32 %v827_v3, %v820_v2  ;;  %v861_v3 = vstv %s860_s18 }
 0x542   :  { %2817 = vmatmul.msk.f32.vlgmr.msra.gmra.mxu0 %vm332_vm3, %v828_v5  ;;  %v864_v5 = vstv %s863_s21 }
 0x543   :  { %1225 = vmatpush.msra.mxu0 %v1212_v7 }
 0x545   :  { %1226 = vmatpush.msra.mxu0 %v1211_v8  ;;  %v865_v8 = vmul.f32 %v864_v5, %v3682_v41 }
 0x547   :  { %1227 = vmatpush.msra.mxu0 %v1210_v13 }
 0x549   :  { %1228 = vmatpush.msra.mxu0 %v1209_v10 }
 0x583   :  { %v973_v12 = vpop.xlane.xlu0 %972 }
 0x584   :  { %2996 = vrcp.f32 %v973_v12  ;;  %v994_v17 = vand.u32 2147483648, %v973_v12  ;;  %v992_v19 = vand.u32 2147483647, %v973_v12  ;;  %vm988_vm2 = vweird.f32 %v973_v12 }
 0x586   :  { %v995_v4 = vor.u32 1.1754944e-38, %v994_v17  ;;  %vm993_vm6 = vcmp.eq.f32.partialorder %v992_v19, 8.507059e+37 }
 0x58a   :  { %v2997_v14 = vpop.eup %2996 }
 0x58b   :  { %v984_v15 = vmul.f32 %v2997_v14, %v973_v12  ;;  %v976_v16 = vpop.xlane.xlu2 %975  ;;  %vm989_vm0 = vweird.f32 %v2997_v14 }
 0x58c   :  { %2998 = vrcp.f32 %v976_v16  ;;  %vm990_vm5 = vmor %vm988_vm2, %vm989_vm0  ;;  %v1009_v27 = vand.u32 2147483648, %v976_v16  ;;  %v1007_v31 = vand.u32 2147483647, %v976_v16  ;;  %vm1003_vm9 = vweird.f32 %v976_v16 }
 0x58d   :  { %v985_v11 = vsub.f32 1.0, %v984_v15 }
 0x58e   :  { %v1010_v35 = vor.u32 1.1754944e-38, %v1009_v27  ;;  %vm1008_vm11 = vcmp.eq.f32.partialorder %v1007_v31, 8.507059e+37 }
 0x58f   :  { %v986_v18 = vmul.f32 %v2997_v14, %v985_v11 }
 0x591   :  { %v987_v20 = vadd.f32 %v2997_v14, %v986_v18 }
 0x592   :  { %v2999_v21 = vpop.eup %2998 }
 0x593   :  { %v991_v22 = vsel %vm990_vm5, %v2997_v14, %v987_v20  ;;  %v999_v23 = vmul.f32 %v2999_v21, %v976_v16  ;;  %vm1004_vm7 = vweird.f32 %v2999_v21 }
 0x594   :  { %v996_v9 = vsel %vm993_vm6, %v995_v4, %v991_v22  ;;  %vm1005_vm10 = vmor %vm1003_vm9, %vm1004_vm7 }
 0x595   :  { %v997_v25 = vmul.f32 %v2823_v24, %v996_v9  ;;  %v1000_v26 = vsub.f32 1.0, %v999_v23 }
 0x597   :  { %v1001_v29 = vmul.f32 %v2999_v21, %v1000_v26  ;;  %v1013_v32 = vmul.f32 %v3797_v46, %v997_v25  ;;  %v1625_v46 = vld [vmem:[#allocation12 + $0x58] sm:$0xff] }
 0x598   :  { %1643 = vmatpush.msrb.mxu3 %v1625_v46 }
 0x599   :  { %v1002_v33 = vadd.f32 %v2999_v21, %v1001_v29  ;;  %2825 = vmatmul.msk.f32.vlgmr.msrb.gmra.mxu0 %vm958_vm15, %v1013_v32 }
 0x59a   :  { %1644 = vmatpush.msrb.mxu3 %v1624_v47 }
 0x59b   :  { %v1006_v36 = vsel %vm1005_vm10, %v2999_v21, %v1002_v33 }
 0x59c   :  { %v1011_v38 = vsel %vm1008_vm11, %v1010_v35, %v1006_v36  ;;  %1645 = vmatpush.msrb.mxu3 %v1623_v51 }
 0x59d   :  { %v1012_v39 = vmul.f32 %v2824_v37, %v1011_v38 }
 0x59f   :  { %v1014_v40 = vmul.f32 %v3801_v49, %v1012_v39 }
 0x5a1   :  { %2826 = vmatmul.msk.f32.gmra.mxu0 %vm958_vm15, %v1014_v40  ;;  %v1073_v42 = vpop.f32.mrf.mxu1 }
 0x5a2   :  { %v1074_v43 = vadd.f32 %v1073_v42, %v3771_v30  ;;  %v1622_v30 = vld [vmem:[#allocation12 + $0x40] sm:$0xff] }
 0x5a3   :  { %1646 = vmatpush.msrb.mxu3 %v1622_v30 }
 0x5a4   :  { %v1079_v44 = vsel %vm958_vm15, %v1074_v43, -inf }
 0x5a5   :  { %1080 = vmax.xlane.f32.xlu1 %v1079_v44 }
 0x5a7   :  { %v1377_v48 = vpop.f32.mrf.mxu3 }
 0x5a8   :  { %v1378_v50 = vadd.f32 %v1377_v48, %v1236_v45 }
 0x5a9   :  { %v1076_v52 = vpop.f32.mrf.mxu1  ;;  %2836 = vmatmul.msk.f32.vlgmr.msra.gmra.mxu0 %vm332_vm3, %v3698_v1 }
 0x5aa   :  { %v1077_v49 = vadd.f32 %v1076_v52, %v3778_v34  ;;  %v1383_v53 = vsel %vm642_vm4, %v1378_v50, -inf }
 0x5ab   :  { %1384 = vmax.xlane.f32.xlu0 %v1383_v53 }
 0x5ac   :  { %v1082_v54 = vsel %vm958_vm15, %v1077_v49, -inf }
 0x5ad   :  { %1083 = vmax.xlane.f32.xlu2 %v1082_v54 }
 0x5af   :  { %v1380_v56 = vpop.f32.mrf.mxu3 }
 0x5b0   :  { %v1381_v57 = vadd.f32 %v1380_v56, %v1237_v55 }
 0x5b1   :  { %2837 = vmatmul.msk.f32.gmra.mxu0 %vm332_vm3, %v3706_v6  ;;  %v1261_v58 = vpop.f32.mrf.mxu1 }
 0x5b2   :  { %v1262_v1 = vadd.f32 %v1261_v58, %v1236_v45  ;;  %v1386_v59 = vsel %vm642_vm4, %v1381_v57, -inf }
 0x5b3   :  { %1387 = vmax.xlane.f32.xlu1 %v1386_v59 }
 0x5b4   :  { %v1267_v34 = vsel %vm642_vm4, %v1262_v1, -inf }
 0x5b5   :  { %1268 = vmax.xlane.f32.xlu0 %v1267_v34 }
 0x5b9   :  { %v1264_v61 = vpop.f32.mrf.mxu1 }
 0x5ba   :  { %v1265_v62 = vadd.f32 %v1264_v61, %v1237_v55 }
 0x5bc   :  { %v1270_v63 = vsel %vm642_vm4, %v1265_v62, -inf }
 0x5bd   :  { %1271 = vmax.xlane.f32.xlu2 %v1270_v63 }
 0x5bf   :  { %v857_v2 = vpop.f32.mrf.mxu0 }
 0x5c0   :  { %v858_v6 = vadd.f32 %v2971_v0, %v857_v2 }
 0x5c2   :  { %v862_v7 = vmul.f32 %v861_v3, %v858_v6 }
 0x5c4   :  { %v866_v12 = vadd.f32 %v865_v8, %v862_v7 }
 0x5c6   :  { %867 = vst.msk [vmem:[#allocation2] sm:$0xff] %vm332_vm3, %v866_v12 }
 0x5cd   :  { %v3839_v13 = vld [vmem:[#allocation2] sm:$0xff] }
 0x5ce   :  { %2859 = vmatmul.msk.f32.vlgmr.msrb.gmra.mxu3 %vm332_vm3, %v3839_v13 }
 0x616   :  { %v3846_v16 = vpop.f32.mrf.mxu0 }
 0x618   :  { %v3843_v10 = vpop.xlane.xlu1 %1080 }
 0x619   :  { %v1085_v14 = vsub.f32 %v1074_v43, %v3843_v10  ;;  %vm1097_vm14 = vcmp.gt.f32.partialorder %v3843_v10, -1e+20 }
 0x61a   :  { %v2830_v5 = vsel %vm1097_vm14, 1.0, %v3465_v60 }
 0x61b   :  { %v1087_v15 = vmul.f32 1.442695, %v1085_v14 }
 0x61d   :  { %3000 = vpow2.f32 %v1087_v15 }
 0x61e   :  { %v3848_v11 = vpop.xlane.xlu0 %1384  ;;  %v3858_v22 = vpop.f32.mrf.mxu0 }
 0x61f   :  { %v1389_v41 = vsub.f32 %v1378_v50, %v3848_v11  ;;  %vm1401_vm2 = vcmp.gt.f32.partialorder %v3848_v11, -1e+20 }
 0x620   :  { %v3851_v17 = vpop.xlane.xlu2 %1083 }
 0x621   :  { %v1391_v18 = vmul.f32 1.442695, %v1389_v41  ;;  %v1086_v19 = vsub.f32 %v1077_v49, %v3851_v17 }
 0x623   :  { %v3854_v20 = vpop.eup %3000  ;;  %3002 = vpow2.f32 %v1391_v18  ;;  %v1089_v21 = vmul.f32 1.442695, %v1086_v19 }
 0x624   :  { %v1091_v4 = vsel %vm958_vm15, %v3854_v20, 0.0 }
 0x625   :  { %3004 = vpow2.f32 %v1089_v21  ;;  %1092 = vadd.xlane.f32.xlu1 %v1091_v4 }
 0x626   :  { %v3860_v23 = vpop.xlane.xlu1 %1387  ;;  %v3874_v35 = vpop.f32.mrf.mxu0 }
 0x627   :  { %v1390_v24 = vsub.f32 %v1381_v57, %v3860_v23 }
 0x628   :  { %v3863_v9 = vpop.xlane.xlu0 %1268 }
 0x629   :  { %v3865_v25 = vpop.eup %3002  ;;  %v1393_v26 = vmul.f32 1.442695, %v1390_v24  ;;  %v1273_v27 = vsub.f32 %v1262_v1, %v3863_v9 }
 0x62a   :  { %v1395_v29 = vsel %vm642_vm4, %v3865_v25, 0.0 }
 0x62b   :  { %v3870_v31 = vpop.eup %3004  ;;  %3006 = vpow2.f32 %v1393_v26  ;;  %1396 = vadd.xlane.f32.xlu0 %v1395_v29  ;;  %v1275_v33 = vmul.f32 1.442695, %v1273_v27  ;;  %v2850_v26 = vsel %vm1401_vm2, 1.0, %v3465_v60  ;;  %v1593_v27 = vld [vmem:[#allocation11 + $0x48] sm:$0xff] }
 0x62c   :  { %v1094_v32 = vsel %vm958_vm15, %v3870_v31, 0.0 }
 0x62d   :  { %1095 = vadd.xlane.f32.xlu2 %v1094_v32  ;;  %3008 = vpow2.f32 %v1275_v33 }
 0x62e   :  { %v3885_v43 = vpop.f32.mrf.mxu0 }
 0x62f   :  { %v2948_v45 = vpack.i.bf16 %v3885_v43, %v3764_v28 }
 0x630   :  { %v3876_v36 = vpop.xlane.xlu2 %1271 }
 0x631   :  { %v3878_v37 = vpop.eup %3006  ;;  %v1274_v38 = vsub.f32 %v1265_v62, %v3876_v36 }
 0x632   :  { %v1398_v39 = vsel %vm642_vm4, %v3878_v37, 0.0 }
 0x633   :  { %1399 = vadd.xlane.f32.xlu1 %v1398_v39  ;;  %v1277_v40 = vmul.f32 1.442695, %v1274_v38  ;;  %v3883_v42 = vpop.eup %3008 }
 0x634   :  { %v1279_v44 = vsel %vm642_vm4, %v3883_v42, 0.0 }
 0x635   :  { %3010 = vpow2.f32 %v1277_v40 }
 0x63b   :  { %1280 = vadd.xlane.f32.xlu1 %v1279_v44  ;;  %v3891_v46 = vpop.eup %3010 }
 0x63c   :  { %v1282_v47 = vsel %vm642_vm4, %v3891_v46, 0.0 }
 0x63f   :  { %2949 = vrot.lane.b32.xlu0 %v2948_v45, %s3464_s23 }
 0x643   :  { %1283 = vadd.xlane.f32.xlu1 %v1282_v47 }
 0x645   :  { %1441 = vrot.lane.b32.xlu2 %v3874_v35, %s3464_s23 }
 0x698   :  { %v1093_v48 = vpop.xlane.xlu1 %1092 }
 0x699   :  { %3012 = vrcp.f32 %v1093_v48  ;;  %v1114_v55 = vand.u32 2147483648, %v1093_v48  ;;  %vm1108_vm13 = vweird.f32 %v1093_v48  ;;  %v1112_v1 = vand.u32 2147483647, %v1093_v48 }
 0x69b   :  { %v1115_v0 = vor.u32 1.1754944e-38, %v1114_v55  ;;  %vm1113_vm5 = vcmp.eq.f32.partialorder %v1112_v1, 8.507059e+37 }
 0x69e   :  { %v1397_v50 = vpop.xlane.xlu0 %1396 }
 0x69f   :  { %v3013_v51 = vpop.eup %3012  ;;  %3014 = vrcp.f32 %v1397_v50  ;;  %v1416_v62 = vand.u32 2147483647, %v1397_v50  ;;  %v1418_v63 = vand.u32 2147483648, %v1397_v50  ;;  %vm1412_vm6 = vweird.f32 %v1397_v50 }
 0x6a0   :  { %v1104_v52 = vmul.f32 %v3013_v51, %v1093_v48  ;;  %v1096_v49 = vpop.xlane.xlu2 %1095  ;;  %vm1109_vm12 = vweird.f32 %v3013_v51 }
 0x6a1   :  { %3016 = vrcp.f32 %v1096_v49  ;;  %vm1110_vm0 = vmor %vm1108_vm13, %vm1109_vm12  ;;  %vm1417_vm8 = vcmp.eq.f32.partialorder %v1416_v62, 8.507059e+37  ;;  %v1419_v10 = vor.u32 1.1754944e-38, %v1418_v63  ;;  %v1129_v14 = vand.u32 2147483648, %v1096_v49 }
 0x6a2   :  { %v1105_v28 = vsub.f32 1.0, %v1104_v52  ;;  %vm1123_vm10 = vweird.f32 %v1096_v49  ;;  %v1127_v24 = vand.u32 2147483647, %v1096_v49  ;;  %vm1098_vm13 = vcmp.gt.f32.partialorder %v3851_v17, -1e+20 }
 0x6a3   :  { %v1130_v33 = vor.u32 1.1754944e-38, %v1129_v14 }
 0x6a4   :  { %v1106_v53 = vmul.f32 %v3013_v51, %v1105_v28  ;;  %vm1128_vm14 = vcmp.eq.f32.partialorder %v1127_v24, 8.507059e+37 }
 0x6a5   :  { %v3015_v30 = vpop.eup %3014 }
 0x6a6   :  { %v1107_v54 = vadd.f32 %v3013_v51, %v1106_v53  ;;  %v1408_v56 = vmul.f32 %v3015_v30, %v1397_v50  ;;  %v3898_v57 = vpop.xlane.xlu1 %1399  ;;  %vm1413_vm1 = vweird.f32 %v3015_v30 }
 0x6a7   :  { %v3017_v58 = vpop.eup %3016  ;;  %3018 = vrcp.f32 %v3898_v57  ;;  %vm1414_vm7 = vmor %vm1412_vm6, %vm1413_vm1  ;;  %v1433_v38 = vand.u32 2147483648, %v3898_v57  ;;  %v1431_v11 = vand.u32 2147483647, %v3898_v57  ;;  %vm1402_vm1 = vcmp.gt.f32.partialorder %v3860_v23, -1e+20 }
 0x6a8   :  { %v1409_v59 = vsub.f32 1.0, %v1408_v56  ;;  %v1119_v34 = vmul.f32 %v3017_v58, %v1096_v49  ;;  %v1111_v61 = vsel %vm1110_vm0, %v3013_v51, %v1107_v54  ;;  %vm1124_vm9 = vweird.f32 %v3017_v58  ;;  %v1442_v28 = vpop.permute.xlu2 %1441  ;;  %v1562_v56 = vld [vmem:[#allocation9 + $0x58] sm:$0xff] }
 0x6a9   :  { %v1116_v6 = vsel %vm1113_vm5, %v1115_v0, %v1111_v61  ;;  %vm3911_vm11 = vmor %vm1123_vm10, %vm1124_vm9  ;;  %vm1427_vm0 = vweird.f32 %v3898_v57  ;;  %v1434_v53 = vor.u32 1.1754944e-38, %v1433_v38  ;;  %vm1432_vm5 = vcmp.eq.f32.partialorder %v1431_v11, 8.507059e+37  ;;  %v1560_v0 = vld [vmem:[#allocation9 + $0x48] sm:$0xff] }
 0x6aa   :  { %v1410_v2 = vmul.f32 %v3015_v30, %v1409_v59  ;;  %v1120_v3 = vsub.f32 1.0, %v1119_v34  ;;  %v1117_v21 = vmul.f32 %v2830_v5, %v1116_v6  ;;  %v1559_v5 = vld [vmem:[#allocation9 + $0x40] sm:$0xff] }
 0x6ac   :  { %v1411_v7 = vadd.f32 %v3015_v30, %v1410_v2  ;;  %v1121_v8 = vmul.f32 %v3017_v58, %v1120_v3  ;;  %v1133_v48 = vmul.f32 %v3854_v20, %v1117_v21  ;;  %v2831_v20 = vsel %vm1098_vm13, 1.0, %v3465_v60  ;;  %v1594_v21 = vld [vmem:[#allocation11 + $0x50] sm:$0xff] }
 0x6ad   :  { %v3019_v12 = vpop.eup %3018 }
 0x6ae   :  { %v1415_v15 = vsel %vm1414_vm7, %v3015_v30, %v1411_v7  ;;  %v1122_v41 = vadd.f32 %v3017_v58, %v1121_v8  ;;  %v1423_v18 = vmul.f32 %v3019_v12, %v3898_v57  ;;  %v3905_v19 = vpop.xlane.xlu1 %1280  ;;  %vm1428_vm12 = vweird.f32 %v3019_v12 }
 0x6af   :  { %v1420_v4 = vsel %vm1417_vm8, %v1419_v10, %v1415_v15  ;;  %3020 = vrcp.f32 %v3905_v19  ;;  %vm3923_vm2 = vmor %vm1427_vm0, %vm1428_vm12  ;;  %v1302_v59 = vand.u32 2147483648, %v3905_v19  ;;  %v1300_v62 = vand.u32 2147483647, %v3905_v19 }
 0x6b0   :  { %v1424_v29 = vsub.f32 1.0, %v1423_v18  ;;  %v1421_v32 = vmul.f32 %v2850_v26, %v1420_v4  ;;  %v1126_v40 = vsel %vm3911_vm11, %v3017_v58, %v1122_v41  ;;  %vm1285_vm7 = vcmp.gt.f32.partialorder %v3863_v9, -1e+20 }
 0x6b1   :  { %v2950_v39 = vpop.permute.xlu0 %2949  ;;  %v1131_v51 = vsel %vm1128_vm14, %v1130_v33, %v1126_v40  ;;  %vm1296_vm8 = vweird.f32 %v3905_v19  ;;  %v1303_v2 = vor.u32 1.1754944e-38, %v1302_v59  ;;  %vm1301_vm10 = vcmp.eq.f32.partialorder %v1300_v62, 8.507059e+37  ;;  %v1509_v40 = vld [vmem:[#allocation18 + $0x30] sm:$0xff] }
 0x6b2   :  { %v1425_v44 = vmul.f32 %v3019_v12, %v1424_v29  ;;  %v2952_v45 = vunpack.i.h.bf16 %v2950_v39  ;;  %v2951_v47 = vunpack.i.l.bf16 %v2950_v39  ;;  %v1437_v17 = vmul.f32 %v3865_v25, %v1421_v32 }
 0x6b3   :  { %v1132_v57 = vmul.f32 %v2831_v20, %v1131_v51  ;;  %v2851_v25 = vsel %vm1402_vm1, 1.0, %v3465_v60  ;;  %vm1286_vm12 = vcmp.gt.f32.partialorder %v3876_v36, -1e+20 }
 0x6b4   :  { %v1426_v50 = vadd.f32 %v3019_v12, %v1425_v44  ;;  %1160 = vmatpush.msra.mxu2 %v2951_v47  ;;  %1467 = vmatpush.msrb.mxu0 %v2952_v45  ;;  %v2843_v24 = vsel %vm1286_vm12, 1.0, %v3465_v60  ;;  %v1508_v44 = vld [vmem:[#allocation18 + $0x28] sm:$0xff]  ;;  %v1507_v45 = vld [vmem:[#allocation18 + $0x20] sm:$0xff] }
 0x6b5   :  { %v3021_v52 = vpop.eup %3020  ;;  %2832 = vmatmul.msk.f32.vlgmr.msra.gmra.mxu2 %vm958_vm15, %v1133_v48  ;;  %v1134_v63 = vmul.f32 %v3870_v31, %v1132_v57  ;;  %v2842_v31 = vsel %vm1285_vm7, 1.0, %v3465_v60 }
 0x6b6   :  { %v1292_v30 = vmul.f32 %v3021_v52, %v3905_v19  ;;  %1343 = vmatpush.msrb.mxu2 %v3885_v43  ;;  %1468 = vmatpush.msrb.mxu0 %v1442_v28  ;;  %v1284_v54 = vpop.xlane.xlu1 %1283  ;;  %v1430_v55 = vsel %vm3923_vm2, %v3019_v12, %v1426_v50  ;;  %v1561_v43 = vld [vmem:[#allocation9 + $0x50] sm:$0xff]  ;;  %vm1297_vm6 = vweird.f32 %v3021_v52 }
 0x6b7   :  { %3022 = vrcp.f32 %v1284_v54  ;;  %2852 = vmatmul.msk.f32.vlgmr.msrb.gmra.mxu0 %vm642_vm4, %v1437_v17  ;;  %v1435_v1 = vsel %vm1432_vm5, %v1434_v53, %v1430_v55  ;;  %vm1298_vm9 = vmor %vm1296_vm8, %vm1297_vm6  ;;  %v1317_v10 = vand.u32 2147483648, %v1284_v54  ;;  %v1315_v15 = vand.u32 2147483647, %v1284_v54 }
 0x6b8   :  { %v1293_v58 = vsub.f32 1.0, %v1292_v30  ;;  %1344 = vmatpush.msrb.mxu2 %v3874_v35  ;;  %v1436_v34 = vmul.f32 %v2851_v25, %v1435_v1  ;;  %vm1311_vm13 = vweird.f32 %v1284_v54 }
 0x6b9   :  { %v1318_v19 = vor.u32 1.1754944e-38, %v1317_v10  ;;  %vm1316_vm0 = vcmp.eq.f32.partialorder %v1315_v15, 8.507059e+37  ;;  %v1693_v10 = vld [vmem:[#allocation11 + $0x60] sm:$0xff]  ;;  %v1762_v15 = vld [vmem:[#allocation21 + $0x78] sm:$0xff] }
 0x6ba   :  { %1583 = vmatpush.msra.mxu2 %v1562_v56  ;;  %v1294_v61 = vmul.f32 %v3021_v52, %v1293_v58  ;;  %v1438_v3 = vmul.f32 %v3878_v37, %v1436_v34  ;;  %v1595_v37 = vld [vmem:[#allocation11 + $0x58] sm:$0xff]  ;;  %1781 = vmatpush.msra.mxu3 %v1762_v15 }
 0x6bc   :  { %1584 = vmatpush.msra.mxu2 %v1561_v43  ;;  %v1295_v23 = vadd.f32 %v3021_v52, %v1294_v61 }
 0x6bd   :  { %v3023_v35 = vpop.eup %3022  ;;  %2833 = vmatmul.msk.f32.gmra.mxu2 %vm958_vm15, %v1134_v63 }
 0x6be   :  { %v1299_v6 = vsel %vm1298_vm9, %v3021_v52, %v1295_v23  ;;  %v1307_v7 = vmul.f32 %v3023_v35, %v1284_v54  ;;  %1585 = vmatpush.msra.mxu2 %v1560_v0  ;;  %vm1312_vm11 = vweird.f32 %v3023_v35 }
 0x6bf   :  { %v1304_v8 = vsel %vm1301_vm10, %v1303_v2, %v1299_v6  ;;  %2853 = vmatmul.msk.f32.gmra.mxu0 %vm642_vm4, %v1438_v3  ;;  %vm1313_vm14 = vmor %vm1311_vm13, %vm1312_vm11  ;;  %v1696_v2 = vld [vmem:[#allocation11 + $0x78] sm:$0xff]  ;;  %v1695_v6 = vld [vmem:[#allocation11 + $0x70] sm:$0xff] }
 0x6c0   :  { %v1305_v9 = vmul.f32 %v2842_v31, %v1304_v8  ;;  %v1308_v12 = vsub.f32 1.0, %v1307_v7  ;;  %1586 = vmatpush.msra.mxu2 %v1559_v5  ;;  %v1729_v3 = vld [vmem:[#allocation12 + $0x78] sm:$0xff]  ;;  %v1656_v5 = vld [vmem:[#allocation9 + $0x70] sm:$0xff]  ;;  %v1655_v31 = vld [vmem:[#allocation9 + $0x68] sm:$0xff] }
 0x6c1   :  { %v1728_v7 = vld [vmem:[#allocation12 + $0x70] sm:$0xff]  ;;  %v1694_v8 = vld [vmem:[#allocation11 + $0x68] sm:$0xff] }
 0x6c2   :  { %v1309_v14 = vmul.f32 %v3023_v35, %v1308_v12  ;;  %v1321_v41 = vmul.f32 %v3883_v42, %v1305_v9  ;;  %v1592_v42 = vld [vmem:[#allocation11 + $0x40] sm:$0xff]  ;;  %v1727_v9 = vld [vmem:[#allocation12 + $0x68] sm:$0xff] }
 0x6c3   :  { %v1654_v12 = vld [vmem:[#allocation9 + $0x60] sm:$0xff] }
 0x6c4   :  { %v1310_v18 = vadd.f32 %v3023_v35, %v1309_v14  ;;  %v1726_v14 = vld [vmem:[#allocation12 + $0x60] sm:$0xff] }
 0x6c5   :  { %2844 = vmatmul.msk.f32.vlgmr.msrb.gmra.mxu2 %vm642_vm4, %v1321_v41  ;;  %v1761_v41 = vld [vmem:[#allocation21 + $0x70] sm:$0xff] }
 0x6c6   :  { %v1314_v4 = vsel %vm1313_vm14, %v3023_v35, %v1310_v18  ;;  %1613 = vmatpush.msrb.mxu2 %v1595_v37  ;;  %v1657_v35 = vld [vmem:[#allocation9 + $0x78] sm:$0xff]  ;;  %1782 = vmatpush.msra.mxu3 %v1761_v41  ;;  %v2975_v37 = vld [vmem:[#allocation20 + $0x1] ss:$0 sm:$0xff] }
 0x6c7   :  { %v1319_v26 = vsel %vm1316_vm0, %v1318_v19, %v1314_v4  ;;  %1681 = vmatpush.msra.mxu0 %v1657_v35  ;;  %v1546_v19 = vstv %s2856_s26 }
 0x6c8   :  { %v1320_v29 = vmul.f32 %v2843_v24, %v1319_v26  ;;  %1614 = vmatpush.msrb.mxu2 %v1594_v21  ;;  %v1550_v21 = vstv %s1549_s2  ;;  %v3074_v26 = vld [vmem:[#allocation2 + $0x8] sm:$0xff] }
 0x6c9   :  { %1682 = vmatpush.msra.mxu0 %v1656_v5 }
 0x6ca   :  { %v1322_v32 = vmul.f32 %v3891_v46, %v1320_v29  ;;  %1615 = vmatpush.msrb.mxu2 %v1593_v27  ;;  %v1510_v46 = vld [vmem:[#allocation18 + $0x38] sm:$0xff]  ;;  %v1551_v27 = vmul.f32 %v3074_v26, %v1550_v21 }
 0x6cb   :  { %1534 = vmatpush.msra.mxu1 %v1510_v46  ;;  %1683 = vmatpush.msra.mxu0 %v1655_v31  ;;  %v2057_v31 = vld [vmem:[#allocation21 + $0x90] sm:$0xff] }
 0x6cc   :  { %1616 = vmatpush.msrb.mxu2 %v1592_v42 }
 0x6cd   :  { %2845 = vmatmul.msk.f32.gmra.mxu2 %vm642_vm4, %v1322_v32  ;;  %1535 = vmatpush.msra.mxu1 %v1509_v40 }
 0x6ce   :  { %1684 = vmatpush.msra.mxu0 %v1654_v12  ;;  %v2973_v12 = vld [vmem:[#allocation14 + $0x2] ss:$0 sm:$0xff] }
 0x6cf   :  { %1536 = vmatpush.msra.mxu1 %v1508_v44  ;;  %v1760_v44 = vld [vmem:[#allocation21 + $0x68] sm:$0xff] }
 0x6d0   :  { %1783 = vmatpush.msra.mxu3 %v1760_v44 }
 0x6d1   :  { %1537 = vmatpush.msra.mxu1 %v1507_v45  ;;  %v1759_v45 = vld [vmem:[#allocation21 + $0x60] sm:$0xff] }
 0x6d2   :  { %1784 = vmatpush.msra.mxu3 %v1759_v45  ;;  %v2016_v45 = vld [vmem:[#allocation18 + $0x50] sm:$0xff] }
 0x6d3   :  { %1714 = vmatpush.msrb.mxu1 %v1696_v2 }
 0x6d5   :  { %2857 = vmatmul.msk.f32.vlgmr.msra.gmra.mxu2 %vm332_vm3, %v3839_v13  ;;  %1715 = vmatpush.msrb.mxu1 %v1695_v6 }
 0x6d6   :  { %1747 = vmatpush.msra.mxu2 %v1729_v3  ;;  %v2058_v3 = vld [vmem:[#allocation21 + $0x98] sm:$0xff] }
 0x6d7   :  { %1716 = vmatpush.msrb.mxu1 %v1694_v8 }
 0x6d8   :  { %1748 = vmatpush.msra.mxu2 %v1728_v7 }
 0x6d9   :  { %1717 = vmatpush.msrb.mxu1 %v1693_v10  ;;  %v2055_v10 = vld [vmem:[#allocation21 + $0x80] sm:$0xff] }
 0x6da   :  { %1749 = vmatpush.msra.mxu2 %v1727_v9  ;;  %v2056_v9 = vld [vmem:[#allocation21 + $0x88] sm:$0xff] }
 0x6dc   :  { %1750 = vmatpush.msra.mxu2 %v1726_v14 }
 0x6dd   :  { %2858 = vmatmul.msk.f32.vlgmr.msrb.gmra.mxu2 %vm332_vm3, %v3839_v13 }
 0x734   :  { %v1470_v36 = vpop.f32.mrf.mxu0 }
 0x735   :  { %1478 = vrot.lane.b32.xlu1 %v1470_v36, %s3451_s8 }
 0x738   :  { %v1162_v33 = vpop.f32.mrf.mxu2 }
 0x739   :  { %1170 = vrot.lane.b32.xlu0 %v1162_v33, %s3451_s8  ;;  %v3075_v33 = vld [vmem:[#allocation2 + $0x10] sm:$0xff] }
 0x73c   :  { %v1473_v38 = vpop.f32.mrf.mxu0 }
 0x740   :  { %v1165_v39 = vpop.f32.mrf.mxu2 }
 0x741   :  { %1172 = vrot.lane.b32.xlu2 %v1165_v39, %s3451_s8  ;;  %1480 = vrot.lane.b32.xlu0 %v1473_v38, %s3451_s8  ;;  %v1552_v38 = vmul.f32 %v3075_v33, %v1550_v21 }
 0x748   :  { %v1346_v13 = vpop.f32.mrf.mxu2 }
 0x750   :  { %v1349_v17 = vpop.f32.mrf.mxu2 }
 0x79b   :  { %v1173_v49 = vpop.permute.xlu2 %1172 }
 0x79c   :  { %v1177_v30 = vsel %vm642_vm4, %v3858_v22, %v1173_v49  ;;  %v1588_v49 = vpop.f32.mrf.mxu2 }
 0x79d   :  { %v1589_v15 = vadd.f32 %v2973_v12, %v1588_v49  ;;  %v2977_v12 = vld [vmem:[#allocation15 + $0x3] ss:$0 sm:$0xff] }
 0x7a7   :  { %v1479_v47 = vpop.permute.xlu1 %1478 }
 0x7a8   :  { %v1484_v48 = vsel %vm642_vm4, %v1346_v13, %v1479_v47  ;;  %v1796_v13 = vld [vmem:[#allocation23 + $0x78] sm:$0xff]  ;;  %v1795_v47 = vld [vmem:[#allocation23 + $0x70] sm:$0xff] }
 0x7a9   :  { %1815 = vmatpush.msrb.mxu0 %v1796_v13  ;;  %v2015_v13 = vld [vmem:[#allocation18 + $0x48] sm:$0xff] }
 0x7ab   :  { %v1171_v11 = vpop.permute.xlu0 %1170  ;;  %1816 = vmatpush.msrb.mxu0 %v1795_v47  ;;  %v2014_v47 = vld [vmem:[#allocation18 + $0x40] sm:$0xff] }
 0x7ac   :  { %v1176_v50 = vsel %vm642_vm4, %v3846_v16, %v1171_v11  ;;  %v1794_v11 = vld [vmem:[#allocation23 + $0x68] sm:$0xff] }
 0x7ad   :  { %v1486_v51 = vadd.f32 %v1484_v48, %v1176_v50  ;;  %1817 = vmatpush.msrb.mxu0 %v1794_v11  ;;  %v1793_v48 = vld [vmem:[#allocation23 + $0x60] sm:$0xff]  ;;  %v2086_v50 = vld [vmem:[#allocation23 + $0x98] sm:$0xff] }
 0x7af   :  { %v1490_v52 = vmul.f32 0.044715, %v1486_v51  ;;  %v1488_v34 = vmul.f32 0.5, %v1486_v51  ;;  %1818 = vmatpush.msrb.mxu0 %v1793_v48 }
 0x7b1   :  { %v1492_v28 = vmul.f32 %v1490_v52, %v1486_v51  ;;  %v2084_v52 = vld [vmem:[#allocation23 + $0x88] sm:$0xff] }
 0x7b3   :  { %v1494_v20 = vmul.f32 %v1492_v28, %v1486_v51  ;;  %v1481_v53 = vpop.permute.xlu0 %1480  ;;  %v2083_v28 = vld [vmem:[#allocation23 + $0x80] sm:$0xff] }
 0x7b4   :  { %v1485_v54 = vsel %vm642_vm4, %v1349_v17, %v1481_v53  ;;  %v2976_v17 = vld [vmem:[#allocation14 + $0x3] ss:$0 sm:$0xff] }
 0x7b5   :  { %v1496_v55 = vadd.f32 %v1494_v20, %v1486_v51  ;;  %v1487_v56 = vadd.f32 %v1485_v54, %v1177_v30  ;;  %v2085_v51 = vld [vmem:[#allocation23 + $0x90] sm:$0xff]  ;;  %v1618_v20 = vpop.f32.mrf.mxu2  ;;  %v2978_v54 = vld [vmem:[#allocation17 + $0x3] ss:$0 sm:$0xff] }
 0x7b7   :  { %v1498_v57 = vmul.f32 0.7978846, %v1496_v55  ;;  %v1491_v25 = vmul.f32 0.044715, %v1487_v56  ;;  %v1489_v22 = vmul.f32 0.5, %v1487_v56 }
 0x7b9   :  { %3024 = vtanh.f32 %v1498_v57  ;;  %v1493_v58 = vmul.f32 %v1491_v25, %v1487_v56 }
 0x7bb   :  { %v1495_v1 = vmul.f32 %v1493_v58, %v1487_v56 }
 0x7bd   :  { %v1497_v16 = vadd.f32 %v1495_v1, %v1487_v56 }
 0x7bf   :  { %v3025_v43 = vpop.eup %3024  ;;  %v1499_v59 = vmul.f32 0.7978846, %v1497_v16  ;;  %v2972_v16 = vld [vmem:[#allocation17 + $0x2] ss:$0 sm:$0xff] }
 0x7c0   :  { %v1502_v61 = vadd.f32 1.0, %v3025_v43  ;;  %v1648_v43 = vpop.f32.mrf.mxu3 }
 0x7c1   :  { %3026 = vtanh.f32 %v1499_v59  ;;  %v1649_v59 = vadd.f32 %v2972_v16, %v1648_v43 }
 0x7c2   :  { %v1504_v62 = vmul.f32 %v1502_v61, %v1488_v34 }
 0x7c4   :  { %2854 = vmatmul.msk.f32.vlgmr.msra.gmra.mxu1 %vm332_vm3, %v1504_v62 }
 0x7c7   :  { %v3027_v63 = vpop.eup %3026 }
 0x7c8   :  { %v1503_v0 = vadd.f32 1.0, %v3027_v63 }
 0x7ca   :  { %v1505_v23 = vmul.f32 %v1503_v0, %v1489_v22  ;;  %v2974_v22 = vld [vmem:[#allocation15 + $0x2] ss:$0 sm:$0xff] }
 0x7cb   :  { %v1619_v0 = vadd.f32 %v2974_v22, %v1618_v20 }
 0x7cc   :  { %2855 = vmatmul.msk.f32.gmra.mxu1 %vm332_vm3, %v1505_v23 }
 0x841   :  { %v1539_v18 = vpop.f32.mrf.mxu1 }
 0x842   :  { %v1540_v4 = vadd.f32 %v2975_v37, %v1539_v18 }
 0x844   :  { %v1547_v24 = vmul.f32 %v1546_v19, %v1540_v4 }
 0x846   :  { %v1553_v29 = vadd.f32 %v1551_v27, %v1547_v24 }
 0x848   :  { %1555 = vst.msk [vmem:[#allocation2 + $0x8] sm:$0xff] %vm332_vm3, %v1553_v29 }
 0x849   :  { %v1542_v42 = vpop.f32.mrf.mxu1 }
 0x84a   :  { %v1543_v32 = vadd.f32 %v2975_v37, %v1542_v42  ;;  %v1826_v37 = vld [vmem:[%s4296_s16] sm:$0xff] }
 0x84c   :  { %v1548_v36 = vmul.f32 %v1546_v19, %v1543_v32 }
 0x84e   :  { %v1554_v39 = vadd.f32 %v1552_v38, %v1548_v36 }
 0x84f   :  { %v1651_v46 = vld [vmem:[#allocation2 + $0x8] sm:$0xff] }
 0x850   :  { %1556 = vst.msk [vmem:[#allocation2 + $0x10] sm:$0xff] %vm332_vm3, %v1554_v39  ;;  %2860 = vmatmul.msk.f32.vlgmr.msra.gmra.mxu0 %vm332_vm3, %v1651_v46  ;;  %2862 = vmatmul.msk.f32.vlgmr.msrb.gmra.mxu1 %vm332_vm3, %v1651_v46 }
 0x851   :  { %2864 = vmatmul.msk.f32.vlgmr.msra.gmra.mxu2 %vm332_vm3, %v1651_v46  ;;  %2102 = vmatpush.msra.mxu0 %v2086_v50 }
 0x853   :  { %2103 = vmatpush.msra.mxu0 %v2085_v51 }
 0x855   :  { %2104 = vmatpush.msra.mxu0 %v2084_v52 }
 0x857   :  { %v1652_v40 = vld [vmem:[#allocation2 + $0x10] sm:$0xff]  ;;  %2105 = vmatpush.msra.mxu0 %v2083_v28 }
 0x858   :  { %2861 = vmatmul.msk.f32.gmra.mxu0 %vm332_vm3, %v1652_v40  ;;  %2863 = vmatmul.msk.f32.gmra.mxu1 %vm332_vm3, %v1652_v40 }
 0x859   :  { %2865 = vmatmul.msk.f32.gmra.mxu2 %vm332_vm3, %v1652_v40  ;;  %v2017_v40 = vld [vmem:[#allocation18 + $0x58] sm:$0xff] }
 0x8cd   :  { %v1686_v53 = vpop.f32.mrf.mxu0  ;;  %v4005_v14 = vpop.f32.mrf.mxu1 }
 0x8ce   :  { %v3978_v30 = vadd.f32 %v2976_v17, %v1686_v53 }
 0x8d0   :  { %2866 = vmatmul.msk.f32.vlgmr.msra.gmra.mxu3 %vm332_vm3, %v3978_v30 }
 0x8d4   :  { %v1752_v55 = vpop.f32.mrf.mxu2 }
 0x8d5   :  { %v3982_v56 = vadd.f32 %v2978_v54, %v1752_v55  ;;  %v1689_v57 = vpop.f32.mrf.mxu0  ;;  %v4008_v41 = vpop.f32.mrf.mxu1 }
 0x8d6   :  { %v3984_v25 = vadd.f32 %v2976_v17, %v1689_v57 }
 0x8d7   :  { %2868 = vmatmul.msk.f32.vlgmr.msrb.gmra.mxu0 %vm332_vm3, %v3982_v56 }
 0x8d8   :  { %2867 = vmatmul.msk.f32.gmra.mxu3 %vm332_vm3, %v3984_v25 }
 0x8dc   :  { %v1755_v58 = vpop.f32.mrf.mxu2 }
 0x8dd   :  { %v3990_v1 = vadd.f32 %v2978_v54, %v1755_v58 }
 0x8df   :  { %2869 = vmatmul.msk.f32.gmra.mxu0 %vm332_vm3, %v3990_v1 }
 0x8e7   :  { %2883 = vmatmul.msk.f32.vlgmr.msra.gmra.mxu0 %vm332_vm3, %v1649_v59 }
 0x953   :  { %v1786_v34 = vpop.f32.mrf.mxu3 }
 0x954   :  { %v1820_v61 = vpop.f32.mrf.mxu0  ;;  %1909 = vrot.lane.b32.xlu0 %v1786_v34, %s3464_s23 }
 0x95b   :  { %v1789_v62 = vpop.f32.mrf.mxu3 }
 0x95c   :  { %v1823_v63 = vpop.f32.mrf.mxu0  ;;  %1911 = vrot.lane.b32.xlu2 %v1789_v62, %s3464_s23  ;;  %2870 = vmatpush.xpose.msk.msra.mxu1 %vm642_vm4, %v1789_v62 }
 0x95d   :  { %1901 = vmatpush.msrb.mxu2 %v1823_v63  ;;  %v2953_v23 = vpack.i.bf16 %v1820_v61, %v1823_v63 }
 0x95f   :  { %1902 = vmatpush.msrb.mxu2 %v1820_v61 }
 0x960   :  { %2871 = vmatpush.xpose.msk.msra.mxu1 %vm642_vm4, %v1786_v34 }
 0x961   :  { %2038 = vmatpush.msra.mxu2 %v2017_v40 }
 0x963   :  { %2872 = vmatmul.msk.f32.vlgmr.msra.gmra.mxu1 %vm642_vm4, %v1619_v0  ;;  %2039 = vmatpush.msra.mxu2 %v2016_v45 }
 0x964   :  { %1907 = vrot.lane.b32.xlu2 %v1619_v0, %s3464_s23  ;;  %v4021_v59 = vpop.f32.mrf.mxu0 }
 0x965   :  { %2040 = vmatpush.msra.mxu2 %v2015_v13 }
 0x967   :  { %2041 = vmatpush.msra.mxu2 %v2014_v47 }
 0x96c   :  { %2954 = vrot.lane.b32.xlu2 %v2953_v23, %s3464_s23 }
 0x9b6   :  { %v1912_v35 = vpop.permute.xlu2 %1911 }
 0x9b7   :  { %2875 = vmatpush.xpose.msk.msrb.mxu3 %vm642_vm4, %v1912_v35 }
 0x9be   :  { %v1908_v2 = vpop.permute.xlu2 %1907 }
 0x9c6   :  { %v1910_v5 = vpop.permute.xlu0 %1909  ;;  %v2955_v6 = vpop.permute.xlu2 %2954 }
 0x9c7   :  { %v2956_v7 = vunpack.i.l.bf16 %v2955_v6  ;;  %2876 = vmatpush.xpose.msk.msrb.mxu3 %vm642_vm4, %v1910_v5  ;;  %v2957_v8 = vunpack.i.h.bf16 %v2955_v6 }
 0x9c9   :  { %1992 = vmatpush.msrb.mxu1 %v2956_v7 }
 0x9ca   :  { %2877 = vmatmul.msk.f32.vlgmr.msrb.gmra.mxu3 %vm642_vm4, %v1908_v2 }
 0x9cb   :  { %2074 = vmatpush.msra.mxu3 %v2058_v3  ;;  %1993 = vmatpush.msrb.mxu1 %v2957_v8  ;;  %v2369_v8 = vld [vmem:[#allocation21 + $0xb8] sm:$0xff] }
 0x9cd   :  { %2075 = vmatpush.msra.mxu3 %v2057_v31 }
 0x9cf   :  { %2076 = vmatpush.msra.mxu3 %v2056_v9  ;;  %v2368_v9 = vld [vmem:[#allocation21 + $0xb0] sm:$0xff] }
 0x9d1   :  { %2077 = vmatpush.msra.mxu3 %v2055_v10  ;;  %v2367_v10 = vld [vmem:[#allocation21 + $0xa8] sm:$0xff] }
 0x9d2   :  { %2882 = vmatmul.msk.f32.vlgmr.msra.gmra.mxu3 %vm332_vm3, %v1589_v15  ;;  %v2366_v15 = vld [vmem:[#allocation21 + $0xa0] sm:$0xff] }
 0x9e0   :  { %v1853_v18 = vpop.f32.mrf.mxu1 }
 0x9e1   :  { %v1854_v19 = vadd.f32 %v1853_v18, %v1826_v37  ;;  %v4033_v18 = vadd.f32 %v2977_v12, %v4008_v41 }
 0x9e3   :  { %v1856_v21 = vsel %vm642_vm4, %v1854_v19, -inf }
 0x9e4   :  { %1857 = vmax.xlane.f32.xlu2 %v1856_v21 }
 0xa4d   :  { %v1936_v4 = vpop.f32.mrf.mxu3 }
 0xa4e   :  { %v1937_v24 = vadd.f32 %v1936_v4, %v1826_v37  ;;  %v4028_v37 = vadd.f32 %v2977_v12, %v4005_v14  ;;  %v4045_v14 = vld [vmem:[%s4297_s17] sm:$0xff] }
 0xa50   :  { %v1939_v26 = vsel %vm642_vm4, %v1937_v24, -inf }
 0xa51   :  { %1940 = vmax.xlane.f32.xlu0 %v1939_v26 }
 0xa55   :  { %v2079_v27 = vpop.f32.mrf.mxu3 }
 0xa56   :  { %2884 = vmatpush.xpose.msk.msra.mxu1 %vm642_vm4, %v2079_v27  ;;  %2233 = vrot.lane.b32.xlu2 %v2079_v27, %s3464_s23 }
 0xa57   :  { %v1858_v29 = vpop.xlane.xlu2 %1857 }
 0xa58   :  { %v1859_v42 = vsub.f32 %v1854_v19, %v1858_v29  ;;  %vm1865_vm2 = vcmp.gt.f32.partialorder %v1858_v29, -1e+20 }
 0xa59   :  { %v2873_v57 = vsel %vm1865_vm2, 1.0, %v3465_v60 }
 0xa5a   :  { %v1860_v32 = vmul.f32 1.442695, %v1859_v42 }
 0xa5c   :  { %3028 = vpow2.f32 %v1860_v32 }
 0xa62   :  { %v3029_v36 = vpop.eup %3028 }
 0xa63   :  { %v1862_v33 = vsel %vm642_vm4, %v3029_v36, 0.0 }
 0xa64   :  { %1863 = vadd.xlane.f32.xlu0 %v1862_v33 }
 0xab0   :  { %v2234_v38 = vpop.permute.xlu2 %2233 }
 0xab1   :  { %2891 = vmatpush.xpose.msk.msrb.mxu3 %vm642_vm4, %v2234_v38 }
 0xac4   :  { %v1941_v39 = vpop.xlane.xlu0 %1940 }
 0xac5   :  { %v1942_v46 = vsub.f32 %v1937_v24, %v1941_v39  ;;  %vm1948_vm9 = vcmp.gt.f32.partialorder %v1941_v39, -1e+20 }
 0xac6   :  { %v2878_v5 = vsel %vm1948_vm9, 1.0, %v3465_v60 }
 0xac7   :  { %v1943_v44 = vmul.f32 1.442695, %v1942_v46 }
 0xac9   :  { %3030 = vpow2.f32 %v1943_v44 }
 0xacf   :  { %v3031_v11 = vpop.eup %3030 }
 0xad0   :  { %v1945_v48 = vsel %vm642_vm4, %v3031_v11, 0.0 }
 0xad1   :  { %1946 = vadd.xlane.f32.xlu1 %v1945_v48 }
 0xad7   :  { %v1864_v50 = vpop.xlane.xlu0 %1863 }
 0xad8   :  { %3032 = vrcp.f32 %v1864_v50  ;;  %v1879_v28 = vand.u32 2147483648, %v1864_v50  ;;  %v1877_v20 = vand.u32 2147483647, %v1864_v50  ;;  %vm1873_vm5 = vweird.f32 %v1864_v50 }
 0xada   :  { %v1880_v54 = vor.u32 1.1754944e-38, %v1879_v28  ;;  %vm1878_vm7 = vcmp.eq.f32.partialorder %v1877_v20, 8.507059e+37 }
 0xade   :  { %v3033_v51 = vpop.eup %3032 }
 0xadf   :  { %v1869_v52 = vmul.f32 %v3033_v51, %v1864_v50  ;;  %vm1874_vm1 = vweird.f32 %v3033_v51 }
 0xae0   :  { %vm1875_vm6 = vmor %vm1873_vm5, %vm1874_vm1 }
 0xae1   :  { %v1870_v49 = vsub.f32 1.0, %v1869_v52 }
 0xae3   :  { %v1871_v17 = vmul.f32 %v3033_v51, %v1870_v49 }
 0xae5   :  { %v1872_v53 = vadd.f32 %v3033_v51, %v1871_v17 }
 0xae7   :  { %v1876_v55 = vsel %vm1875_vm6, %v3033_v51, %v1872_v53 }
 0xae8   :  { %v1881_v58 = vsel %vm1878_vm7, %v1880_v54, %v1876_v55 }
 0xae9   :  { %v1882_v16 = vmul.f32 %v2873_v57, %v1881_v58 }
 0xaeb   :  { %v1883_v43 = vmul.f32 %v3029_v36, %v1882_v16  ;;  %v2979_v16 = vld [vmem:[#allocation20 + $0x2] ss:$0 sm:$0xff] }
 0xaed   :  { %2874 = vmatmul.msk.f32.vlgmr.msrb.gmra.mxu2 %vm642_vm4, %v1883_v43 }
 0xaee   :  { %2221 = vmatpush.msrb.mxu2 %v4021_v59 }
 0xb44   :  { %v1947_v34 = vpop.xlane.xlu1 %1946 }
 0xb45   :  { %3034 = vrcp.f32 %v1947_v34  ;;  %v1962_v22 = vand.u32 2147483648, %v1947_v34  ;;  %v1960_v23 = vand.u32 2147483647, %v1947_v34  ;;  %vm1956_vm10 = vweird.f32 %v1947_v34 }
 0xb47   :  { %v1963_v2 = vor.u32 1.1754944e-38, %v1962_v22  ;;  %vm1961_vm12 = vcmp.eq.f32.partialorder %v1960_v23, 8.507059e+37  ;;  %v3076_v22 = vld [vmem:[#allocation2] sm:$0xff] }
 0xb4b   :  { %v3035_v61 = vpop.eup %3034 }
 0xb4c   :  { %v1952_v62 = vmul.f32 %v3035_v61, %v1947_v34  ;;  %vm1957_vm8 = vweird.f32 %v3035_v61 }
 0xb4d   :  { %vm1958_vm11 = vmor %vm1956_vm10, %vm1957_vm8 }
 0xb4e   :  { %v1953_v63 = vsub.f32 1.0, %v1952_v62 }
 0xb50   :  { %v1954_v0 = vmul.f32 %v3035_v61, %v1953_v63 }
 0xb52   :  { %v1955_v35 = vadd.f32 %v3035_v61, %v1954_v0 }
 0xb54   :  { %v1959_v3 = vsel %vm1958_vm11, %v3035_v61, %v1955_v35  ;;  %v2397_v35 = vld [vmem:[#allocation23 + $0xb8] sm:$0xff] }
 0xb55   :  { %v1964_v6 = vsel %vm1961_vm12, %v1963_v2, %v1959_v3  ;;  %v2396_v2 = vld [vmem:[#allocation23 + $0xb0] sm:$0xff] }
 0xb56   :  { %v1965_v7 = vmul.f32 %v2878_v5, %v1964_v6  ;;  %v2395_v5 = vld [vmem:[#allocation23 + $0xa8] sm:$0xff]  ;;  %v2394_v6 = vld [vmem:[#allocation23 + $0xa0] sm:$0xff] }
 0xb58   :  { %v1966_v31 = vmul.f32 %v3031_v11, %v1965_v7 }
 0xb5a   :  { %2879 = vmatmul.msk.f32.vlgmr.msrb.gmra.mxu1 %vm642_vm4, %v1966_v31 }
 0xb5b   :  { %2382 = vmatpush.msrb.mxu1 %v2369_v8 }
 0xb5d   :  { %2383 = vmatpush.msrb.mxu1 %v2368_v9 }
 0xb5f   :  { %2384 = vmatpush.msrb.mxu1 %v2367_v10 }
 0xb61   :  { %2385 = vmatpush.msrb.mxu1 %v2366_v15 }
 0xb62   :  { %2885 = vmatmul.msk.f32.vlgmr.msra.gmra.mxu1 %vm642_vm4, %v4028_v37 }
 0xb6a   :  { %2886 = vmatmul.msk.f32.gmra.mxu1 %vm642_vm4, %v4033_v18 }
 0xb70   :  { %v1904_v42 = vpop.f32.mrf.mxu2 }
 0xb72   :  { %2898 = vmatmul.msk.f32.vlgmr.msrb.gmra.mxu1 %vm332_vm3, %v3978_v30  ;;  %v4052_v30 = vld [vmem:[%s4297_s17 + $0x8] sm:$0xff]  ;;  %s2881_s17 = sld [smem:[#allocation26 + $0x80]] }
 0xb78   :  { %s2049_s12 = ssub.f32 1.0, %s2881_s17  ;;  %v2047_v34 = vstv %s2881_s17 }
 0xb7a   :  { %2899 = vmatmul.msk.f32.gmra.mxu1 %vm332_vm3, %v3984_v25  ;;  %v2050_v61 = vstv %s2049_s12 }
 0xb7b   :  { %v2051_v0 = vmul.f32 %v3076_v22, %v2050_v61 }
 0xbd7   :  { %v1995_v19 = vpop.f32.mrf.mxu1 }
 0xbd8   :  { %1999 = vrot.lane.b32.xlu2 %v1995_v19, %s3451_s8 }
 0xbdf   :  { %v2138_v21 = vpop.f32.mrf.mxu1 }
 0xbe0   :  { %v2139_v41 = vadd.f32 %v2138_v21, %v4045_v14 }
 0xbe2   :  { %v2144_v4 = vsel %vm958_vm15, %v2139_v41, -inf }
 0xbe3   :  { %2145 = vmax.xlane.f32.xlu1 %v2144_v4 }
 0xbe7   :  { %v2141_v25 = vpop.f32.mrf.mxu1 }
 0xbe8   :  { %v2142_v24 = vadd.f32 %v2141_v25, %v4052_v30 }
 0xbea   :  { %v2147_v26 = vsel %vm958_vm15, %v2142_v24, -inf }
 0xbeb   :  { %2148 = vmax.xlane.f32.xlu0 %v2147_v26 }
 0xbef   :  { %v2387_v27 = vpop.f32.mrf.mxu1 }
 0xbf7   :  { %v2390_v29 = vpop.f32.mrf.mxu1 }
 0xbf8   :  { %2902 = vmatpush.xpose.msk.msra.mxu3 %vm642_vm4, %v2390_v29 }
 0xbfc   :  { %2539 = vrot.lane.b32.xlu1 %v2390_v29, %s3464_s23  ;;  %2903 = vmatpush.xpose.msk.msra.mxu3 %vm642_vm4, %v2387_v27 }
 0xbff   :  { %2537 = vrot.lane.b32.xlu0 %v2387_v27, %s3464_s23 }
 0xc04   :  { %2229 = vrot.lane.b32.xlu1 %v4028_v37, %s3464_s23 }
 0xc07   :  { %2231 = vrot.lane.b32.xlu0 %v4033_v18, %s3464_s23 }
 0xc32   :  { %v2000_v32 = vpop.permute.xlu2 %1999 }
 0xc33   :  { %v2002_v36 = vsel %vm642_vm4, %v1904_v42, %v2000_v32 }
 0xc34   :  { %v2005_v33 = vmul.f32 0.044715, %v2002_v36  ;;  %v2004_v45 = vmul.f32 0.5, %v2002_v36 }
 0xc36   :  { %v2006_v38 = vmul.f32 %v2005_v33, %v2002_v36 }
 0xc38   :  { %v2007_v39 = vmul.f32 %v2006_v38, %v2002_v36 }
 0xc3a   :  { %v2008_v46 = vadd.f32 %v2007_v39, %v2002_v36 }
 0xc3c   :  { %v2009_v40 = vmul.f32 0.7978846, %v2008_v46 }
 0xc3e   :  { %3036 = vtanh.f32 %v2009_v40 }
 0xc44   :  { %v3037_v44 = vpop.eup %3036 }
 0xc45   :  { %v2011_v13 = vadd.f32 1.0, %v3037_v44 }
 0xc47   :  { %v2012_v47 = vmul.f32 %v2011_v13, %v2004_v45  ;;  %v2421_v45 = vld [vmem:[#allocation24] sm:$0xff] }
 0xc49   :  { %2880 = vmatmul.msk.f32.vlgmr.msra.gmra.mxu2 %vm332_vm3, %v2012_v47 }
 0xc4a   :  { %2410 = vmatpush.msra.mxu2 %v2397_v35 }
 0xc4c   :  { %2411 = vmatpush.msra.mxu2 %v2396_v2 }
 0xc4e   :  { %2412 = vmatpush.msra.mxu2 %v2395_v5 }
 0xc50   :  { %2413 = vmatpush.msra.mxu2 %v2394_v6 }
 0xc56   :  { %v4066_v11 = vpop.xlane.xlu1 %2145 }
 0xc57   :  { %v2150_v48 = vsub.f32 %v2139_v41, %v4066_v11  ;;  %vm2162_vm14 = vcmp.gt.f32.partialorder %v4066_v11, -1e+20 }
 0xc58   :  { %v2887_v4 = vsel %vm2162_vm14, 1.0, %v3465_v60 }
 0xc59   :  { %v2152_v50 = vmul.f32 1.442695, %v2150_v48 }
 0xc5b   :  { %3038 = vpow2.f32 %v2152_v50  ;;  %v2422_v50 = vld [vmem:[#allocation24 + $0x8] sm:$0xff] }
 0xc5e   :  { %v4069_v51 = vpop.xlane.xlu0 %2148 }
 0xc5f   :  { %v2151_v52 = vsub.f32 %v2142_v24, %v4069_v51  ;;  %vm2163_vm6 = vcmp.gt.f32.partialorder %v4069_v51, -1e+20 }
 0xc60   :  { %v2888_v39 = vsel %vm2163_vm6, 1.0, %v3465_v60 }
 0xc61   :  { %v4072_v49 = vpop.eup %3038  ;;  %v2154_v28 = vmul.f32 1.442695, %v2151_v52 }
 0xc62   :  { %v2156_v17 = vsel %vm958_vm15, %v4072_v49, 0.0 }
 0xc63   :  { %3040 = vpow2.f32 %v2154_v28  ;;  %2157 = vadd.xlane.f32.xlu1 %v2156_v17 }
 0xc69   :  { %v4076_v20 = vpop.eup %3040 }
 0xc6a   :  { %v2159_v53 = vsel %vm958_vm15, %v4076_v20, 0.0 }
 0xc6b   :  { %2160 = vadd.xlane.f32.xlu0 %v2159_v53 }
 0xc6e   :  { %v2540_v54 = vpop.permute.xlu1 %2539 }
 0xc6f   :  { %2910 = vmatpush.xpose.msk.msra.mxu1 %vm642_vm4, %v2540_v54 }
 0xc71   :  { %v2538_v55 = vpop.permute.xlu0 %2537 }
 0xc73   :  { %2911 = vmatpush.xpose.msk.msra.mxu1 %vm642_vm4, %v2538_v55 }
 0xc76   :  { %v2230_v57 = vpop.permute.xlu1 %2229 }
 0xc77   :  { %2892 = vmatmul.msk.f32.vlgmr.msrb.gmra.mxu3 %vm642_vm4, %v2230_v57  ;;  %2912 = vmatmul.msk.f32.vlgmr.msra.gmra.mxu1 %vm642_vm4, %v2230_v57 }
 0xc79   :  { %v2232_v58 = vpop.permute.xlu0 %2231 }
 0xc7f   :  { %2893 = vmatmul.msk.f32.gmra.mxu3 %vm642_vm4, %v2232_v58  ;;  %2913 = vmatmul.msk.f32.gmra.mxu1 %vm642_vm4, %v2232_v58 }
 0xc87   :  { %2904 = vmatmul.msk.f32.vlgmr.msra.gmra.mxu3 %vm642_vm4, %v4028_v37 }
 0xc8f   :  { %2905 = vmatmul.msk.f32.gmra.mxu3 %vm642_vm4, %v4033_v18 }
 0xccc   :  { %v2043_v43 = vpop.f32.mrf.mxu2 }
 0xccd   :  { %v2044_v62 = vadd.f32 %v2979_v16, %v2043_v43 }
 0xccf   :  { %v2048_v63 = vmul.f32 %v2047_v34, %v2044_v62 }
 0xcd1   :  { %v2052_v23 = vadd.f32 %v2051_v0, %v2048_v63 }
 0xcd3   :  { %2053 = vst.msk [vmem:[#allocation2] sm:$0xff] %vm332_vm3, %v2052_v23 }
 0xcd6   :  { %v2158_v3 = vpop.xlane.xlu1 %2157 }
 0xcd7   :  { %3042 = vrcp.f32 %v2158_v3  ;;  %v2179_v12 = vand.u32 2147483648, %v2158_v3  ;;  %v2177_v15 = vand.u32 2147483647, %v2158_v3  ;;  %vm2173_vm0 = vweird.f32 %v2158_v3 }
 0xcd9   :  { %v2180_v19 = vor.u32 1.1754944e-38, %v2179_v12  ;;  %vm2178_vm2 = vcmp.eq.f32.partialorder %v2177_v15, 8.507059e+37 }
 0xcdd   :  { %v3043_v7 = vpop.eup %3042 }
 0xcde   :  { %v2169_v31 = vmul.f32 %v3043_v7, %v2158_v3  ;;  %v2161_v8 = vpop.xlane.xlu0 %2160  ;;  %vm2174_vm13 = vweird.f32 %v3043_v7 }
 0xcdf   :  { %3044 = vrcp.f32 %v2161_v8  ;;  %vm2175_vm1 = vmor %vm2173_vm0, %vm2174_vm13  ;;  %v2194_v27 = vand.u32 2147483648, %v2161_v8  ;;  %v2192_v42 = vand.u32 2147483647, %v2161_v8  ;;  %vm2188_vm7 = vweird.f32 %v2161_v8 }
 0xce0   :  { %v2170_v9 = vsub.f32 1.0, %v2169_v31 }
 0xce1   :  { %v2195_v33 = vor.u32 1.1754944e-38, %v2194_v27  ;;  %vm2193_vm9 = vcmp.eq.f32.partialorder %v2192_v42, 8.507059e+37 }
 0xce2   :  { %v2171_v10 = vmul.f32 %v3043_v7, %v2170_v9 }
 0xce4   :  { %v2172_v37 = vadd.f32 %v3043_v7, %v2171_v10 }
 0xce5   :  { %v3045_v18 = vpop.eup %3044 }
 0xce6   :  { %v2176_v21 = vsel %vm2175_vm1, %v3043_v7, %v2172_v37  ;;  %v2184_v41 = vmul.f32 %v3045_v18, %v2161_v8  ;;  %vm2189_vm5 = vweird.f32 %v3045_v18 }
 0xce7   :  { %v2181_v25 = vsel %vm2178_vm2, %v2180_v19, %v2176_v21  ;;  %vm2190_vm8 = vmor %vm2188_vm7, %vm2189_vm5 }
 0xce8   :  { %v2182_v24 = vmul.f32 %v2887_v4, %v2181_v25  ;;  %v2185_v26 = vsub.f32 1.0, %v2184_v41 }
 0xcea   :  { %v2186_v29 = vmul.f32 %v3045_v18, %v2185_v26  ;;  %v2198_v32 = vmul.f32 %v4072_v49, %v2182_v24 }
 0xcec   :  { %v2187_v36 = vadd.f32 %v3045_v18, %v2186_v29  ;;  %2889 = vmatmul.msk.f32.vlgmr.msrb.gmra.mxu2 %vm958_vm15, %v2198_v32 }
 0xcee   :  { %v2191_v38 = vsel %vm2190_vm8, %v3045_v18, %v2187_v36 }
 0xcef   :  { %v2196_v46 = vsel %vm2193_vm9, %v2195_v33, %v2191_v38 }
 0xcf0   :  { %v2197_v40 = vmul.f32 %v2888_v39, %v2196_v46 }
 0xcf2   :  { %v2199_v44 = vmul.f32 %v4076_v20, %v2197_v40 }
 0xcf4   :  { %2890 = vmatmul.msk.f32.gmra.mxu2 %vm958_vm15, %v2199_v44  ;;  %v2562_v13 = vpop.f32.mrf.mxu1 }
 0xcf5   :  { %v2563_v47 = vadd.f32 %v2562_v13, %v2421_v45 }
 0xcf7   :  { %v2568_v11 = vsel %vm642_vm4, %v2563_v47, -inf }
 0xcf8   :  { %2569 = vmax.xlane.f32.xlu2 %v2568_v11 }
 0xcfa   :  { %v2258_v48 = vpop.f32.mrf.mxu3 }
 0xcfb   :  { %v2259_v51 = vadd.f32 %v2258_v48, %v4045_v14 }
 0xcfc   :  { %2900 = vmatmul.msk.f32.vlgmr.msra.gmra.mxu2 %vm332_vm3, %v3982_v56  ;;  %v2565_v52 = vpop.f32.mrf.mxu1 }
 0xcfd   :  { %v2566_v49 = vadd.f32 %v2565_v52, %v2422_v50  ;;  %v2264_v28 = vsel %vm958_vm15, %v2259_v51, -inf }
 0xcfe   :  { %2265 = vmax.xlane.f32.xlu1 %v2264_v28 }
 0xcff   :  { %v2571_v17 = vsel %vm642_vm4, %v2566_v49, -inf }
 0xd00   :  { %2572 = vmax.xlane.f32.xlu0 %v2571_v17 }
 0xd02   :  { %v2261_v20 = vpop.f32.mrf.mxu3 }
 0xd03   :  { %v2262_v53 = vadd.f32 %v2261_v20, %v4052_v30 }
 0xd04   :  { %2901 = vmatmul.msk.f32.gmra.mxu2 %vm332_vm3, %v3990_v1 }
 0xd05   :  { %v2267_v54 = vsel %vm958_vm15, %v2262_v53, -inf }
 0xd06   :  { %2268 = vmax.xlane.f32.xlu2 %v2267_v54 }
 0xd0a   :  { %v2446_v14 = vpop.f32.mrf.mxu3 }
 0xd0b   :  { %v2447_v55 = vadd.f32 %v2446_v14, %v2421_v45 }
 0xd0d   :  { %v2452_v56 = vsel %vm642_vm4, %v2447_v55, -inf }
 0xd0e   :  { %2453 = vmax.xlane.f32.xlu1 %v2452_v56 }
 0xd12   :  { %v2449_v57 = vpop.f32.mrf.mxu3 }
 0xd13   :  { %v2450_v58 = vadd.f32 %v2449_v57, %v2422_v50 }
 0xd15   :  { %v2455_v16 = vsel %vm642_vm4, %v2450_v58, -inf }
 0xd16   :  { %2456 = vmax.xlane.f32.xlu2 %v2455_v16 }
 0xd6b   :  { %v4111_v43 = vpop.xlane.xlu2 %2569 }
 0xd6c   :  { %v2574_v30 = vsub.f32 %v2563_v47, %v4111_v43  ;;  %vm2586_vm14 = vcmp.gt.f32.partialorder %v4111_v43, -1e+20 }
 0xd6e   :  { %v2576_v34 = vmul.f32 1.442695, %v2574_v30 }
 0xd6f   :  { %v4119_v63 = vpop.f32.mrf.mxu2 }
 0xd70   :  { %3046 = vpow2.f32 %v2576_v34 }
 0xd71   :  { %v4114_v1 = vpop.xlane.xlu1 %2265 }
 0xd72   :  { %v2270_v61 = vsub.f32 %v2259_v51, %v4114_v1  ;;  %vm2282_vm11 = vcmp.gt.f32.partialorder %v4114_v1, -1e+20 }
 0xd73   :  { %v4117_v62 = vpop.xlane.xlu0 %2572 }
 0xd74   :  { %v2272_v22 = vmul.f32 1.442695, %v2270_v61  ;;  %v2575_v0 = vsub.f32 %v2566_v49, %v4117_v62 }
 0xd76   :  { %v4122_v23 = vpop.eup %3046  ;;  %3048 = vpow2.f32 %v2272_v22  ;;  %v2578_v35 = vmul.f32 1.442695, %v2575_v0 }
 0xd77   :  { %v2580_v2 = vsel %vm642_vm4, %v4122_v23, 0.0  ;;  %v4135_v9 = vpop.f32.mrf.mxu2 }
 0xd78   :  { %3050 = vpow2.f32 %v2578_v35  ;;  %2581 = vadd.xlane.f32.xlu0 %v2580_v2  ;;  %v2914_v35 = vsel %vm2586_vm14, 1.0, %v3465_v60 }
 0xd79   :  { %v4126_v3 = vpop.xlane.xlu2 %2268 }
 0xd7a   :  { %v2271_v5 = vsub.f32 %v2262_v53, %v4126_v3  ;;  %vm2283_vm8 = vcmp.gt.f32.partialorder %v4126_v3, -1e+20  ;;  %v2746_v3 = vld [vmem:[%s4299_s19 + $0x18] sm:$0xff] }
 0xd7c   :  { %v4129_v6 = vpop.eup %3048  ;;  %v2274_v7 = vmul.f32 1.442695, %v2271_v5 }
 0xd7d   :  { %v2276_v31 = vsel %vm958_vm15, %v4129_v6, 0.0 }
 0xd7e   :  { %v4133_v8 = vpop.eup %3050  ;;  %3052 = vpow2.f32 %v2274_v7  ;;  %2277 = vadd.xlane.f32.xlu1 %v2276_v31 }
 0xd7f   :  { %v2583_v12 = vsel %vm642_vm4, %v4133_v8, 0.0  ;;  %v4146_v21 = vpop.f32.mrf.mxu2 }
 0xd80   :  { %2584 = vadd.xlane.f32.xlu0 %v2583_v12 }
 0xd81   :  { %v4139_v10 = vpop.xlane.xlu1 %2453 }
 0xd82   :  { %v2458_v15 = vsub.f32 %v2447_v55, %v4139_v10  ;;  %v2894_v55 = vsel %vm2282_vm11, 1.0, %v3465_v60  ;;  %vm2587_vm11 = vcmp.gt.f32.partialorder %v4117_v62, -1e+20 }
 0xd84   :  { %v4142_v37 = vpop.eup %3052  ;;  %v2460_v18 = vmul.f32 1.442695, %v2458_v15 }
 0xd85   :  { %v2279_v19 = vsel %vm958_vm15, %v4142_v37, 0.0 }
 0xd86   :  { %3054 = vpow2.f32 %v2460_v18  ;;  %2280 = vadd.xlane.f32.xlu2 %v2279_v19 }
 0xd87   :  { %v4155_v27 = vpop.f32.mrf.mxu2 }
 0xd88   :  { %v2958_v42 = vpack.i.bf16 %v4146_v21, %v4155_v27 }
 0xd89   :  { %v4148_v41 = vpop.xlane.xlu2 %2456 }
 0xd8a   :  { %v2459_v4 = vsub.f32 %v2450_v58, %v4148_v41 }
 0xd8c   :  { %v4151_v25 = vpop.eup %3054  ;;  %v2462_v24 = vmul.f32 1.442695, %v2459_v4 }
 0xd8d   :  { %v2464_v26 = vsel %vm642_vm4, %v4151_v25, 0.0 }
 0xd8e   :  { %3056 = vpow2.f32 %v2462_v24  ;;  %2465 = vadd.xlane.f32.xlu2 %v2464_v26 }
 0xd94   :  { %v4157_v29 = vpop.eup %3056  ;;  %2321 = vrot.lane.b32.xlu0 %v4021_v59, %s3464_s23 }
 0xd95   :  { %v2467_v32 = vsel %vm642_vm4, %v4157_v29, 0.0 }
 0xd96   :  { %2468 = vadd.xlane.f32.xlu2 %v2467_v32 }
 0xd97   :  { %2959 = vrot.lane.b32.xlu1 %v2958_v42, %s3464_s23  ;;  %v2895_v42 = vsel %vm2283_vm8, 1.0, %v3465_v60 }
 0xdeb   :  { %v2582_v36 = vpop.xlane.xlu0 %2581 }
 0xdec   :  { %3058 = vrcp.f32 %v2582_v36  ;;  %v2603_v17 = vand.u32 2147483648, %v2582_v36  ;;  %vm2597_vm0 = vweird.f32 %v2582_v36  ;;  %v2601_v54 = vand.u32 2147483647, %v2582_v36 }
 0xdee   :  { %v2604_v61 = vor.u32 1.1754944e-38, %v2603_v17  ;;  %vm2602_vm6 = vcmp.eq.f32.partialorder %v2601_v54, 8.507059e+37  ;;  %v2915_v17 = vsel %vm2587_vm11, 1.0, %v3465_v60  ;;  %v2743_v54 = vld [vmem:[%s4299_s19] sm:$0xff] }
 0xdf1   :  { %v2278_v33 = vpop.xlane.xlu1 %2277 }
 0xdf2   :  { %v3059_v38 = vpop.eup %3058  ;;  %3060 = vrcp.f32 %v2278_v33  ;;  %v2299_v50 = vand.u32 2147483648, %v2278_v33  ;;  %v2297_v52 = vand.u32 2147483647, %v2278_v33  ;;  %vm2293_vm13 = vweird.f32 %v2278_v33 }
 0xdf3   :  { %v2593_v39 = vmul.f32 %v3059_v38, %v2582_v36  ;;  %v4166_v46 = vpop.xlane.xlu0 %2584  ;;  %vm2598_vm12 = vweird.f32 %v3059_v38 }
 0xdf4   :  { %3062 = vrcp.f32 %v4166_v46  ;;  %v2300_v14 = vor.u32 1.1754944e-38, %v2299_v50  ;;  %vm4179_vm2 = vmor %vm2597_vm0, %vm2598_vm12  ;;  %vm2298_vm5 = vcmp.eq.f32.partialorder %v2297_v52, 8.507059e+37  ;;  %v2616_v43 = vand.u32 2147483647, %v4166_v46 }
 0xdf5   :  { %v2594_v59 = vsub.f32 1.0, %v2593_v39  ;;  %v2618_v19 = vand.u32 2147483648, %v4166_v46  ;;  %vm2612_vm12 = vweird.f32 %v4166_v46 }
 0xdf7   :  { %v2595_v47 = vmul.f32 %v3059_v38, %v2594_v59 }
 0xdf8   :  { %v3061_v40 = vpop.eup %3060 }
 0xdf9   :  { %v2289_v44 = vmul.f32 %v3061_v40, %v2278_v33  ;;  %v4169_v45 = vpop.xlane.xlu2 %2280  ;;  %vm2294_vm10 = vweird.f32 %v3061_v40  ;;  %v2596_v49 = vadd.f32 %v3059_v38, %v2595_v47  ;;  %v2745_v47 = vld [vmem:[%s4299_s19 + $0x10] sm:$0xff] }
 0xdfa   :  { %v4171_v13 = vpop.eup %3062  ;;  %3064 = vrcp.f32 %v4169_v45  ;;  %vm2295_vm1 = vmor %vm2293_vm13, %vm2294_vm10  ;;  %v2314_v2 = vand.u32 2147483648, %v4169_v45  ;;  %v2312_v15 = vand.u32 2147483647, %v4169_v45  ;;  %vm2308_vm10 = vweird.f32 %v4169_v45 }
 0xdfb   :  { %v2290_v11 = vsub.f32 1.0, %v2289_v44  ;;  %v2608_v48 = vmul.f32 %v4171_v13, %v4166_v46  ;;  %v2600_v30 = vsel %vm4179_vm2, %v3059_v38, %v2596_v49  ;;  %vm2613_vm9 = vweird.f32 %v4171_v13 }
 0xdfc   :  { %v2605_v5 = vsel %vm2602_vm6, %v2604_v61, %v2600_v30  ;;  %vm4215_vm14 = vmor %vm2612_vm12, %vm2613_vm9  ;;  %v2315_v36 = vor.u32 1.1754944e-38, %v2314_v2  ;;  %vm2313_vm0 = vcmp.eq.f32.partialorder %v2312_v15, 8.507059e+37  ;;  %v2619_v44 = vor.u32 1.1754944e-38, %v2618_v19  ;;  %v2695_v19 = vld [vmem:[#allocation18 + $0x78] sm:$0xff] }
 0xdfd   :  { %v2291_v51 = vmul.f32 %v3061_v40, %v2290_v11  ;;  %v2609_v28 = vsub.f32 1.0, %v2608_v48  ;;  %vm2471_vm9 = vcmp.gt.f32.partialorder %v4148_v41, -1e+20  ;;  %2719 = vmatpush.msrb.mxu3 %v2695_v19 }
 0xdff   :  { %v2292_v20 = vadd.f32 %v3061_v40, %v2291_v51  ;;  %v2610_v1 = vmul.f32 %v4171_v13, %v2609_v28  ;;  %v2744_v28 = vld [vmem:[%s4299_s19 + $0x8] sm:$0xff] }
 0xe00   :  { %v3065_v53 = vpop.eup %3064 }
 0xe01   :  { %v2296_v57 = vsel %vm2295_vm1, %v3061_v40, %v2292_v20  ;;  %v2304_v58 = vmul.f32 %v3065_v53, %v4169_v45  ;;  %v4184_v16 = vpop.xlane.xlu2 %2465  ;;  %vm2309_vm7 = vweird.f32 %v3065_v53  ;;  %v2611_v12 = vadd.f32 %v4171_v13, %v2610_v1 }
 0xe02   :  { %v2301_v34 = vsel %vm2298_vm5, %v2300_v14, %v2296_v57  ;;  %3066 = vrcp.f32 %v4184_v16  ;;  %vm4205_vm13 = vmor %vm2308_vm10, %vm2309_vm7  ;;  %vm2617_vm1 = vcmp.eq.f32.partialorder %v2616_v43, 8.507059e+37  ;;  %v2487_v11 = vand.u32 2147483648, %v4184_v16 }
 0xe03   :  { %v2302_v22 = vmul.f32 %v2894_v55, %v2301_v34  ;;  %v2305_v0 = vsub.f32 1.0, %v2304_v58  ;;  %v2615_v40 = vsel %vm4215_vm14, %v4171_v13, %v2611_v12  ;;  %v2485_v13 = vand.u32 2147483647, %v4184_v16 }
 0xe04   :  { %v2620_v49 = vsel %vm2617_vm1, %v2619_v44, %v2615_v40  ;;  %vm2470_vm5 = vcmp.gt.f32.partialorder %v4139_v10, -1e+20  ;;  %vm2481_vm6 = vweird.f32 %v4184_v16 }
 0xe05   :  { %v2306_v7 = vmul.f32 %v3065_v53, %v2305_v0  ;;  %v2318_v31 = vmul.f32 %v4129_v6, %v2302_v22  ;;  %v2606_v6 = vmul.f32 %v2914_v35, %v2605_v5  ;;  %vm2486_vm8 = vcmp.eq.f32.partialorder %v2485_v13, 8.507059e+37 }
 0xe06   :  { %v2322_v18 = vpop.permute.xlu0 %2321  ;;  %v2906_v10 = vsel %vm2470_vm5, 1.0, %v3465_v60  ;;  %v2907_v35 = vsel %vm2471_vm9, 1.0, %v3465_v60 }
 0xe07   :  { %v2307_v4 = vadd.f32 %v3065_v53, %v2306_v7  ;;  %2345 = vmatpush.msrb.mxu0 %v2322_v18  ;;  %v2622_v50 = vmul.f32 %v4122_v23, %v2606_v6  ;;  %v2692_v6 = vld [vmem:[#allocation18 + $0x60] sm:$0xff] }
 0xe08   :  { %v3067_v24 = vpop.eup %3066  ;;  %2896 = vmatmul.msk.f32.vlgmr.msrb.gmra.mxu0 %vm958_vm15, %v2318_v31 }
 0xe09   :  { %v2477_v33 = vmul.f32 %v3067_v24, %v4184_v16  ;;  %2528 = vmatpush.msra.mxu0 %v4155_v27  ;;  %v2960_v38 = vpop.permute.xlu1 %2959  ;;  %v2469_v39 = vpop.xlane.xlu2 %2468  ;;  %v2311_v46 = vsel %vm4205_vm13, %v3065_v53, %v2307_v4  ;;  %vm2482_vm2 = vweird.f32 %v3067_v24  ;;  %v2488_v53 = vor.u32 1.1754944e-38, %v2487_v11  ;;  %v2694_v4 = vld [vmem:[#allocation18 + $0x70] sm:$0xff] }
 0xe0a   :  { %v2961_v59 = vunpack.i.l.bf16 %v2960_v38  ;;  %3068 = vrcp.f32 %v2469_v39  ;;  %v2316_v27 = vsel %vm2313_vm0, %v2315_v36, %v2311_v46  ;;  %v2962_v48 = vunpack.i.h.bf16 %v2960_v38  ;;  %vm2483_vm7 = vmor %vm2481_vm6, %vm2482_vm2  ;;  %2720 = vmatpush.msrb.mxu3 %v2694_v4 }
 0xe0b   :  { %v2478_v45 = vsub.f32 1.0, %v2477_v33  ;;  %2529 = vmatpush.msra.mxu0 %v4146_v21  ;;  %v2317_v51 = vmul.f32 %v2895_v42, %v2316_v27  ;;  %v2502_v58 = vand.u32 2147483648, %v2469_v39  ;;  %v2500_v34 = vand.u32 2147483647, %v2469_v39 }
 0xe0c   :  { %2652 = vmatpush.msrb.mxu2 %v2961_v59  ;;  %vm2496_vm10 = vweird.f32 %v2469_v39  ;;  %vm2774_vm13 = vcmask 31744  }
 0xe0d   :  { %2766 = vmatpush.msrb.mxu0 %v2746_v3  ;;  %v2479_v52 = vmul.f32 %v3067_v24, %v2478_v45  ;;  %v2319_v21 = vmul.f32 %v4142_v37, %v2317_v51  ;;  %v2621_v37 = vmul.f32 %v2915_v17, %v2620_v49  ;;  %v2503_v22 = vor.u32 1.1754944e-38, %v2502_v58 }
 0xe0e   :  { %2653 = vmatpush.msrb.mxu2 %v2962_v48  ;;  %vm2501_vm12 = vcmp.eq.f32.partialorder %v2500_v34, 8.507059e+37 }
 0xe0f   :  { %2767 = vmatpush.msrb.mxu0 %v2745_v47  ;;  %v2480_v23 = vadd.f32 %v3067_v24, %v2479_v52  ;;  %2916 = vmatmul.msk.f32.vlgmr.msrb.gmra.mxu2 %vm642_vm4, %v2622_v50  ;;  %v2623_v16 = vmul.f32 %v4133_v8, %v2621_v37 }
 0xe10   :  { %v3069_v20 = vpop.eup %3068  ;;  %2897 = vmatmul.msk.f32.gmra.mxu0 %vm958_vm15, %v2319_v21 }
 0xe11   :  { %v2484_v14 = vsel %vm2483_vm7, %v3067_v24, %v2480_v23  ;;  %v2492_v62 = vmul.f32 %v3069_v20, %v2469_v39  ;;  %2768 = vmatpush.msrb.mxu0 %v2744_v28  ;;  %vm2497_vm15 = vweird.f32 %v3069_v20  ;;  %v2693_v24 = vld [vmem:[#allocation18 + $0x68] sm:$0xff] }
 0xe12   :  { %v2489_v55 = vsel %vm2486_vm8, %v2488_v53, %v2484_v14  ;;  %vm2498_vm11 = vmor %vm2496_vm10, %vm2497_vm15  ;;  %2721 = vmatpush.msrb.mxu3 %v2693_v24 }
 0xe13   :  { %v2490_v56 = vmul.f32 %v2906_v10, %v2489_v55  ;;  %v2493_v57 = vsub.f32 1.0, %v2492_v62  ;;  %2769 = vmatpush.msrb.mxu0 %v2743_v54  ;;  %v3077_v10 = vld [vmem:[#allocation2 + $0x8] sm:$0xff] }
 0xe14   :  { %2722 = vmatpush.msrb.mxu3 %v2692_v6 }
 0xe15   :  { %v2494_v30 = vmul.f32 %v3069_v20, %v2493_v57  ;;  %v2506_v1 = vmul.f32 %v4151_v25, %v2490_v56  ;;  %v2742_v25 = vld [vmem:[#allocation2] sm:$0xff] }
 0xe17   :  { %v2495_v61 = vadd.f32 %v3069_v20, %v2494_v30  ;;  %2917 = vmatmul.msk.f32.gmra.mxu2 %vm642_vm4, %v2623_v16  ;;  %v3078_v30 = vld [vmem:[#allocation2 + $0x10] sm:$0xff] }
 0xe18   :  { %2908 = vmatmul.msk.f32.vlgmr.msra.gmra.mxu0 %vm642_vm4, %v2506_v1 }
 0xe19   :  { %v2499_v0 = vsel %vm2498_vm11, %v3069_v20, %v2495_v61  ;;  %v2981_v20 = vld [vmem:[#allocation20 + $0x3] ss:$0 sm:$0xff] }
 0xe1a   :  { %v2504_v8 = vsel %vm2501_vm12, %v2503_v22, %v2499_v0 }
 0xe1b   :  { %v2505_v2 = vmul.f32 %v2907_v35, %v2504_v8 }
 0xe1d   :  { %v2507_v5 = vmul.f32 %v4157_v29, %v2505_v2  ;;  %v2980_v29 = vld [vmem:[%s4300_s20] ss:$0 sm:$0xff]  ;;  %s2920_s20 = sld [smem:[#allocation26 + $0x81]] }
 0xe20   :  { %2909 = vmatmul.msk.f32.gmra.mxu0 %vm642_vm4, %v2507_v5 }
 0xe23   :  { %v2731_v37 = vstv %s2920_s20 }
 0xe28   :  { %2921 = vmatmul.msk.f32.vlgmr.msrb.gmra.mxu0 %vm332_vm3, %v2742_v25 }
 0xe85   :  { %v2347_v41 = vpop.f32.mrf.mxu0 }
 0xe86   :  { %2355 = vrot.lane.b32.xlu2 %v2347_v41, %s3451_s8 }
 0xe8d   :  { %v2350_v7 = vpop.f32.mrf.mxu0 }
 0xe8e   :  { %2357 = vrot.lane.b32.xlu1 %v2350_v7, %s3451_s8 }
 0xe92   :  { %v2655_v31 = vpop.f32.mrf.mxu2 }
 0xe93   :  { %2663 = vrot.lane.b32.xlu0 %v2655_v31, %s3451_s8 }
 0xe95   :  { %v2531_v12 = vpop.f32.mrf.mxu0 }
 0xe9a   :  { %v2658_v60 = vpop.f32.mrf.mxu2 }
 0xe9b   :  { %2665 = vrot.lane.b32.xlu0 %v2658_v60, %s3451_s8 }
 0xe9d   :  { %v2534_v15 = vpop.f32.mrf.mxu0 }
 0xea5   :  { %v2771_v18 = vpop.f32.mrf.mxu0 }
 0xea6   :  { %v2772_v43 = vadd.f32 %v2980_v29, %v2771_v18 }
 0xea8   :  { %2775 = vst.msk [vmem:[%s4302_s22] sm:$0xff] %vm2774_vm13, %v2772_v43  ;;  %s2734_s22 = ssub.f32 1.0, %s2920_s20 }
 0xeaa   :  { %v2735_v54 = vstv %s2734_s22 }
 0xeab   :  { %v2736_v55 = vmul.f32 %v3077_v10, %v2735_v54  ;;  %v2737_v34 = vmul.f32 %v3078_v30, %v2735_v54 }
 0xee0   :  { %v2356_v26 = vpop.permute.xlu2 %2355 }
 0xee1   :  { %v2361_v32 = vsel %vm642_vm4, %v4119_v63, %v2356_v26 }
 0xf00   :  { %v2358_v39 = vpop.permute.xlu1 %2357 }
 0xf01   :  { %v2362_v40 = vsel %vm642_vm4, %v4135_v9, %v2358_v39 }
 0xf05   :  { %v2664_v42 = vpop.permute.xlu0 %2663 }
 0xf06   :  { %v2669_v36 = vsel %vm642_vm4, %v2531_v12, %v2664_v42 }
 0xf07   :  { %v2671_v33 = vadd.f32 %v2669_v36, %v2361_v32 }
 0xf09   :  { %v2675_v38 = vmul.f32 0.044715, %v2671_v33  ;;  %v2673_v13 = vmul.f32 0.5, %v2671_v33 }
 0xf0b   :  { %v2677_v46 = vmul.f32 %v2675_v38, %v2671_v33 }
 0xf0d   :  { %v2679_v3 = vmul.f32 %v2677_v46, %v2671_v33  ;;  %v2666_v59 = vpop.permute.xlu0 %2665 }
 0xf0e   :  { %v2670_v44 = vsel %vm642_vm4, %v2534_v15, %v2666_v59 }
 0xf0f   :  { %v2681_v45 = vadd.f32 %v2679_v3, %v2671_v33  ;;  %v2672_v27 = vadd.f32 %v2670_v44, %v2362_v40 }
 0xf11   :  { %v2683_v47 = vmul.f32 0.7978846, %v2681_v45  ;;  %v2676_v11 = vmul.f32 0.044715, %v2672_v27  ;;  %v2674_v9 = vmul.f32 0.5, %v2672_v27 }
 0xf13   :  { %3070 = vtanh.f32 %v2683_v47  ;;  %v2678_v48 = vmul.f32 %v2676_v11, %v2672_v27 }
 0xf15   :  { %v2680_v63 = vmul.f32 %v2678_v48, %v2672_v27 }
 0xf17   :  { %v2682_v50 = vadd.f32 %v2680_v63, %v2672_v27 }
 0xf19   :  { %v3071_v51 = vpop.eup %3070  ;;  %v2684_v52 = vmul.f32 0.7978846, %v2682_v50 }
 0xf1a   :  { %v2687_v49 = vadd.f32 1.0, %v3071_v51 }
 0xf1b   :  { %3072 = vtanh.f32 %v2684_v52 }
 0xf1c   :  { %v2689_v21 = vmul.f32 %v2687_v49, %v2673_v13 }
 0xf1e   :  { %2918 = vmatmul.msk.f32.vlgmr.msrb.gmra.mxu3 %vm332_vm3, %v2689_v21 }
 0xf21   :  { %v3073_v28 = vpop.eup %3072 }
 0xf22   :  { %v2688_v17 = vadd.f32 1.0, %v3073_v28 }
 0xf24   :  { %v2690_v23 = vmul.f32 %v2688_v17, %v2674_v9 }
 0xf26   :  { %2919 = vmatmul.msk.f32.gmra.mxu3 %vm332_vm3, %v2690_v23 }
 0xfa1   :  { %v2724_v53 = vpop.f32.mrf.mxu3 }
 0xfa2   :  { %v2725_v14 = vadd.f32 %v2981_v20, %v2724_v53 }
 0xfa4   :  { %v2732_v62 = vmul.f32 %v2731_v37, %v2725_v14 }
 0xfa6   :  { %v2738_v56 = vadd.f32 %v2736_v55, %v2732_v62 }
 0xfa8   :  { %2740 = vst.msk [vmem:[#allocation2 + $0x8] sm:$0xff] %vm332_vm3, %v2738_v56 }
 0xfa9   :  { %v2727_v57 = vpop.f32.mrf.mxu3 }
 0xfaa   :  { %v2728_v58 = vadd.f32 %v2981_v20, %v2727_v57 }
 0xfac   :  { %v2733_v16 = vmul.f32 %v2731_v37, %v2728_v58 }
 0xfae   :  { %v2739_v1 = vadd.f32 %v2737_v34, %v2733_v16 }
 0xfb0   :  { %2741 = vst.msk [vmem:[#allocation2 + $0x10] sm:$0xff] %vm332_vm3, %v2739_v1 }
 0xfb1   :  { %2780 = vsyncpa [#allocation4], 1 }
 0xfb2   :  { %2781 = vsyncpa [#allocation7], 1 }
 0xfb3   :  { %2782 = vsyncpa [#allocation10], 1 }
 0xfb4   :  { %2783 = vsyncpa [#allocation13], 1 }
 0xfb5   :  { %2784 = vsyncpa [#allocation16], 1 }
 0xfb6   :  { %2785 = vsyncpa [#allocation19], 1 }
 0xfb7   :  { %2786 = vsyncpa [#allocation22], 1 }
 0xfb8   :  { %2787 = vsyncpa [#allocation25], 1 }
 0xfb9   :  { %2788 = vsyncpa [#allocation5], 1 }

</bundles_post_ra>
